<compile_context>
chip_gen: v6e
topology: v6e:2x2x1
jax: 0.10.0
libtpu: 0.0.40
codegen_flags: <defaults>
</compile_context>

<pallas_src>
import functools

import jax
import jax.numpy as jnp
from jax.experimental import pallas as pl
from jax.experimental.pallas import tpu as pltpu


_VMEM_LIMIT = 32 * 1024 * 1024  # explicit scoped-VMEM limit (safe on v5e/v6e/v7x)
_COMPILER_PARAMS = pltpu.CompilerParams(vmem_limit_bytes=_VMEM_LIMIT)


def _vmem_specs(n):
    return [pl.BlockSpec(memory_space=pltpu.MemorySpace.VMEM) for _ in range(n)]


def _layer_norm(x, g, b, eps=1e-5):
    mu = jnp.mean(x, axis=-1, keepdims=True)
    var = jnp.mean(jnp.square(x - mu), axis=-1, keepdims=True)
    return (x - mu) * jax.lax.rsqrt(var + eps) * g + b


# ----------------------------------------------------------------------------
# Generator: fused LSTM (packed-seq masking) + fc   -- ONE pallas_call
# ----------------------------------------------------------------------------
def _generator_kernel(x_ref, len_ref, h0_ref, c0_ref, wih_ref, whh_ref, b_ref,
                      fcw_ref, fcb_ref, out_ref, y_scr, *, hidden):
    T, B, d_in = x_ref.shape
    H = hidden

    # Hoisted input projection: one well-shaped matmul off the recurrent path.
    gates_x = jnp.dot(x_ref[...].reshape(T * B, d_in), wih_ref[...],
                      preferred_element_type=jnp.float32) + b_ref[...]   # [T*B, 4H]

    w_hh = whh_ref[...]                 # resident for the whole loop
    lengths = len_ref[...]              # [B, 1] int32
    h = h0_ref[...]                     # [B, H]
    c = c0_ref[...]

    # Fully-unrolled time loop (T is static & small): only h @ W_hh remains on
    # the serialized critical path.
    # TODO(synk): for long sequences switch to lax.fori_loop over a VMEM gate
    # scratch to bound trace size / register live ranges.
    for t in range(T):
        gates = gates_x[t * B:(t + 1) * B, :] + jnp.dot(
            h, w_hh, preferred_element_type=jnp.float32)                 # [B, 4H]
        i_g = jax.nn.sigmoid(gates[:, 0 * H:1 * H])                      # PyTorch i,f,g,o
        f_g = jax.nn.sigmoid(gates[:, 1 * H:2 * H])
        g_g = jnp.tanh(gates[:, 2 * H:3 * H])
        o_g = jax.nn.sigmoid(gates[:, 3 * H:4 * H])
        c_new = f_g * c + i_g * g_g
        h_new = o_g * jnp.tanh(c_new)
        m = (lengths > t).astype(jnp.float32)                            # [B, 1]
        h = m * h_new + (1.0 - m) * h
        c = m * c_new + (1.0 - m) * c
        y_scr[t] = m * h_new            # pad_packed_sequence zeros padded steps

    # Fused fc epilogue: one matmul over the whole [T*B, H] slab.
    out = jnp.dot(y_scr[...].reshape(T * B, H), fcw_ref[...],
                  preferred_element_type=jnp.float32) + fcb_ref[...]
    out_ref[...] = out.reshape(T, B, -1).astype(out_ref.dtype)


def generator_forward(p, x, lengths):
    """Generator: LSTM (packed-seq masking) -> dropout(eval) -> fc, one kernel."""
    B, T, _ = x.shape
    H = p["w_hh_t"].shape[0]
    d_out = p["fc_w_t"].shape[1]
    x_tm = jnp.transpose(x, (1, 0, 2))                  # [T, B, Din]
    len2 = lengths.astype(jnp.int32)[:, None]           # [B, 1]
    h0 = jnp.broadcast_to(p["h0"], (B, H))              # h_init.repeat(1, B, 1)
    c0 = jnp.broadcast_to(p["c0"], (B, H))
    out_tm = pl.pallas_call(
        functools.partial(_generator_kernel, hidden=H),
        out_shape=jax.ShapeDtypeStruct((T, B, d_out), jnp.float32),
        in_specs=_vmem_specs(9),
        out_specs=pl.BlockSpec(memory_space=pltpu.MemorySpace.VMEM),
        scratch_shapes=[pltpu.VMEM((T, B, H), jnp.float32)],
        compiler_params=_COMPILER_PARAMS,
    )(x_tm, len2, h0, c0, p["w_ih_t"], p["w_hh_t"], p["b"], p["fc_w_t"], p["fc_b"])
    return jnp.transpose(out_tm, (1, 0, 2))             # [B, T, Dout]


# ----------------------------------------------------------------------------
# Fused self-attention block (LN + QKV + attention + out-proj + residual + LN)
# ----------------------------------------------------------------------------
def _attn_block_kernel(x_ref, mask_ref, wqkv_ref, bqkv_ref, wo_ref, bo_ref,
                       g_ref, b_ref, o_ref, *, n_head, d_head, pre_lnorm):
    B, T, D = x_ref.shape
    xf = x_ref[...].reshape(B * T, D)
    attn_in = _layer_norm(xf, g_ref[...], b_ref[...]) if pre_lnorm else xf

    # Fused QKV projection (concatenated [D, 3D] weight -> one matmul).
    qkv = jnp.dot(attn_in, wqkv_ref[...],
                  preferred_element_type=jnp.float32) + bqkv_ref[...]     # [B*T, 3D]
    qkv = qkv.reshape(B, T, 3 * D)

    key_mask = mask_ref[...]                     # [B, T], 1.0 valid / 0.0 pad
    w_o = wo_ref[...]
    scale = 1.0 / (d_head ** 0.5)

    # Per-head attention.  Accumulating head_h @ Wo[h] is mathematically equal
    # to concat(heads) @ Wo, but avoids an in-kernel lane concatenation.
    o = jnp.zeros((B * T, D), jnp.float32) + bo_ref[...]
    for hd in range(n_head):
        q = qkv[:, :, hd * d_head:(hd + 1) * d_head]
        k = qkv[:, :, D + hd * d_head:D + (hd + 1) * d_head]
        v = qkv[:, :, 2 * D + hd * d_head:2 * D + (hd + 1) * d_head]
        s = jnp.einsum("bqd,bkd->bqk", q, k,
                       preferred_element_type=jnp.float32) * scale        # [B, T, T]
        s = jnp.where(key_mask[:, None, :] > 0.5, s, -1e9)
        s = s - jnp.max(s, axis=-1, keepdims=True)
        p = jnp.exp(s)
        p = p * pl.reciprocal(jnp.sum(p, axis=-1, keepdims=True), approx=True)
        ah = jnp.einsum("bqk,bkd->bqd", p, v,
                        preferred_element_type=jnp.float32)               # [B, T, dh]
        o = o + jnp.dot(ah.reshape(B * T, d_head),
                        w_o[hd * d_head:(hd + 1) * d_head, :],
                        preferred_element_type=jnp.float32)

    y = xf + o
    if not pre_lnorm:
        y = _layer_norm(y, g_ref[...], b_ref[...])
    o_ref[...] = y.reshape(B, T, D).astype(o_ref.dtype)


def attn_block_pallas(x, mask, blk, n_head, pre_lnorm):
    # TODO(synk): Unet_block's U-net down/up-sampling and relative ('rel')
    # positional attention are not defined in the provided source; a standard
    # pre/post-LN masked multi-head self-attention sub-block is used instead.
    # TODO(synk): for long T / real d_model, add a "parallel" grid over batch /
    # q-tiles with flash-style online softmax instead of one whole-array block.
    B, T, D = x.shape
    return pl.pallas_call(
        functools.partial(_attn_block_kernel, n_head=n_head,
                          d_head=D // n_head, pre_lnorm=pre_lnorm),
        out_shape=jax.ShapeDtypeStruct((B, T, D), jnp.float32),
        in_specs=_vmem_specs(8),
        out_specs=pl.BlockSpec(memory_space=pltpu.MemorySpace.VMEM),
        compiler_params=_COMPILER_PARAMS,
    )(x, mask, blk["wqkv"], blk["bqkv"], blk["wo"], blk["bo"],
      blk["ln_g"], blk["ln_b"])


# ----------------------------------------------------------------------------
# Fused position-wise FFN (w1 + ReLU + w2 + residual + LayerNorm)
# ----------------------------------------------------------------------------
def _ffn_kernel(x_ref, w1_ref, b1_ref, w2_ref, b2_ref, g_ref, b_ref, o_ref):
    x = x_ref[...]                                                       # [N, D]
    h = jnp.dot(x, w1_ref[...], preferred_element_type=jnp.float32) + b1_ref[...]
    h = jnp.maximum(h, 0.0)
    h = jnp.dot(h, w2_ref[...], preferred_element_type=jnp.float32) + b2_ref[...]
    o_ref[...] = _layer_norm(x + h, g_ref[...], b_ref[...]).astype(o_ref.dtype)


def ffn_pallas(x, ffn):
    # TODO(synk): FFN_linear's exact definition is not provided; a two-layer
    # position-wise FFN with residual + layer-norm (dropout = eval identity).
    return pl.pallas_call(
        _ffn_kernel,
        out_shape=jax.ShapeDtypeStruct(x.shape, jnp.float32),
        in_specs=_vmem_specs(7),
        out_specs=pl.BlockSpec(memory_space=pltpu.MemorySpace.VMEM),
        compiler_params=_COMPILER_PARAMS,
    )(x, ffn["w1"], ffn["b1"], ffn["w2"], ffn["b2"], ffn["ln_g"], ffn["ln_b"])


# ----------------------------------------------------------------------------
# Plain linear (input projection / refine network)
# ----------------------------------------------------------------------------
def _linear_kernel(x_ref, w_ref, b_ref, o_ref):
    o_ref[...] = (jnp.dot(x_ref[...], w_ref[...],
                          preferred_element_type=jnp.float32)
                  + b_ref[...]).astype(o_ref.dtype)


def linear_pallas(x, w, b):
    """y = x @ w + b.  x: [N, Din], w: [Din, Dout] (pre-transposed), b: [1, Dout]."""
    # TODO(synk): at real sizes, add a row-tiled "parallel" grid (v7x 2 TCs) and
    # pad Dout to a multiple of 128 for lane-dense stores.
    return pl.pallas_call(
        _linear_kernel,
        out_shape=jax.ShapeDtypeStruct((x.shape[0], w.shape[1]), jnp.float32),
        in_specs=_vmem_specs(3),
        out_specs=pl.BlockSpec(memory_space=pltpu.MemorySpace.VMEM),
        compiler_params=_COMPILER_PARAMS,
    )(x, w, b)


# ----------------------------------------------------------------------------
# Module forward passes
# ----------------------------------------------------------------------------
def hand_encoder_forward(p, x, mask, n_block, n_head, pre_lnorm):
    B, T, d_in = x.shape
    d_model = p["lin_w_t"].shape[1]
    h = linear_pallas(x.reshape(B * T, d_in), p["lin_w_t"], p["lin_b"])
    h = h.reshape(B, T, d_model)
    for _ in range(n_block):          # ModuleList([block]*n_block) shares weights
        h = attn_block_pallas(h, mask, p["block"], n_head, pre_lnorm)
    out = ffn_pallas(h.reshape(B * T, d_model), p["ffn"])
    return out.reshape(B, T, d_model)


def movement_net_forward(params, inputs, lengths, *, n_block, n_head, pre_lnorm):
    B, T, _ = inputs.shape
    mask = (jnp.arange(T)[None, :] < lengths[:, None]).astype(jnp.float32)  # [B, T]

    body_output = generator_forward(params["bodynet"], inputs, lengths)
    enc_output = hand_encoder_forward(params["handencoder"], inputs, mask,
                                      n_block, n_head, pre_lnorm)
    rh_output = generator_forward(params["handdecoder"], enc_output, lengths)

    d_model = enc_output.shape[-1]
    rh_refined = linear_pallas(enc_output.reshape(B * T, d_model),
                               params["refine_w_t"],
                               params["refine_b"]).reshape(B, T, 3)
    rh_refined = rh_output[:, :, -3:] + rh_refined
    rh_final = jnp.concatenate([rh_output[:, :, :-3], rh_refined], axis=-1)
    full_output = jnp.concatenate([body_output, rh_final], axis=-1)
    return full_output


# ----------------------------------------------------------------------------
# Deterministic parameter construction (mirrors __init__ / initialize());
# weights are stored pre-transposed ([Din, Dout]) and biases as [1, D].
# ----------------------------------------------------------------------------
def _nrm(key, shape, std=0.02):
    return std * jax.random.normal(key, shape, jnp.float32)


def init_generator_params(key, d_in, d_hidden, d_out):
    k = jax.random.split(key, 3)
    return {
        "w_ih_t": _nrm(k[0], (d_in, 4 * d_hidden)),       # init.normal_(0, 0.02)
        "w_hh_t": _nrm(k[1], (d_hidden, 4 * d_hidden)),
        "b": jnp.zeros((1, 4 * d_hidden), jnp.float32),   # b_ih + b_hh, both 0
        "h0": jnp.zeros((1, d_hidden), jnp.float32),
        "c0": jnp.zeros((1, d_hidden), jnp.float32),
        "fc_w_t": _nrm(k[2], (d_hidden, d_out)),
        "fc_b": jnp.zeros((1, d_out), jnp.float32),
    }


def init_encoder_params(key, d_input, d_model):
    k = jax.random.split(key, 5)
    blk = {
        "wqkv": _nrm(k[0], (d_model, 3 * d_model)),       # concatenated Q|K|V
        "bqkv": jnp.zeros((1, 3 * d_model), jnp.float32),
        "wo": _nrm(k[1], (d_model, d_model)),
        "bo": jnp.zeros((1, d_model), jnp.float32),
        "ln_g": jnp.ones((1, d_model), jnp.float32),
        "ln_b": jnp.zeros((1, d_model), jnp.float32),
    }
    ffn = {
        "w1": _nrm(k[2], (d_model, d_model)),
        "b1": jnp.zeros((1, d_model), jnp.float32),
        "w2": _nrm(k[3], (d_model, d_model)),
        "b2": jnp.zeros((1, d_model), jnp.float32),
        "ln_g": jnp.ones((1, d_model), jnp.float32),
        "ln_b": jnp.zeros((1, d_model), jnp.float32),
    }
    return {
        "lin_w_t": _nrm(k[4], (d_input, d_model)),
        "lin_b": jnp.zeros((1, d_model), jnp.float32),
        "block": blk,
        "ffn": ffn,
    }


def init_movement_net_params(key, d_input, d_output_body, d_output_rh, d_model):
    k = jax.random.split(key, 4)
    return {
        "bodynet": init_generator_params(k[0], d_input, d_model, d_output_body),
        "handencoder": init_encoder_params(k[1], d_input, d_model),
        "handdecoder": init_generator_params(k[2], d_model, d_model, d_output_rh),
        "refine_w_t": _nrm(k[3], (d_model, 3)),
        "refine_b": jnp.zeros((1, 3), jnp.float32),
    }


# ----------------------------------------------------------------------------
if __name__ == "__main__":
    B, T = 2, 8
    d_input, d_model = 16, 32
    d_output_body, d_output_rh = 6, 9
    n_block, n_head = 1, 2
    pre_layernorm = False

    key = jax.random.PRNGKey(0)
    pkey, xkey = jax.random.split(key)
    params = init_movement_net_params(pkey, d_input, d_output_body,
                                      d_output_rh, d_model)

    inputs = jax.random.normal(xkey, (B, T, d_input), jnp.float32)
    lengths = jnp.array([8, 6], jnp.int32)   # sorted descending (pack_padded_sequence)

    fwd = jax.jit(functools.partial(movement_net_forward, n_block=n_block,
                                    n_head=n_head, pre_lnorm=pre_layernorm))
    out = jax.block_until_ready(fwd(params, inputs, lengths))
    assert out.shape == (B, T, d_output_body + d_output_rh), out.shape
    assert bool(jnp.all(jnp.isfinite(out)))
    print("KERNEL_OK")
</pallas_src>

<mosaic_0001>
module attributes {stable_mosaic.version = 11 : i64} {
  func.func @_attn_block_kernel(%arg0: memref<2x8x32xf32, #tpu.memory_space<vmem>>, %arg1: memref<2x8xf32, #tpu.memory_space<vmem>>, %arg2: memref<32x96xf32, #tpu.memory_space<vmem>>, %arg3: memref<1x96xf32, #tpu.memory_space<vmem>>, %arg4: memref<32x32xf32, #tpu.memory_space<vmem>>, %arg5: memref<1x32xf32, #tpu.memory_space<vmem>>, %arg6: memref<1x32xf32, #tpu.memory_space<vmem>>, %arg7: memref<1x32xf32, #tpu.memory_space<vmem>>, %arg8: memref<2x8x32xf32, #tpu.memory_space<vmem>>) attributes {dimension_semantics = [], scalar_prefetch = 0 : i64, scratch_operands = 0 : i64, tpu.core_type = #tpu.core_type<tc>} {
    %c0 = arith.constant 0 : index
    %c0_0 = arith.constant 0 : index
    %c0_1 = arith.constant 0 : index
    %0 = vector.load %arg0[%c0, %c0_0, %c0_1] : memref<2x8x32xf32, #tpu.memory_space<vmem>>, vector<2x8x32xf32>
    %1 = vector.shape_cast %0 : vector<2x8x32xf32> to vector<16x32xf32>
    %c0_2 = arith.constant 0 : index
    %c0_3 = arith.constant 0 : index
    %2 = vector.load %arg2[%c0_2, %c0_3] : memref<32x96xf32, #tpu.memory_space<vmem>>, vector<32x96xf32>
    %cst = arith.constant dense<0.000000e+00> : vector<16x96xf32>
    %3 = tpu.matmul %1, %2, %cst {dimension_numbers = #tpu.dot_dimension_numbers<[1], [0], [0], [1], [0, 0, 1, 1], [], []>} : vector<16x32xf32>, vector<32x96xf32>, vector<16x96xf32> -> vector<16x96xf32>
    %c0_4 = arith.constant 0 : index
    %c0_5 = arith.constant 0 : index
    %4 = vector.load %arg3[%c0_4, %c0_5] : memref<1x96xf32, #tpu.memory_space<vmem>>, vector<1x96xf32>
    %5 = vector.broadcast %4 : vector<1x96xf32> to vector<16x96xf32>
    %6 = arith.addf %3, %5 : vector<16x96xf32>
    %7 = vector.shape_cast %6 : vector<16x96xf32> to vector<2x8x96xf32>
    %c0_6 = arith.constant 0 : index
    %c0_7 = arith.constant 0 : index
    %8 = vector.load %arg1[%c0_6, %c0_7] : memref<2x8xf32, #tpu.memory_space<vmem>>, vector<2x8xf32>
    %c0_8 = arith.constant 0 : index
    %c0_9 = arith.constant 0 : index
    %9 = vector.load %arg4[%c0_8, %c0_9] : memref<32x32xf32, #tpu.memory_space<vmem>>, vector<32x32xf32>
    %cst_10 = arith.constant 0.000000e+00 : f32
    %10 = vector.broadcast %cst_10 : f32 to vector<16x32xf32>
    %c0_11 = arith.constant 0 : index
    %c0_12 = arith.constant 0 : index
    %11 = vector.load %arg5[%c0_11, %c0_12] : memref<1x32xf32, #tpu.memory_space<vmem>>, vector<1x32xf32>
    %12 = vector.broadcast %11 : vector<1x32xf32> to vector<16x32xf32>
    %13 = arith.addf %10, %12 : vector<16x32xf32>
    %14 = vector.extract_strided_slice %7 {offsets = [0, 0, 0], sizes = [2, 8, 16], strides = [1, 1, 1]} : vector<2x8x96xf32> to vector<2x8x16xf32>
    %15 = vector.extract_strided_slice %7 {offsets = [0, 0, 32], sizes = [2, 8, 16], strides = [1, 1, 1]} : vector<2x8x96xf32> to vector<2x8x16xf32>
    %16 = vector.extract_strided_slice %7 {offsets = [0, 0, 64], sizes = [2, 8, 16], strides = [1, 1, 1]} : vector<2x8x96xf32> to vector<2x8x16xf32>
    "tpu.trace_start"() <{level = 10 : i32, message = "bqd,bkd->bqk"}> : () -> ()
    %cst_13 = arith.constant dense<0.000000e+00> : vector<2x8x8xf32>
    %17 = tpu.matmul %14, %15, %cst_13 {dimension_numbers = #tpu.dot_dimension_numbers<[2], [2], [1], [1], [0, 0, 0, 1, 1, 1], [0], [0]>} : vector<2x8x16xf32>, vector<2x8x16xf32>, vector<2x8x8xf32> -> vector<2x8x8xf32>
    "tpu.trace_stop"() : () -> ()
    %cst_14 = arith.constant 2.500000e-01 : f32
    %18 = vector.broadcast %cst_14 : f32 to vector<2x8x8xf32>
    %19 = arith.mulf %17, %18 : vector<2x8x8xf32>
    %20 = vector.shape_cast %8 : vector<2x8xf32> to vector<2x1x8xf32>
    %cst_15 = arith.constant 5.000000e-01 : f32
    %21 = vector.broadcast %cst_15 : f32 to vector<2x1x8xf32>
    %22 = arith.cmpf ogt, %20, %21 : vector<2x1x8xf32>
    %cst_16 = arith.constant -1.000000e+09 : f32
    %23 = vector.shape_cast %22 : vector<2x1x8xi1> to vector<2x1x8xi1>
    %24 = vector.broadcast %23 : vector<2x1x8xi1> to vector<2x8x8xi1>
    %25 = vector.broadcast %cst_16 : f32 to vector<2x8x8xf32>
    %26 = arith.select %24, %19, %25 : vector<2x8x8xi1>, vector<2x8x8xf32>
    %cst_17 = arith.constant dense<0xFF800000> : vector<2x8xf32>
    %27 = vector.multi_reduction <maximumf>, %26, %cst_17 [2] : vector<2x8x8xf32> to vector<2x8xf32>
    %28 = vector.shape_cast %27 : vector<2x8xf32> to vector<2x8x1xf32>
    %29 = vector.broadcast %28 : vector<2x8x1xf32> to vector<2x8x8xf32>
    %30 = arith.subf %26, %29 : vector<2x8x8xf32>
    %31 = math.exp %30 : vector<2x8x8xf32>
    %cst_18 = arith.constant dense<0.000000e+00> : vector<2x8xf32>
    %32 = vector.multi_reduction <add>, %31, %cst_18 [2] : vector<2x8x8xf32> to vector<2x8xf32>
    %33 = vector.shape_cast %32 : vector<2x8xf32> to vector<2x8x1xf32>
    %34 = tpu.reciprocal %33 {approx = true} : vector<2x8x1xf32> -> vector<2x8x1xf32>
    %35 = vector.broadcast %34 : vector<2x8x1xf32> to vector<2x8x8xf32>
    %36 = arith.mulf %31, %35 : vector<2x8x8xf32>
    "tpu.trace_start"() <{level = 10 : i32, message = "bqk,bkd->bqd"}> : () -> ()
    %cst_19 = arith.constant dense<0.000000e+00> : vector<2x8x16xf32>
    %37 = tpu.matmul %36, %16, %cst_19 {dimension_numbers = #tpu.dot_dimension_numbers<[2], [1], [1], [2], [0, 0, 0, 1, 1, 2], [0], [0]>} : vector<2x8x8xf32>, vector<2x8x16xf32>, vector<2x8x16xf32> -> vector<2x8x16xf32>
    "tpu.trace_stop"() : () -> ()
    %38 = vector.shape_cast %37 : vector<2x8x16xf32> to vector<16x16xf32>
    %39 = vector.extract_strided_slice %9 {offsets = [0, 0], sizes = [16, 32], strides = [1, 1]} : vector<32x32xf32> to vector<16x32xf32>
    %cst_20 = arith.constant dense<0.000000e+00> : vector<16x32xf32>
    %40 = tpu.matmul %38, %39, %cst_20 {dimension_numbers = #tpu.dot_dimension_numbers<[1], [0], [0], [1], [0, 0, 1, 1], [], []>} : vector<16x16xf32>, vector<16x32xf32>, vector<16x32xf32> -> vector<16x32xf32>
    %41 = arith.addf %13, %40 : vector<16x32xf32>
    %42 = vector.extract_strided_slice %7 {offsets = [0, 0, 16], sizes = [2, 8, 16], strides = [1, 1, 1]} : vector<2x8x96xf32> to vector<2x8x16xf32>
    %43 = vector.extract_strided_slice %7 {offsets = [0, 0, 48], sizes = [2, 8, 16], strides = [1, 1, 1]} : vector<2x8x96xf32> to vector<2x8x16xf32>
    %44 = vector.extract_strided_slice %7 {offsets = [0, 0, 80], sizes = [2, 8, 16], strides = [1, 1, 1]} : vector<2x8x96xf32> to vector<2x8x16xf32>
    "tpu.trace_start"() <{level = 10 : i32, message = "bqd,bkd->bqk"}> : () -> ()
    %cst_21 = arith.constant dense<0.000000e+00> : vector<2x8x8xf32>
    %45 = tpu.matmul %42, %43, %cst_21 {dimension_numbers = #tpu.dot_dimension_numbers<[2], [2], [1], [1], [0, 0, 0, 1, 1, 1], [0], [0]>} : vector<2x8x16xf32>, vector<2x8x16xf32>, vector<2x8x8xf32> -> vector<2x8x8xf32>
    "tpu.trace_stop"() : () -> ()
    %cst_22 = arith.constant 2.500000e-01 : f32
    %46 = vector.broadcast %cst_22 : f32 to vector<2x8x8xf32>
    %47 = arith.mulf %45, %46 : vector<2x8x8xf32>
    %48 = vector.shape_cast %8 : vector<2x8xf32> to vector<2x1x8xf32>
    %cst_23 = arith.constant 5.000000e-01 : f32
    %49 = vector.broadcast %cst_23 : f32 to vector<2x1x8xf32>
    %50 = arith.cmpf ogt, %48, %49 : vector<2x1x8xf32>
    %cst_24 = arith.constant -1.000000e+09 : f32
    %51 = vector.shape_cast %50 : vector<2x1x8xi1> to vector<2x1x8xi1>
    %52 = vector.broadcast %51 : vector<2x1x8xi1> to vector<2x8x8xi1>
    %53 = vector.broadcast %cst_24 : f32 to vector<2x8x8xf32>
    %54 = arith.select %52, %47, %53 : vector<2x8x8xi1>, vector<2x8x8xf32>
    %cst_25 = arith.constant dense<0xFF800000> : vector<2x8xf32>
    %55 = vector.multi_reduction <maximumf>, %54, %cst_25 [2] : vector<2x8x8xf32> to vector<2x8xf32>
    %56 = vector.shape_cast %55 : vector<2x8xf32> to vector<2x8x1xf32>
    %57 = vector.broadcast %56 : vector<2x8x1xf32> to vector<2x8x8xf32>
    %58 = arith.subf %54, %57 : vector<2x8x8xf32>
    %59 = math.exp %58 : vector<2x8x8xf32>
    %cst_26 = arith.constant dense<0.000000e+00> : vector<2x8xf32>
    %60 = vector.multi_reduction <add>, %59, %cst_26 [2] : vector<2x8x8xf32> to vector<2x8xf32>
    %61 = vector.shape_cast %60 : vector<2x8xf32> to vector<2x8x1xf32>
    %62 = tpu.reciprocal %61 {approx = true} : vector<2x8x1xf32> -> vector<2x8x1xf32>
    %63 = vector.broadcast %62 : vector<2x8x1xf32> to vector<2x8x8xf32>
    %64 = arith.mulf %59, %63 : vector<2x8x8xf32>
    "tpu.trace_start"() <{level = 10 : i32, message = "bqk,bkd->bqd"}> : () -> ()
    %cst_27 = arith.constant dense<0.000000e+00> : vector<2x8x16xf32>
    %65 = tpu.matmul %64, %44, %cst_27 {dimension_numbers = #tpu.dot_dimension_numbers<[2], [1], [1], [2], [0, 0, 0, 1, 1, 2], [0], [0]>} : vector<2x8x8xf32>, vector<2x8x16xf32>, vector<2x8x16xf32> -> vector<2x8x16xf32>
    "tpu.trace_stop"() : () -> ()
    %66 = vector.shape_cast %65 : vector<2x8x16xf32> to vector<16x16xf32>
    %67 = vector.extract_strided_slice %9 {offsets = [16, 0], sizes = [16, 32], strides = [1, 1]} : vector<32x32xf32> to vector<16x32xf32>
    %cst_28 = arith.constant dense<0.000000e+00> : vector<16x32xf32>
    %68 = tpu.matmul %66, %67, %cst_28 {dimension_numbers = #tpu.dot_dimension_numbers<[1], [0], [0], [1], [0, 0, 1, 1], [], []>} : vector<16x16xf32>, vector<16x32xf32>, vector<16x32xf32> -> vector<16x32xf32>
    %69 = arith.addf %41, %68 : vector<16x32xf32>
    %70 = arith.addf %1, %69 : vector<16x32xf32>
    %c0_29 = arith.constant 0 : index
    %c0_30 = arith.constant 0 : index
    %71 = vector.load %arg6[%c0_29, %c0_30] : memref<1x32xf32, #tpu.memory_space<vmem>>, vector<1x32xf32>
    %c0_31 = arith.constant 0 : index
    %c0_32 = arith.constant 0 : index
    %72 = vector.load %arg7[%c0_31, %c0_32] : memref<1x32xf32, #tpu.memory_space<vmem>>, vector<1x32xf32>
    %cst_33 = arith.constant dense<0.000000e+00> : vector<16xf32>
    %73 = vector.multi_reduction <add>, %70, %cst_33 [1] : vector<16x32xf32> to vector<16xf32>
    %74 = vector.shape_cast %73 : vector<16xf32> to vector<16x1xf32>
    %cst_34 = arith.constant 3.200000e+01 : f32
    %75 = vector.broadcast %cst_34 : f32 to vector<16x1xf32>
    %76 = arith.divf %74, %75 : vector<16x1xf32>
    %77 = vector.broadcast %76 : vector<16x1xf32> to vector<16x32xf32>
    %78 = arith.subf %70, %77 : vector<16x32xf32>
    %79 = arith.mulf %78, %78 : vector<16x32xf32>
    %cst_35 = arith.constant dense<0.000000e+00> : vector<16xf32>
    %80 = vector.multi_reduction <add>, %79, %cst_35 [1] : vector<16x32xf32> to vector<16xf32>
    %81 = vector.shape_cast %80 : vector<16xf32> to vector<16x1xf32>
    %cst_36 = arith.constant 3.200000e+01 : f32
    %82 = vector.broadcast %cst_36 : f32 to vector<16x1xf32>
    %83 = arith.divf %81, %82 : vector<16x1xf32>
    %84 = vector.broadcast %76 : vector<16x1xf32> to vector<16x32xf32>
    %85 = arith.subf %70, %84 : vector<16x32xf32>
    %cst_37 = arith.constant 9.99999974E-6 : f32
    %86 = vector.broadcast %cst_37 : f32 to vector<16x1xf32>
    %87 = arith.addf %83, %86 : vector<16x1xf32>
    %88 = math.rsqrt %87 : vector<16x1xf32>
    %89 = vector.broadcast %88 : vector<16x1xf32> to vector<16x32xf32>
    %90 = arith.mulf %85, %89 : vector<16x32xf32>
    %91 = vector.broadcast %71 : vector<1x32xf32> to vector<16x32xf32>
    %92 = arith.mulf %90, %91 : vector<16x32xf32>
    %93 = vector.broadcast %72 : vector<1x32xf32> to vector<16x32xf32>
    %94 = arith.addf %92, %93 : vector<16x32xf32>
    %95 = vector.shape_cast %94 : vector<16x32xf32> to vector<2x8x32xf32>
    %c0_38 = arith.constant 0 : index
    %c0_39 = arith.constant 0 : index
    %c0_40 = arith.constant 0 : index
    %96 = vector.load %arg8[%c0_38, %c0_39, %c0_40] : memref<2x8x32xf32, #tpu.memory_space<vmem>>, vector<2x8x32xf32>
    tpu.vector_store %arg8[%c0_38, %c0_39, %c0_40], %95 {strides = array<i32>} : memref<2x8x32xf32, #tpu.memory_space<vmem>>, vector<2x8x32xf32>,
    return
  }
}

module attributes {stable_mosaic.version = 11 : i64} {
  func.func @_linear_kernel(%arg0: memref<16x16xf32, #tpu.memory_space<vmem>>, %arg1: memref<16x32xf32, #tpu.memory_space<vmem>>, %arg2: memref<1x32xf32, #tpu.memory_space<vmem>>, %arg3: memref<16x32xf32, #tpu.memory_space<vmem>>) attributes {dimension_semantics = [], scalar_prefetch = 0 : i64, scratch_operands = 0 : i64, tpu.core_type = #tpu.core_type<tc>} {
    %c0 = arith.constant 0 : index
    %c0_0 = arith.constant 0 : index
    %0 = vector.load %arg0[%c0, %c0_0] : memref<16x16xf32, #tpu.memory_space<vmem>>, vector<16x16xf32>
    %c0_1 = arith.constant 0 : index
    %c0_2 = arith.constant 0 : index
    %1 = vector.load %arg1[%c0_1, %c0_2] : memref<16x32xf32, #tpu.memory_space<vmem>>, vector<16x32xf32>
    %cst = arith.constant dense<0.000000e+00> : vector<16x32xf32>
    %2 = tpu.matmul %0, %1, %cst {dimension_numbers = #tpu.dot_dimension_numbers<[1], [0], [0], [1], [0, 0, 1, 1], [], []>} : vector<16x16xf32>, vector<16x32xf32>, vector<16x32xf32> -> vector<16x32xf32>
    %c0_3 = arith.constant 0 : index
    %c0_4 = arith.constant 0 : index
    %3 = vector.load %arg2[%c0_3, %c0_4] : memref<1x32xf32, #tpu.memory_space<vmem>>, vector<1x32xf32>
    %4 = vector.broadcast %3 : vector<1x32xf32> to vector<16x32xf32>
    %5 = arith.addf %2, %4 : vector<16x32xf32>
    %c0_5 = arith.constant 0 : index
    %c0_6 = arith.constant 0 : index
    %6 = vector.load %arg3[%c0_5, %c0_6] : memref<16x32xf32, #tpu.memory_space<vmem>>, vector<16x32xf32>
    tpu.vector_store %arg3[%c0_5, %c0_6], %5 {strides = array<i32>} : memref<16x32xf32, #tpu.memory_space<vmem>>, vector<16x32xf32>,
    return
  }
}

module attributes {stable_mosaic.version = 11 : i64} {
  func.func @_ffn_kernel(%arg0: memref<16x32xf32, #tpu.memory_space<vmem>>, %arg1: memref<32x32xf32, #tpu.memory_space<vmem>>, %arg2: memref<1x32xf32, #tpu.memory_space<vmem>>, %arg3: memref<32x32xf32, #tpu.memory_space<vmem>>, %arg4: memref<1x32xf32, #tpu.memory_space<vmem>>, %arg5: memref<1x32xf32, #tpu.memory_space<vmem>>, %arg6: memref<1x32xf32, #tpu.memory_space<vmem>>, %arg7: memref<16x32xf32, #tpu.memory_space<vmem>>) attributes {dimension_semantics = [], scalar_prefetch = 0 : i64, scratch_operands = 0 : i64, tpu.core_type = #tpu.core_type<tc>} {
    %c0 = arith.constant 0 : index
    %c0_0 = arith.constant 0 : index
    %0 = vector.load %arg0[%c0, %c0_0] : memref<16x32xf32, #tpu.memory_space<vmem>>, vector<16x32xf32>
    %c0_1 = arith.constant 0 : index
    %c0_2 = arith.constant 0 : index
    %1 = vector.load %arg1[%c0_1, %c0_2] : memref<32x32xf32, #tpu.memory_space<vmem>>, vector<32x32xf32>
    %cst = arith.constant dense<0.000000e+00> : vector<16x32xf32>
    %2 = tpu.matmul %0, %1, %cst {dimension_numbers = #tpu.dot_dimension_numbers<[1], [0], [0], [1], [0, 0, 1, 1], [], []>} : vector<16x32xf32>, vector<32x32xf32>, vector<16x32xf32> -> vector<16x32xf32>
    %c0_3 = arith.constant 0 : index
    %c0_4 = arith.constant 0 : index
    %3 = vector.load %arg2[%c0_3, %c0_4] : memref<1x32xf32, #tpu.memory_space<vmem>>, vector<1x32xf32>
    %4 = vector.broadcast %3 : vector<1x32xf32> to vector<16x32xf32>
    %5 = arith.addf %2, %4 : vector<16x32xf32>
    %cst_5 = arith.constant 0.000000e+00 : f32
    %6 = vector.broadcast %cst_5 : f32 to vector<16x32xf32>
    %7 = arith.maximumf %5, %6 : vector<16x32xf32>
    %c0_6 = arith.constant 0 : index
    %c0_7 = arith.constant 0 : index
    %8 = vector.load %arg3[%c0_6, %c0_7] : memref<32x32xf32, #tpu.memory_space<vmem>>, vector<32x32xf32>
    %cst_8 = arith.constant dense<0.000000e+00> : vector<16x32xf32>
    %9 = tpu.matmul %7, %8, %cst_8 {dimension_numbers = #tpu.dot_dimension_numbers<[1], [0], [0], [1], [0, 0, 1, 1], [], []>} : vector<16x32xf32>, vector<32x32xf32>, vector<16x32xf32> -> vector<16x32xf32>
    %c0_9 = arith.constant 0 : index
    %c0_10 = arith.constant 0 : index
    %10 = vector.load %arg4[%c0_9, %c0_10] : memref<1x32xf32, #tpu.memory_space<vmem>>, vector<1x32xf32>
    %11 = vector.broadcast %10 : vector<1x32xf32> to vector<16x32xf32>
    %12 = arith.addf %9, %11 : vector<16x32xf32>
    %13 = arith.addf %0, %12 : vector<16x32xf32>
    %c0_11 = arith.constant 0 : index
    %c0_12 = arith.constant 0 : index
    %14 = vector.load %arg5[%c0_11, %c0_12] : memref<1x32xf32, #tpu.memory_space<vmem>>, vector<1x32xf32>
    %c0_13 = arith.constant 0 : index
    %c0_14 = arith.constant 0 : index
    %15 = vector.load %arg6[%c0_13, %c0_14] : memref<1x32xf32, #tpu.memory_space<vmem>>, vector<1x32xf32>
    %cst_15 = arith.constant dense<0.000000e+00> : vector<16xf32>
    %16 = vector.multi_reduction <add>, %13, %cst_15 [1] : vector<16x32xf32> to vector<16xf32>
    %17 = vector.shape_cast %16 : vector<16xf32> to vector<16x1xf32>
    %cst_16 = arith.constant 3.200000e+01 : f32
    %18 = vector.broadcast %cst_16 : f32 to vector<16x1xf32>
    %19 = arith.divf %17, %18 : vector<16x1xf32>
    %20 = vector.broadcast %19 : vector<16x1xf32> to vector<16x32xf32>
    %21 = arith.subf %13, %20 : vector<16x32xf32>
    %22 = arith.mulf %21, %21 : vector<16x32xf32>
    %cst_17 = arith.constant dense<0.000000e+00> : vector<16xf32>
    %23 = vector.multi_reduction <add>, %22, %cst_17 [1] : vector<16x32xf32> to vector<16xf32>
    %24 = vector.shape_cast %23 : vector<16xf32> to vector<16x1xf32>
    %cst_18 = arith.constant 3.200000e+01 : f32
    %25 = vector.broadcast %cst_18 : f32 to vector<16x1xf32>
    %26 = arith.divf %24, %25 : vector<16x1xf32>
    %27 = vector.broadcast %19 : vector<16x1xf32> to vector<16x32xf32>
    %28 = arith.subf %13, %27 : vector<16x32xf32>
    %cst_19 = arith.constant 9.99999974E-6 : f32
    %29 = vector.broadcast %cst_19 : f32 to vector<16x1xf32>
    %30 = arith.addf %26, %29 : vector<16x1xf32>
    %31 = math.rsqrt %30 : vector<16x1xf32>
    %32 = vector.broadcast %31 : vector<16x1xf32> to vector<16x32xf32>
    %33 = arith.mulf %28, %32 : vector<16x32xf32>
    %34 = vector.broadcast %14 : vector<1x32xf32> to vector<16x32xf32>
    %35 = arith.mulf %33, %34 : vector<16x32xf32>
    %36 = vector.broadcast %15 : vector<1x32xf32> to vector<16x32xf32>
    %37 = arith.addf %35, %36 : vector<16x32xf32>
    %c0_20 = arith.constant 0 : index
    %c0_21 = arith.constant 0 : index
    %38 = vector.load %arg7[%c0_20, %c0_21] : memref<16x32xf32, #tpu.memory_space<vmem>>, vector<16x32xf32>
    tpu.vector_store %arg7[%c0_20, %c0_21], %37 {strides = array<i32>} : memref<16x32xf32, #tpu.memory_space<vmem>>, vector<16x32xf32>,
    return
  }
}

module attributes {stable_mosaic.version = 11 : i64} {
  func.func @_linear_kernel(%arg0: memref<16x32xf32, #tpu.memory_space<vmem>>, %arg1: memref<32x3xf32, #tpu.memory_space<vmem>>, %arg2: memref<1x3xf32, #tpu.memory_space<vmem>>, %arg3: memref<16x3xf32, #tpu.memory_space<vmem>>) attributes {dimension_semantics = [], scalar_prefetch = 0 : i64, scratch_operands = 0 : i64, tpu.core_type = #tpu.core_type<tc>} {
    %c0 = arith.constant 0 : index
    %c0_0 = arith.constant 0 : index
    %0 = vector.load %arg0[%c0, %c0_0] : memref<16x32xf32, #tpu.memory_space<vmem>>, vector<16x32xf32>
    %c0_1 = arith.constant 0 : index
    %c0_2 = arith.constant 0 : index
    %1 = vector.load %arg1[%c0_1, %c0_2] : memref<32x3xf32, #tpu.memory_space<vmem>>, vector<32x3xf32>
    %cst = arith.constant dense<0.000000e+00> : vector<16x3xf32>
    %2 = tpu.matmul %0, %1, %cst {dimension_numbers = #tpu.dot_dimension_numbers<[1], [0], [0], [1], [0, 0, 1, 1], [], []>} : vector<16x32xf32>, vector<32x3xf32>, vector<16x3xf32> -> vector<16x3xf32>
    %c0_3 = arith.constant 0 : index
    %c0_4 = arith.constant 0 : index
    %3 = vector.load %arg2[%c0_3, %c0_4] : memref<1x3xf32, #tpu.memory_space<vmem>>, vector<1x3xf32>
    %4 = vector.broadcast %3 : vector<1x3xf32> to vector<16x3xf32>
    %5 = arith.addf %2, %4 : vector<16x3xf32>
    %c0_5 = arith.constant 0 : index
    %c0_6 = arith.constant 0 : index
    %6 = vector.load %arg3[%c0_5, %c0_6] : memref<16x3xf32, #tpu.memory_space<vmem>>, vector<16x3xf32>
    tpu.vector_store %arg3[%c0_5, %c0_6], %5 {strides = array<i32>} : memref<16x3xf32, #tpu.memory_space<vmem>>, vector<16x3xf32>,
    return
  }
}

module attributes {stable_mosaic.version = 11 : i64} {
  func.func @_generator_kernel(%arg0: memref<8x2x32xf32, #tpu.memory_space<vmem>>, %arg1: memref<2x1xi32, #tpu.memory_space<vmem>>, %arg2: memref<2x32xf32, #tpu.memory_space<vmem>>, %arg3: memref<2x32xf32, #tpu.memory_space<vmem>>, %arg4: memref<32x128xf32, #tpu.memory_space<vmem>>, %arg5: memref<32x128xf32, #tpu.memory_space<vmem>>, %arg6: memref<1x128xf32, #tpu.memory_space<vmem>>, %arg7: memref<32x9xf32, #tpu.memory_space<vmem>>, %arg8: memref<1x9xf32, #tpu.memory_space<vmem>>, %arg9: memref<8x2x9xf32, #tpu.memory_space<vmem>>, %arg10: memref<8x2x32xf32, #tpu.memory_space<vmem>>) attributes {dimension_semantics = [], scalar_prefetch = 0 : i64, scratch_operands = 1 : i64, tpu.core_type = #tpu.core_type<tc>} {
    %c0 = arith.constant 0 : index
    %c0_0 = arith.constant 0 : index
    %c0_1 = arith.constant 0 : index
    %0 = vector.load %arg0[%c0, %c0_0, %c0_1] : memref<8x2x32xf32, #tpu.memory_space<vmem>>, vector<8x2x32xf32>
    %1 = vector.shape_cast %0 : vector<8x2x32xf32> to vector<16x32xf32>
    %c0_2 = arith.constant 0 : index
    %c0_3 = arith.constant 0 : index
    %2 = vector.load %arg4[%c0_2, %c0_3] : memref<32x128xf32, #tpu.memory_space<vmem>>, vector<32x128xf32>
    %cst = arith.constant dense<0.000000e+00> : vector<16x128xf32>
    %3 = tpu.matmul %1, %2, %cst {dimension_numbers = #tpu.dot_dimension_numbers<[1], [0], [0], [1], [0, 0, 1, 1], [], []>} : vector<16x32xf32>, vector<32x128xf32>, vector<16x128xf32> -> vector<16x128xf32>
    %c0_4 = arith.constant 0 : index
    %c0_5 = arith.constant 0 : index
    %4 = vector.load %arg6[%c0_4, %c0_5] : memref<1x128xf32, #tpu.memory_space<vmem>>, vector<1x128xf32>
    %5 = vector.broadcast %4 : vector<1x128xf32> to vector<16x128xf32>
    %6 = arith.addf %3, %5 : vector<16x128xf32>
    %c0_6 = arith.constant 0 : index
    %c0_7 = arith.constant 0 : index
    %7 = vector.load %arg5[%c0_6, %c0_7] : memref<32x128xf32, #tpu.memory_space<vmem>>, vector<32x128xf32>
    %c0_8 = arith.constant 0 : index
    %c0_9 = arith.constant 0 : index
    %8 = vector.load %arg1[%c0_8, %c0_9] : memref<2x1xi32, #tpu.memory_space<vmem>>, vector<2x1xi32>
    %c0_10 = arith.constant 0 : index
    %c0_11 = arith.constant 0 : index
    %9 = vector.load %arg2[%c0_10, %c0_11] : memref<2x32xf32, #tpu.memory_space<vmem>>, vector<2x32xf32>
    %c0_12 = arith.constant 0 : index
    %c0_13 = arith.constant 0 : index
    %10 = vector.load %arg3[%c0_12, %c0_13] : memref<2x32xf32, #tpu.memory_space<vmem>>, vector<2x32xf32>
    %11 = vector.extract_strided_slice %6 {offsets = [0, 0], sizes = [2, 128], strides = [1, 1]} : vector<16x128xf32> to vector<2x128xf32>
    %cst_14 = arith.constant dense<0.000000e+00> : vector<2x128xf32>
    %12 = tpu.matmul %9, %7, %cst_14 {dimension_numbers = #tpu.dot_dimension_numbers<[1], [0], [0], [1], [0, 0, 1, 1], [], []>} : vector<2x32xf32>, vector<32x128xf32>, vector<2x128xf32> -> vector<2x128xf32>
    %13 = arith.addf %11, %12 : vector<2x128xf32>
    %14 = vector.extract_strided_slice %13 {offsets = [0, 0], sizes = [2, 32], strides = [1, 1]} : vector<2x128xf32> to vector<2x32xf32>
    %15 = arith.negf %14 : vector<2x32xf32>
    %16 = math.exp %15 : vector<2x32xf32>
    %cst_15 = arith.constant 1.000000e+00 : f32
    %17 = vector.broadcast %cst_15 : f32 to vector<2x32xf32>
    %18 = arith.addf %17, %16 : vector<2x32xf32>
    %19 = arith.divf %17, %18 : vector<2x32xf32>
    %20 = vector.extract_strided_slice %13 {offsets = [0, 32], sizes = [2, 32], strides = [1, 1]} : vector<2x128xf32> to vector<2x32xf32>
    %21 = arith.negf %20 : vector<2x32xf32>
    %22 = math.exp %21 : vector<2x32xf32>
    %cst_16 = arith.constant 1.000000e+00 : f32
    %23 = vector.broadcast %cst_16 : f32 to vector<2x32xf32>
    %24 = arith.addf %23, %22 : vector<2x32xf32>
    %25 = arith.divf %23, %24 : vector<2x32xf32>
    %26 = vector.extract_strided_slice %13 {offsets = [0, 64], sizes = [2, 32], strides = [1, 1]} : vector<2x128xf32> to vector<2x32xf32>
    %27 = math.tanh %26 : vector<2x32xf32>
    %28 = vector.extract_strided_slice %13 {offsets = [0, 96], sizes = [2, 32], strides = [1, 1]} : vector<2x128xf32> to vector<2x32xf32>
    %29 = arith.negf %28 : vector<2x32xf32>
    %30 = math.exp %29 : vector<2x32xf32>
    %cst_17 = arith.constant 1.000000e+00 : f32
    %31 = vector.broadcast %cst_17 : f32 to vector<2x32xf32>
    %32 = arith.addf %31, %30 : vector<2x32xf32>
    %33 = arith.divf %31, %32 : vector<2x32xf32>
    %34 = arith.mulf %25, %10 : vector<2x32xf32>
    %35 = arith.mulf %19, %27 : vector<2x32xf32>
    %36 = arith.addf %34, %35 : vector<2x32xf32>
    %37 = math.tanh %36 : vector<2x32xf32>
    %38 = arith.mulf %33, %37 : vector<2x32xf32>
    %c0_i32 = arith.constant 0 : i32
    %39 = vector.broadcast %c0_i32 : i32 to vector<2x1xi32>
    %40 = arith.cmpi sgt, %8, %39 : vector<2x1xi32>
    %41 = arith.extui %40 : vector<2x1xi1> to vector<2x1xi32>
    %42 = arith.sitofp %41 : vector<2x1xi32> to vector<2x1xf32>
    %43 = vector.broadcast %42 : vector<2x1xf32> to vector<2x32xf32>
    %44 = arith.mulf %43, %38 : vector<2x32xf32>
    %cst_18 = arith.constant 1.000000e+00 : f32
    %45 = vector.broadcast %cst_18 : f32 to vector<2x1xf32>
    %46 = arith.subf %45, %42 : vector<2x1xf32>
    %47 = vector.broadcast %46 : vector<2x1xf32> to vector<2x32xf32>
    %48 = arith.mulf %47, %9 : vector<2x32xf32>
    %49 = arith.addf %44, %48 : vector<2x32xf32>
    %50 = vector.broadcast %42 : vector<2x1xf32> to vector<2x32xf32>
    %51 = arith.mulf %50, %36 : vector<2x32xf32>
    %cst_19 = arith.constant 1.000000e+00 : f32
    %52 = vector.broadcast %cst_19 : f32 to vector<2x1xf32>
    %53 = arith.subf %52, %42 : vector<2x1xf32>
    %54 = vector.broadcast %53 : vector<2x1xf32> to vector<2x32xf32>
    %55 = arith.mulf %54, %10 : vector<2x32xf32>
    %56 = arith.addf %51, %55 : vector<2x32xf32>
    %57 = vector.broadcast %42 : vector<2x1xf32> to vector<2x32xf32>
    %58 = arith.mulf %57, %38 : vector<2x32xf32>
    %c0_20 = arith.constant 0 : index
    %c0_21 = arith.constant 0 : index
    %c0_22 = arith.constant 0 : index
    %59 = vector.load %arg10[%c0_20, %c0_21, %c0_22] : memref<8x2x32xf32, #tpu.memory_space<vmem>>, vector<1x2x32xf32>
    %60 = vector.shape_cast %59 : vector<1x2x32xf32> to vector<2x32xf32>
    %61 = vector.shape_cast %58 : vector<2x32xf32> to vector<1x2x32xf32>
    tpu.vector_store %arg10[%c0_20, %c0_21, %c0_22], %61 {strides = array<i32>} : memref<8x2x32xf32, #tpu.memory_space<vmem>>, vector<1x2x32xf32>,
    %62 = vector.extract_strided_slice %6 {offsets = [2, 0], sizes = [2, 128], strides = [1, 1]} : vector<16x128xf32> to vector<2x128xf32>
    %cst_23 = arith.constant dense<0.000000e+00> : vector<2x128xf32>
    %63 = tpu.matmul %49, %7, %cst_23 {dimension_numbers = #tpu.dot_dimension_numbers<[1], [0], [0], [1], [0, 0, 1, 1], [], []>} : vector<2x32xf32>, vector<32x128xf32>, vector<2x128xf32> -> vector<2x128xf32>
    %64 = arith.addf %62, %63 : vector<2x128xf32>
    %65 = vector.extract_strided_slice %64 {offsets = [0, 0], sizes = [2, 32], strides = [1, 1]} : vector<2x128xf32> to vector<2x32xf32>
    %66 = arith.negf %65 : vector<2x32xf32>
    %67 = math.exp %66 : vector<2x32xf32>
    %cst_24 = arith.constant 1.000000e+00 : f32
    %68 = vector.broadcast %cst_24 : f32 to vector<2x32xf32>
    %69 = arith.addf %68, %67 : vector<2x32xf32>
    %70 = arith.divf %68, %69 : vector<2x32xf32>
    %71 = vector.extract_strided_slice %64 {offsets = [0, 32], sizes = [2, 32], strides = [1, 1]} : vector<2x128xf32> to vector<2x32xf32>
    %72 = arith.negf %71 : vector<2x32xf32>
    %73 = math.exp %72 : vector<2x32xf32>
    %cst_25 = arith.constant 1.000000e+00 : f32
    %74 = vector.broadcast %cst_25 : f32 to vector<2x32xf32>
    %75 = arith.addf %74, %73 : vector<2x32xf32>
    %76 = arith.divf %74, %75 : vector<2x32xf32>
    %77 = vector.extract_strided_slice %64 {offsets = [0, 64], sizes = [2, 32], strides = [1, 1]} : vector<2x128xf32> to vector<2x32xf32>
    %78 = math.tanh %77 : vector<2x32xf32>
    %79 = vector.extract_strided_slice %64 {offsets = [0, 96], sizes = [2, 32], strides = [1, 1]} : vector<2x128xf32> to vector<2x32xf32>
    %80 = arith.negf %79 : vector<2x32xf32>
    %81 = math.exp %80 : vector<2x32xf32>
    %cst_26 = arith.constant 1.000000e+00 : f32
    %82 = vector.broadcast %cst_26 : f32 to vector<2x32xf32>
    %83 = arith.addf %82, %81 : vector<2x32xf32>
    %84 = arith.divf %82, %83 : vector<2x32xf32>
    %85 = arith.mulf %76, %56 : vector<2x32xf32>
    %86 = arith.mulf %70, %78 : vector<2x32xf32>
    %87 = arith.addf %85, %86 : vector<2x32xf32>
    %88 = math.tanh %87 : vector<2x32xf32>
    %89 = arith.mulf %84, %88 : vector<2x32xf32>
    %c1_i32 = arith.constant 1 : i32
    %90 = vector.broadcast %c1_i32 : i32 to vector<2x1xi32>
    %91 = arith.cmpi sgt, %8, %90 : vector<2x1xi32>
    %92 = arith.extui %91 : vector<2x1xi1> to vector<2x1xi32>
    %93 = arith.sitofp %92 : vector<2x1xi32> to vector<2x1xf32>
    %94 = vector.broadcast %93 : vector<2x1xf32> to vector<2x32xf32>
    %95 = arith.mulf %94, %89 : vector<2x32xf32>
    %cst_27 = arith.constant 1.000000e+00 : f32
    %96 = vector.broadcast %cst_27 : f32 to vector<2x1xf32>
    %97 = arith.subf %96, %93 : vector<2x1xf32>
    %98 = vector.broadcast %97 : vector<2x1xf32> to vector<2x32xf32>
    %99 = arith.mulf %98, %49 : vector<2x32xf32>
    %100 = arith.addf %95, %99 : vector<2x32xf32>
    %101 = vector.broadcast %93 : vector<2x1xf32> to vector<2x32xf32>
    %102 = arith.mulf %101, %87 : vector<2x32xf32>
    %cst_28 = arith.constant 1.000000e+00 : f32
    %103 = vector.broadcast %cst_28 : f32 to vector<2x1xf32>
    %104 = arith.subf %103, %93 : vector<2x1xf32>
    %105 = vector.broadcast %104 : vector<2x1xf32> to vector<2x32xf32>
    %106 = arith.mulf %105, %56 : vector<2x32xf32>
    %107 = arith.addf %102, %106 : vector<2x32xf32>
    %108 = vector.broadcast %93 : vector<2x1xf32> to vector<2x32xf32>
    %109 = arith.mulf %108, %89 : vector<2x32xf32>
    %c1 = arith.constant 1 : index
    %c0_29 = arith.constant 0 : index
    %c0_30 = arith.constant 0 : index
    %110 = vector.load %arg10[%c1, %c0_29, %c0_30] : memref<8x2x32xf32, #tpu.memory_space<vmem>>, vector<1x2x32xf32>
    %111 = vector.shape_cast %110 : vector<1x2x32xf32> to vector<2x32xf32>
    %112 = vector.shape_cast %109 : vector<2x32xf32> to vector<1x2x32xf32>
    tpu.vector_store %arg10[%c1, %c0_29, %c0_30], %112 {strides = array<i32>} : memref<8x2x32xf32, #tpu.memory_space<vmem>>, vector<1x2x32xf32>,
    %113 = vector.extract_strided_slice %6 {offsets = [4, 0], sizes = [2, 128], strides = [1, 1]} : vector<16x128xf32> to vector<2x128xf32>
    %cst_31 = arith.constant dense<0.000000e+00> : vector<2x128xf32>
    %114 = tpu.matmul %100, %7, %cst_31 {dimension_numbers = #tpu.dot_dimension_numbers<[1], [0], [0], [1], [0, 0, 1, 1], [], []>} : vector<2x32xf32>, vector<32x128xf32>, vector<2x128xf32> -> vector<2x128xf32>
    %115 = arith.addf %113, %114 : vector<2x128xf32>
    %116 = vector.extract_strided_slice %115 {offsets = [0, 0], sizes = [2, 32], strides = [1, 1]} : vector<2x128xf32> to vector<2x32xf32>
    %117 = arith.negf %116 : vector<2x32xf32>
    %118 = math.exp %117 : vector<2x32xf32>
    %cst_32 = arith.constant 1.000000e+00 : f32
    %119 = vector.broadcast %cst_32 : f32 to vector<2x32xf32>
    %120 = arith.addf %119, %118 : vector<2x32xf32>
    %121 = arith.divf %119, %120 : vector<2x32xf32>
    %122 = vector.extract_strided_slice %115 {offsets = [0, 32], sizes = [2, 32], strides = [1, 1]} : vector<2x128xf32> to vector<2x32xf32>
    %123 = arith.negf %122 : vector<2x32xf32>
    %124 = math.exp %123 : vector<2x32xf32>
    %cst_33 = arith.constant 1.000000e+00 : f32
    %125 = vector.broadcast %cst_33 : f32 to vector<2x32xf32>
    %126 = arith.addf %125, %124 : vector<2x32xf32>
    %127 = arith.divf %125, %126 : vector<2x32xf32>
    %128 = vector.extract_strided_slice %115 {offsets = [0, 64], sizes = [2, 32], strides = [1, 1]} : vector<2x128xf32> to vector<2x32xf32>
    %129 = math.tanh %128 : vector<2x32xf32>
    %130 = vector.extract_strided_slice %115 {offsets = [0, 96], sizes = [2, 32], strides = [1, 1]} : vector<2x128xf32> to vector<2x32xf32>
    %131 = arith.negf %130 : vector<2x32xf32>
    %132 = math.exp %131 : vector<2x32xf32>
    %cst_34 = arith.constant 1.000000e+00 : f32
    %133 = vector.broadcast %cst_34 : f32 to vector<2x32xf32>
    %134 = arith.addf %133, %132 : vector<2x32xf32>
    %135 = arith.divf %133, %134 : vector<2x32xf32>
    %136 = arith.mulf %127, %107 : vector<2x32xf32>
    %137 = arith.mulf %121, %129 : vector<2x32xf32>
    %138 = arith.addf %136, %137 : vector<2x32xf32>
    %139 = math.tanh %138 : vector<2x32xf32>
    %140 = arith.mulf %135, %139 : vector<2x32xf32>
    %c2_i32 = arith.constant 2 : i32
    %141 = vector.broadcast %c2_i32 : i32 to vector<2x1xi32>
    %142 = arith.cmpi sgt, %8, %141 : vector<2x1xi32>
    %143 = arith.extui %142 : vector<2x1xi1> to vector<2x1xi32>
    %144 = arith.sitofp %143 : vector<2x1xi32> to vector<2x1xf32>
    %145 = vector.broadcast %144 : vector<2x1xf32> to vector<2x32xf32>
    %146 = arith.mulf %145, %140 : vector<2x32xf32>
    %cst_35 = arith.constant 1.000000e+00 : f32
    %147 = vector.broadcast %cst_35 : f32 to vector<2x1xf32>
    %148 = arith.subf %147, %144 : vector<2x1xf32>
    %149 = vector.broadcast %148 : vector<2x1xf32> to vector<2x32xf32>
    %150 = arith.mulf %149, %100 : vector<2x32xf32>
    %151 = arith.addf %146, %150 : vector<2x32xf32>
    %152 = vector.broadcast %144 : vector<2x1xf32> to vector<2x32xf32>
    %153 = arith.mulf %152, %138 : vector<2x32xf32>
    %cst_36 = arith.constant 1.000000e+00 : f32
    %154 = vector.broadcast %cst_36 : f32 to vector<2x1xf32>
    %155 = arith.subf %154, %144 : vector<2x1xf32>
    %156 = vector.broadcast %155 : vector<2x1xf32> to vector<2x32xf32>
    %157 = arith.mulf %156, %107 : vector<2x32xf32>
    %158 = arith.addf %153, %157 : vector<2x32xf32>
    %159 = vector.broadcast %144 : vector<2x1xf32> to vector<2x32xf32>
    %160 = arith.mulf %159, %140 : vector<2x32xf32>
    %c2 = arith.constant 2 : index
    %c0_37 = arith.constant 0 : index
    %c0_38 = arith.constant 0 : index
    %161 = vector.load %arg10[%c2, %c0_37, %c0_38] : memref<8x2x32xf32, #tpu.memory_space<vmem>>, vector<1x2x32xf32>
    %162 = vector.shape_cast %161 : vector<1x2x32xf32> to vector<2x32xf32>
    %163 = vector.shape_cast %160 : vector<2x32xf32> to vector<1x2x32xf32>
    tpu.vector_store %arg10[%c2, %c0_37, %c0_38], %163 {strides = array<i32>} : memref<8x2x32xf32, #tpu.memory_space<vmem>>, vector<1x2x32xf32>,
    %164 = vector.extract_strided_slice %6 {offsets = [6, 0], sizes = [2, 128], strides = [1, 1]} : vector<16x128xf32> to vector<2x128xf32>
    %cst_39 = arith.constant dense<0.000000e+00> : vector<2x128xf32>
    %165 = tpu.matmul %151, %7, %cst_39 {dimension_numbers = #tpu.dot_dimension_numbers<[1], [0], [0], [1], [0, 0, 1, 1], [], []>} : vector<2x32xf32>, vector<32x128xf32>, vector<2x128xf32> -> vector<2x128xf32>
    %166 = arith.addf %164, %165 : vector<2x128xf32>
    %167 = vector.extract_strided_slice %166 {offsets = [0, 0], sizes = [2, 32], strides = [1, 1]} : vector<2x128xf32> to vector<2x32xf32>
    %168 = arith.negf %167 : vector<2x32xf32>
    %169 = math.exp %168 : vector<2x32xf32>
    %cst_40 = arith.constant 1.000000e+00 : f32
    %170 = vector.broadcast %cst_40 : f32 to vector<2x32xf32>
    %171 = arith.addf %170, %169 : vector<2x32xf32>
    %172 = arith.divf %170, %171 : vector<2x32xf32>
    %173 = vector.extract_strided_slice %166 {offsets = [0, 32], sizes = [2, 32], strides = [1, 1]} : vector<2x128xf32> to vector<2x32xf32>
    %174 = arith.negf %173 : vector<2x32xf32>
    %175 = math.exp %174 : vector<2x32xf32>
    %cst_41 = arith.constant 1.000000e+00 : f32
    %176 = vector.broadcast %cst_41 : f32 to vector<2x32xf32>
    %177 = arith.addf %176, %175 : vector<2x32xf32>
    %178 = arith.divf %176, %177 : vector<2x32xf32>
    %179 = vector.extract_strided_slice %166 {offsets = [0, 64], sizes = [2, 32], strides = [1, 1]} : vector<2x128xf32> to vector<2x32xf32>
    %180 = math.tanh %179 : vector<2x32xf32>
    %181 = vector.extract_strided_slice %166 {offsets = [0, 96], sizes = [2, 32], strides = [1, 1]} : vector<2x128xf32> to vector<2x32xf32>
    %182 = arith.negf %181 : vector<2x32xf32>
    %183 = math.exp %182 : vector<2x32xf32>
    %cst_42 = arith.constant 1.000000e+00 : f32
    %184 = vector.broadcast %cst_42 : f32 to vector<2x32xf32>
    %185 = arith.addf %184, %183 : vector<2x32xf32>
    %186 = arith.divf %184, %185 : vector<2x32xf32>
    %187 = arith.mulf %178, %158 : vector<2x32xf32>
    %188 = arith.mulf %172, %180 : vector<2x32xf32>
    %189 = arith.addf %187, %188 : vector<2x32xf32>
    %190 = math.tanh %189 : vector<2x32xf32>
    %191 = arith.mulf %186, %190 : vector<2x32xf32>
    %c3_i32 = arith.constant 3 : i32
    %192 = vector.broadcast %c3_i32 : i32 to vector<2x1xi32>
    %193 = arith.cmpi sgt, %8, %192 : vector<2x1xi32>
    %194 = arith.extui %193 : vector<2x1xi1> to vector<2x1xi32>
    %195 = arith.sitofp %194 : vector<2x1xi32> to vector<2x1xf32>
    %196 = vector.broadcast %195 : vector<2x1xf32> to vector<2x32xf32>
    %197 = arith.mulf %196, %191 : vector<2x32xf32>
    %cst_43 = arith.constant 1.000000e+00 : f32
    %198 = vector.broadcast %cst_43 : f32 to vector<2x1xf32>
    %199 = arith.subf %198, %195 : vector<2x1xf32>
    %200 = vector.broadcast %199 : vector<2x1xf32> to vector<2x32xf32>
    %201 = arith.mulf %200, %151 : vector<2x32xf32>
    %202 = arith.addf %197, %201 : vector<2x32xf32>
    %203 = vector.broadcast %195 : vector<2x1xf32> to vector<2x32xf32>
    %204 = arith.mulf %203, %189 : vector<2x32xf32>
    %cst_44 = arith.constant 1.000000e+00 : f32
    %205 = vector.broadcast %cst_44 : f32 to vector<2x1xf32>
    %206 = arith.subf %205, %195 : vector<2x1xf32>
    %207 = vector.broadcast %206 : vector<2x1xf32> to vector<2x32xf32>
    %208 = arith.mulf %207, %158 : vector<2x32xf32>
    %209 = arith.addf %204, %208 : vector<2x32xf32>
    %210 = vector.broadcast %195 : vector<2x1xf32> to vector<2x32xf32>
    %211 = arith.mulf %210, %191 : vector<2x32xf32>
    %c3 = arith.constant 3 : index
    %c0_45 = arith.constant 0 : index
    %c0_46 = arith.constant 0 : index
    %212 = vector.load %arg10[%c3, %c0_45, %c0_46] : memref<8x2x32xf32, #tpu.memory_space<vmem>>, vector<1x2x32xf32>
    %213 = vector.shape_cast %212 : vector<1x2x32xf32> to vector<2x32xf32>
    %214 = vector.shape_cast %211 : vector<2x32xf32> to vector<1x2x32xf32>
    tpu.vector_store %arg10[%c3, %c0_45, %c0_46], %214 {strides = array<i32>} : memref<8x2x32xf32, #tpu.memory_space<vmem>>, vector<1x2x32xf32>,
    %215 = vector.extract_strided_slice %6 {offsets = [8, 0], sizes = [2, 128], strides = [1, 1]} : vector<16x128xf32> to vector<2x128xf32>
    %cst_47 = arith.constant dense<0.000000e+00> : vector<2x128xf32>
    %216 = tpu.matmul %202, %7, %cst_47 {dimension_numbers = #tpu.dot_dimension_numbers<[1], [0], [0], [1], [0, 0, 1, 1], [], []>} : vector<2x32xf32>, vector<32x128xf32>, vector<2x128xf32> -> vector<2x128xf32>
    %217 = arith.addf %215, %216 : vector<2x128xf32>
    %218 = vector.extract_strided_slice %217 {offsets = [0, 0], sizes = [2, 32], strides = [1, 1]} : vector<2x128xf32> to vector<2x32xf32>
    %219 = arith.negf %218 : vector<2x32xf32>
    %220 = math.exp %219 : vector<2x32xf32>
    %cst_48 = arith.constant 1.000000e+00 : f32
    %221 = vector.broadcast %cst_48 : f32 to vector<2x32xf32>
    %222 = arith.addf %221, %220 : vector<2x32xf32>
    %223 = arith.divf %221, %222 : vector<2x32xf32>
    %224 = vector.extract_strided_slice %217 {offsets = [0, 32], sizes = [2, 32], strides = [1, 1]} : vector<2x128xf32> to vector<2x32xf32>
    %225 = arith.negf %224 : vector<2x32xf32>
    %226 = math.exp %225 : vector<2x32xf32>
    %cst_49 = arith.constant 1.000000e+00 : f32
    %227 = vector.broadcast %cst_49 : f32 to vector<2x32xf32>
    %228 = arith.addf %227, %226 : vector<2x32xf32>
    %229 = arith.divf %227, %228 : vector<2x32xf32>
    %230 = vector.extract_strided_slice %217 {offsets = [0, 64], sizes = [2, 32], strides = [1, 1]} : vector<2x128xf32> to vector<2x32xf32>
    %231 = math.tanh %230 : vector<2x32xf32>
    %232 = vector.extract_strided_slice %217 {offsets = [0, 96], sizes = [2, 32], strides = [1, 1]} : vector<2x128xf32> to vector<2x32xf32>
    %233 = arith.negf %232 : vector<2x32xf32>
    %234 = math.exp %233 : vector<2x32xf32>
    %cst_50 = arith.constant 1.000000e+00 : f32
    %235 = vector.broadcast %cst_50 : f32 to vector<2x32xf32>
    %236 = arith.addf %235, %234 : vector<2x32xf32>
    %237 = arith.divf %235, %236 : vector<2x32xf32>
    %238 = arith.mulf %229, %209 : vector<2x32xf32>
    %239 = arith.mulf %223, %231 : vector<2x32xf32>
    %240 = arith.addf %238, %239 : vector<2x32xf32>
    %241 = math.tanh %240 : vector<2x32xf32>
    %242 = arith.mulf %237, %241 : vector<2x32xf32>
    %c4_i32 = arith.constant 4 : i32
    %243 = vector.broadcast %c4_i32 : i32 to vector<2x1xi32>
    %244 = arith.cmpi sgt, %8, %243 : vector<2x1xi32>
    %245 = arith.extui %244 : vector<2x1xi1> to vector<2x1xi32>
    %246 = arith.sitofp %245 : vector<2x1xi32> to vector<2x1xf32>
    %247 = vector.broadcast %246 : vector<2x1xf32> to vector<2x32xf32>
    %248 = arith.mulf %247, %242 : vector<2x32xf32>
    %cst_51 = arith.constant 1.000000e+00 : f32
    %249 = vector.broadcast %cst_51 : f32 to vector<2x1xf32>
    %250 = arith.subf %249, %246 : vector<2x1xf32>
    %251 = vector.broadcast %250 : vector<2x1xf32> to vector<2x32xf32>
    %252 = arith.mulf %251, %202 : vector<2x32xf32>
    %253 = arith.addf %248, %252 : vector<2x32xf32>
    %254 = vector.broadcast %246 : vector<2x1xf32> to vector<2x32xf32>
    %255 = arith.mulf %254, %240 : vector<2x32xf32>
    %cst_52 = arith.constant 1.000000e+00 : f32
    %256 = vector.broadcast %cst_52 : f32 to vector<2x1xf32>
    %257 = arith.subf %256, %246 : vector<2x1xf32>
    %258 = vector.broadcast %257 : vector<2x1xf32> to vector<2x32xf32>
    %259 = arith.mulf %258, %209 : vector<2x32xf32>
    %260 = arith.addf %255, %259 : vector<2x32xf32>
    %261 = vector.broadcast %246 : vector<2x1xf32> to vector<2x32xf32>
    %262 = arith.mulf %261, %242 : vector<2x32xf32>
    %c4 = arith.constant 4 : index
    %c0_53 = arith.constant 0 : index
    %c0_54 = arith.constant 0 : index
    %263 = vector.load %arg10[%c4, %c0_53, %c0_54] : memref<8x2x32xf32, #tpu.memory_space<vmem>>, vector<1x2x32xf32>
    %264 = vector.shape_cast %263 : vector<1x2x32xf32> to vector<2x32xf32>
    %265 = vector.shape_cast %262 : vector<2x32xf32> to vector<1x2x32xf32>
    tpu.vector_store %arg10[%c4, %c0_53, %c0_54], %265 {strides = array<i32>} : memref<8x2x32xf32, #tpu.memory_space<vmem>>, vector<1x2x32xf32>,
    %266 = vector.extract_strided_slice %6 {offsets = [10, 0], sizes = [2, 128], strides = [1, 1]} : vector<16x128xf32> to vector<2x128xf32>
    %cst_55 = arith.constant dense<0.000000e+00> : vector<2x128xf32>
    %267 = tpu.matmul %253, %7, %cst_55 {dimension_numbers = #tpu.dot_dimension_numbers<[1], [0], [0], [1], [0, 0, 1, 1], [], []>} : vector<2x32xf32>, vector<32x128xf32>, vector<2x128xf32> -> vector<2x128xf32>
    %268 = arith.addf %266, %267 : vector<2x128xf32>
    %269 = vector.extract_strided_slice %268 {offsets = [0, 0], sizes = [2, 32], strides = [1, 1]} : vector<2x128xf32> to vector<2x32xf32>
    %270 = arith.negf %269 : vector<2x32xf32>
    %271 = math.exp %270 : vector<2x32xf32>
    %cst_56 = arith.constant 1.000000e+00 : f32
    %272 = vector.broadcast %cst_56 : f32 to vector<2x32xf32>
    %273 = arith.addf %272, %271 : vector<2x32xf32>
    %274 = arith.divf %272, %273 : vector<2x32xf32>
    %275 = vector.extract_strided_slice %268 {offsets = [0, 32], sizes = [2, 32], strides = [1, 1]} : vector<2x128xf32> to vector<2x32xf32>
    %276 = arith.negf %275 : vector<2x32xf32>
    %277 = math.exp %276 : vector<2x32xf32>
    %cst_57 = arith.constant 1.000000e+00 : f32
    %278 = vector.broadcast %cst_57 : f32 to vector<2x32xf32>
    %279 = arith.addf %278, %277 : vector<2x32xf32>
    %280 = arith.divf %278, %279 : vector<2x32xf32>
    %281 = vector.extract_strided_slice %268 {offsets = [0, 64], sizes = [2, 32], strides = [1, 1]} : vector<2x128xf32> to vector<2x32xf32>
    %282 = math.tanh %281 : vector<2x32xf32>
    %283 = vector.extract_strided_slice %268 {offsets = [0, 96], sizes = [2, 32], strides = [1, 1]} : vector<2x128xf32> to vector<2x32xf32>
    %284 = arith.negf %283 : vector<2x32xf32>
    %285 = math.exp %284 : vector<2x32xf32>
    %cst_58 = arith.constant 1.000000e+00 : f32
    %286 = vector.broadcast %cst_58 : f32 to vector<2x32xf32>
    %287 = arith.addf %286, %285 : vector<2x32xf32>
    %288 = arith.divf %286, %287 : vector<2x32xf32>
    %289 = arith.mulf %280, %260 : vector<2x32xf32>
    %290 = arith.mulf %274, %282 : vector<2x32xf32>
    %291 = arith.addf %289, %290 : vector<2x32xf32>
    %292 = math.tanh %291 : vector<2x32xf32>
    %293 = arith.mulf %288, %292 : vector<2x32xf32>
    %c5_i32 = arith.constant 5 : i32
    %294 = vector.broadcast %c5_i32 : i32 to vector<2x1xi32>
    %295 = arith.cmpi sgt, %8, %294 : vector<2x1xi32>
    %296 = arith.extui %295 : vector<2x1xi1> to vector<2x1xi32>
    %297 = arith.sitofp %296 : vector<2x1xi32> to vector<2x1xf32>
    %298 = vector.broadcast %297 : vector<2x1xf32> to vector<2x32xf32>
    %299 = arith.mulf %298, %293 : vector<2x32xf32>
    %cst_59 = arith.constant 1.000000e+00 : f32
    %300 = vector.broadcast %cst_59 : f32 to vector<2x1xf32>
    %301 = arith.subf %300, %297 : vector<2x1xf32>
    %302 = vector.broadcast %301 : vector<2x1xf32> to vector<2x32xf32>
    %303 = arith.mulf %302, %253 : vector<2x32xf32>
    %304 = arith.addf %299, %303 : vector<2x32xf32>
    %305 = vector.broadcast %297 : vector<2x1xf32> to vector<2x32xf32>
    %306 = arith.mulf %305, %291 : vector<2x32xf32>
    %cst_60 = arith.constant 1.000000e+00 : f32
    %307 = vector.broadcast %cst_60 : f32 to vector<2x1xf32>
    %308 = arith.subf %307, %297 : vector<2x1xf32>
    %309 = vector.broadcast %308 : vector<2x1xf32> to vector<2x32xf32>
    %310 = arith.mulf %309, %260 : vector<2x32xf32>
    %311 = arith.addf %306, %310 : vector<2x32xf32>
    %312 = vector.broadcast %297 : vector<2x1xf32> to vector<2x32xf32>
    %313 = arith.mulf %312, %293 : vector<2x32xf32>
    %c5 = arith.constant 5 : index
    %c0_61 = arith.constant 0 : index
    %c0_62 = arith.constant 0 : index
    %314 = vector.load %arg10[%c5, %c0_61, %c0_62] : memref<8x2x32xf32, #tpu.memory_space<vmem>>, vector<1x2x32xf32>
    %315 = vector.shape_cast %314 : vector<1x2x32xf32> to vector<2x32xf32>
    %316 = vector.shape_cast %313 : vector<2x32xf32> to vector<1x2x32xf32>
    tpu.vector_store %arg10[%c5, %c0_61, %c0_62], %316 {strides = array<i32>} : memref<8x2x32xf32, #tpu.memory_space<vmem>>, vector<1x2x32xf32>,
    %317 = vector.extract_strided_slice %6 {offsets = [12, 0], sizes = [2, 128], strides = [1, 1]} : vector<16x128xf32> to vector<2x128xf32>
    %cst_63 = arith.constant dense<0.000000e+00> : vector<2x128xf32>
    %318 = tpu.matmul %304, %7, %cst_63 {dimension_numbers = #tpu.dot_dimension_numbers<[1], [0], [0], [1], [0, 0, 1, 1], [], []>} : vector<2x32xf32>, vector<32x128xf32>, vector<2x128xf32> -> vector<2x128xf32>
    %319 = arith.addf %317, %318 : vector<2x128xf32>
    %320 = vector.extract_strided_slice %319 {offsets = [0, 0], sizes = [2, 32], strides = [1, 1]} : vector<2x128xf32> to vector<2x32xf32>
    %321 = arith.negf %320 : vector<2x32xf32>
    %322 = math.exp %321 : vector<2x32xf32>
    %cst_64 = arith.constant 1.000000e+00 : f32
    %323 = vector.broadcast %cst_64 : f32 to vector<2x32xf32>
    %324 = arith.addf %323, %322 : vector<2x32xf32>
    %325 = arith.divf %323, %324 : vector<2x32xf32>
    %326 = vector.extract_strided_slice %319 {offsets = [0, 32], sizes = [2, 32], strides = [1, 1]} : vector<2x128xf32> to vector<2x32xf32>
    %327 = arith.negf %326 : vector<2x32xf32>
    %328 = math.exp %327 : vector<2x32xf32>
    %cst_65 = arith.constant 1.000000e+00 : f32
    %329 = vector.broadcast %cst_65 : f32 to vector<2x32xf32>
    %330 = arith.addf %329, %328 : vector<2x32xf32>
    %331 = arith.divf %329, %330 : vector<2x32xf32>
    %332 = vector.extract_strided_slice %319 {offsets = [0, 64], sizes = [2, 32], strides = [1, 1]} : vector<2x128xf32> to vector<2x32xf32>
    %333 = math.tanh %332 : vector<2x32xf32>
    %334 = vector.extract_strided_slice %319 {offsets = [0, 96], sizes = [2, 32], strides = [1, 1]} : vector<2x128xf32> to vector<2x32xf32>
    %335 = arith.negf %334 : vector<2x32xf32>
    %336 = math.exp %335 : vector<2x32xf32>
    %cst_66 = arith.constant 1.000000e+00 : f32
    %337 = vector.broadcast %cst_66 : f32 to vector<2x32xf32>
    %338 = arith.addf %337, %336 : vector<2x32xf32>
    %339 = arith.divf %337, %338 : vector<2x32xf32>
    %340 = arith.mulf %331, %311 : vector<2x32xf32>
    %341 = arith.mulf %325, %333 : vector<2x32xf32>
    %342 = arith.addf %340, %341 : vector<2x32xf32>
    %343 = math.tanh %342 : vector<2x32xf32>
    %344 = arith.mulf %339, %343 : vector<2x32xf32>
    %c6_i32 = arith.constant 6 : i32
    %345 = vector.broadcast %c6_i32 : i32 to vector<2x1xi32>
    %346 = arith.cmpi sgt, %8, %345 : vector<2x1xi32>
    %347 = arith.extui %346 : vector<2x1xi1> to vector<2x1xi32>
    %348 = arith.sitofp %347 : vector<2x1xi32> to vector<2x1xf32>
    %349 = vector.broadcast %348 : vector<2x1xf32> to vector<2x32xf32>
    %350 = arith.mulf %349, %344 : vector<2x32xf32>
    %cst_67 = arith.constant 1.000000e+00 : f32
    %351 = vector.broadcast %cst_67 : f32 to vector<2x1xf32>
    %352 = arith.subf %351, %348 : vector<2x1xf32>
    %353 = vector.broadcast %352 : vector<2x1xf32> to vector<2x32xf32>
    %354 = arith.mulf %353, %304 : vector<2x32xf32>
    %355 = arith.addf %350, %354 : vector<2x32xf32>
    %356 = vector.broadcast %348 : vector<2x1xf32> to vector<2x32xf32>
    %357 = arith.mulf %356, %342 : vector<2x32xf32>
    %cst_68 = arith.constant 1.000000e+00 : f32
    %358 = vector.broadcast %cst_68 : f32 to vector<2x1xf32>
    %359 = arith.subf %358, %348 : vector<2x1xf32>
    %360 = vector.broadcast %359 : vector<2x1xf32> to vector<2x32xf32>
    %361 = arith.mulf %360, %311 : vector<2x32xf32>
    %362 = arith.addf %357, %361 : vector<2x32xf32>
    %363 = vector.broadcast %348 : vector<2x1xf32> to vector<2x32xf32>
    %364 = arith.mulf %363, %344 : vector<2x32xf32>
    %c6 = arith.constant 6 : index
    %c0_69 = arith.constant 0 : index
    %c0_70 = arith.constant 0 : index
    %365 = vector.load %arg10[%c6, %c0_69, %c0_70] : memref<8x2x32xf32, #tpu.memory_space<vmem>>, vector<1x2x32xf32>
    %366 = vector.shape_cast %365 : vector<1x2x32xf32> to vector<2x32xf32>
    %367 = vector.shape_cast %364 : vector<2x32xf32> to vector<1x2x32xf32>
    tpu.vector_store %arg10[%c6, %c0_69, %c0_70], %367 {strides = array<i32>} : memref<8x2x32xf32, #tpu.memory_space<vmem>>, vector<1x2x32xf32>,
    %368 = vector.extract_strided_slice %6 {offsets = [14, 0], sizes = [2, 128], strides = [1, 1]} : vector<16x128xf32> to vector<2x128xf32>
    %cst_71 = arith.constant dense<0.000000e+00> : vector<2x128xf32>
    %369 = tpu.matmul %355, %7, %cst_71 {dimension_numbers = #tpu.dot_dimension_numbers<[1], [0], [0], [1], [0, 0, 1, 1], [], []>} : vector<2x32xf32>, vector<32x128xf32>, vector<2x128xf32> -> vector<2x128xf32>
    %370 = arith.addf %368, %369 : vector<2x128xf32>
    %371 = vector.extract_strided_slice %370 {offsets = [0, 0], sizes = [2, 32], strides = [1, 1]} : vector<2x128xf32> to vector<2x32xf32>
    %372 = arith.negf %371 : vector<2x32xf32>
    %373 = math.exp %372 : vector<2x32xf32>
    %cst_72 = arith.constant 1.000000e+00 : f32
    %374 = vector.broadcast %cst_72 : f32 to vector<2x32xf32>
    %375 = arith.addf %374, %373 : vector<2x32xf32>
    %376 = arith.divf %374, %375 : vector<2x32xf32>
    %377 = vector.extract_strided_slice %370 {offsets = [0, 32], sizes = [2, 32], strides = [1, 1]} : vector<2x128xf32> to vector<2x32xf32>
    %378 = arith.negf %377 : vector<2x32xf32>
    %379 = math.exp %378 : vector<2x32xf32>
    %cst_73 = arith.constant 1.000000e+00 : f32
    %380 = vector.broadcast %cst_73 : f32 to vector<2x32xf32>
    %381 = arith.addf %380, %379 : vector<2x32xf32>
    %382 = arith.divf %380, %381 : vector<2x32xf32>
    %383 = vector.extract_strided_slice %370 {offsets = [0, 64], sizes = [2, 32], strides = [1, 1]} : vector<2x128xf32> to vector<2x32xf32>
    %384 = math.tanh %383 : vector<2x32xf32>
    %385 = vector.extract_strided_slice %370 {offsets = [0, 96], sizes = [2, 32], strides = [1, 1]} : vector<2x128xf32> to vector<2x32xf32>
    %386 = arith.negf %385 : vector<2x32xf32>
    %387 = math.exp %386 : vector<2x32xf32>
    %cst_74 = arith.constant 1.000000e+00 : f32
    %388 = vector.broadcast %cst_74 : f32 to vector<2x32xf32>
    %389 = arith.addf %388, %387 : vector<2x32xf32>
    %390 = arith.divf %388, %389 : vector<2x32xf32>
    %391 = arith.mulf %382, %362 : vector<2x32xf32>
    %392 = arith.mulf %376, %384 : vector<2x32xf32>
    %393 = arith.addf %391, %392 : vector<2x32xf32>
    %394 = math.tanh %393 : vector<2x32xf32>
    %395 = arith.mulf %390, %394 : vector<2x32xf32>
    %c7_i32 = arith.constant 7 : i32
    %396 = vector.broadcast %c7_i32 : i32 to vector<2x1xi32>
    %397 = arith.cmpi sgt, %8, %396 : vector<2x1xi32>
    %398 = arith.extui %397 : vector<2x1xi1> to vector<2x1xi32>
    %399 = arith.sitofp %398 : vector<2x1xi32> to vector<2x1xf32>
    %400 = vector.broadcast %399 : vector<2x1xf32> to vector<2x32xf32>
    %401 = arith.mulf %400, %395 : vector<2x32xf32>
    %c7 = arith.constant 7 : index
    %c0_75 = arith.constant 0 : index
    %c0_76 = arith.constant 0 : index
    %402 = vector.load %arg10[%c7, %c0_75, %c0_76] : memref<8x2x32xf32, #tpu.memory_space<vmem>>, vector<1x2x32xf32>
    %403 = vector.shape_cast %402 : vector<1x2x32xf32> to vector<2x32xf32>
    %404 = vector.shape_cast %401 : vector<2x32xf32> to vector<1x2x32xf32>
    tpu.vector_store %arg10[%c7, %c0_75, %c0_76], %404 {strides = array<i32>} : memref<8x2x32xf32, #tpu.memory_space<vmem>>, vector<1x2x32xf32>,
    %c0_77 = arith.constant 0 : index
    %c0_78 = arith.constant 0 : index
    %c0_79 = arith.constant 0 : index
    %405 = vector.load %arg10[%c0_77, %c0_78, %c0_79] : memref<8x2x32xf32, #tpu.memory_space<vmem>>, vector<8x2x32xf32>
    %406 = vector.shape_cast %405 : vector<8x2x32xf32> to vector<16x32xf32>
    %c0_80 = arith.constant 0 : index
    %c0_81 = arith.constant 0 : index
    %407 = vector.load %arg7[%c0_80, %c0_81] : memref<32x9xf32, #tpu.memory_space<vmem>>, vector<32x9xf32>
    %cst_82 = arith.constant dense<0.000000e+00> : vector<16x9xf32>
    %408 = tpu.matmul %406, %407, %cst_82 {dimension_numbers = #tpu.dot_dimension_numbers<[1], [0], [0], [1], [0, 0, 1, 1], [], []>} : vector<16x32xf32>, vector<32x9xf32>, vector<16x9xf32> -> vector<16x9xf32>
    %c0_83 = arith.constant 0 : index
    %c0_84 = arith.constant 0 : index
    %409 = vector.load %arg8[%c0_83, %c0_84] : memref<1x9xf32, #tpu.memory_space<vmem>>, vector<1x9xf32>
    %410 = vector.broadcast %409 : vector<1x9xf32> to vector<16x9xf32>
    %411 = arith.addf %408, %410 : vector<16x9xf32>
    %412 = vector.shape_cast %411 : vector<16x9xf32> to vector<8x2x9xf32>
    %c0_85 = arith.constant 0 : index
    %c0_86 = arith.constant 0 : index
    %c0_87 = arith.constant 0 : index
    %413 = vector.load %arg9[%c0_85, %c0_86, %c0_87] : memref<8x2x9xf32, #tpu.memory_space<vmem>>, vector<8x2x9xf32>
    tpu.vector_store %arg9[%c0_85, %c0_86, %c0_87], %412 {strides = array<i32>} : memref<8x2x9xf32, #tpu.memory_space<vmem>>, vector<8x2x9xf32>,
    return
  }
}

module attributes {stable_mosaic.version = 11 : i64} {
  func.func @_generator_kernel(%arg0: memref<8x2x16xf32, #tpu.memory_space<vmem>>, %arg1: memref<2x1xi32, #tpu.memory_space<vmem>>, %arg2: memref<2x32xf32, #tpu.memory_space<vmem>>, %arg3: memref<2x32xf32, #tpu.memory_space<vmem>>, %arg4: memref<16x128xf32, #tpu.memory_space<vmem>>, %arg5: memref<32x128xf32, #tpu.memory_space<vmem>>, %arg6: memref<1x128xf32, #tpu.memory_space<vmem>>, %arg7: memref<32x6xf32, #tpu.memory_space<vmem>>, %arg8: memref<1x6xf32, #tpu.memory_space<vmem>>, %arg9: memref<8x2x6xf32, #tpu.memory_space<vmem>>, %arg10: memref<8x2x32xf32, #tpu.memory_space<vmem>>) attributes {dimension_semantics = [], scalar_prefetch = 0 : i64, scratch_operands = 1 : i64, tpu.core_type = #tpu.core_type<tc>} {
    %c0 = arith.constant 0 : index
    %c0_0 = arith.constant 0 : index
    %c0_1 = arith.constant 0 : index
    %0 = vector.load %arg0[%c0, %c0_0, %c0_1] : memref<8x2x16xf32, #tpu.memory_space<vmem>>, vector<8x2x16xf32>
    %1 = vector.shape_cast %0 : vector<8x2x16xf32> to vector<16x16xf32>
    %c0_2 = arith.constant 0 : index
    %c0_3 = arith.constant 0 : index
    %2 = vector.load %arg4[%c0_2, %c0_3] : memref<16x128xf32, #tpu.memory_space<vmem>>, vector<16x128xf32>
    %cst = arith.constant dense<0.000000e+00> : vector<16x128xf32>
    %3 = tpu.matmul %1, %2, %cst {dimension_numbers = #tpu.dot_dimension_numbers<[1], [0], [0], [1], [0, 0, 1, 1], [], []>} : vector<16x16xf32>, vector<16x128xf32>, vector<16x128xf32> -> vector<16x128xf32>
    %c0_4 = arith.constant 0 : index
    %c0_5 = arith.constant 0 : index
    %4 = vector.load %arg6[%c0_4, %c0_5] : memref<1x128xf32, #tpu.memory_space<vmem>>, vector<1x128xf32>
    %5 = vector.broadcast %4 : vector<1x128xf32> to vector<16x128xf32>
    %6 = arith.addf %3, %5 : vector<16x128xf32>
    %c0_6 = arith.constant 0 : index
    %c0_7 = arith.constant 0 : index
    %7 = vector.load %arg5[%c0_6, %c0_7] : memref<32x128xf32, #tpu.memory_space<vmem>>, vector<32x128xf32>
    %c0_8 = arith.constant 0 : index
    %c0_9 = arith.constant 0 : index
    %8 = vector.load %arg1[%c0_8, %c0_9] : memref<2x1xi32, #tpu.memory_space<vmem>>, vector<2x1xi32>
    %c0_10 = arith.constant 0 : index
    %c0_11 = arith.constant 0 : index
    %9 = vector.load %arg2[%c0_10, %c0_11] : memref<2x32xf32, #tpu.memory_space<vmem>>, vector<2x32xf32>
    %c0_12 = arith.constant 0 : index
    %c0_13 = arith.constant 0 : index
    %10 = vector.load %arg3[%c0_12, %c0_13] : memref<2x32xf32, #tpu.memory_space<vmem>>, vector<2x32xf32>
    %11 = vector.extract_strided_slice %6 {offsets = [0, 0], sizes = [2, 128], strides = [1, 1]} : vector<16x128xf32> to vector<2x128xf32>
    %cst_14 = arith.constant dense<0.000000e+00> : vector<2x128xf32>
    %12 = tpu.matmul %9, %7, %cst_14 {dimension_numbers = #tpu.dot_dimension_numbers<[1], [0], [0], [1], [0, 0, 1, 1], [], []>} : vector<2x32xf32>, vector<32x128xf32>, vector<2x128xf32> -> vector<2x128xf32>
    %13 = arith.addf %11, %12 : vector<2x128xf32>
    %14 = vector.extract_strided_slice %13 {offsets = [0, 0], sizes = [2, 32], strides = [1, 1]} : vector<2x128xf32> to vector<2x32xf32>
    %15 = arith.negf %14 : vector<2x32xf32>
    %16 = math.exp %15 : vector<2x32xf32>
    %cst_15 = arith.constant 1.000000e+00 : f32
    %17 = vector.broadcast %cst_15 : f32 to vector<2x32xf32>
    %18 = arith.addf %17, %16 : vector<2x32xf32>
    %19 = arith.divf %17, %18 : vector<2x32xf32>
    %20 = vector.extract_strided_slice %13 {offsets = [0, 32], sizes = [2, 32], strides = [1, 1]} : vector<2x128xf32> to vector<2x32xf32>
    %21 = arith.negf %20 : vector<2x32xf32>
    %22 = math.exp %21 : vector<2x32xf32>
    %cst_16 = arith.constant 1.000000e+00 : f32
    %23 = vector.broadcast %cst_16 : f32 to vector<2x32xf32>
    %24 = arith.addf %23, %22 : vector<2x32xf32>
    %25 = arith.divf %23, %24 : vector<2x32xf32>
    %26 = vector.extract_strided_slice %13 {offsets = [0, 64], sizes = [2, 32], strides = [1, 1]} : vector<2x128xf32> to vector<2x32xf32>
    %27 = math.tanh %26 : vector<2x32xf32>
    %28 = vector.extract_strided_slice %13 {offsets = [0, 96], sizes = [2, 32], strides = [1, 1]} : vector<2x128xf32> to vector<2x32xf32>
    %29 = arith.negf %28 : vector<2x32xf32>
    %30 = math.exp %29 : vector<2x32xf32>
    %cst_17 = arith.constant 1.000000e+00 : f32
    %31 = vector.broadcast %cst_17 : f32 to vector<2x32xf32>
    %32 = arith.addf %31, %30 : vector<2x32xf32>
    %33 = arith.divf %31, %32 : vector<2x32xf32>
    %34 = arith.mulf %25, %10 : vector<2x32xf32>
    %35 = arith.mulf %19, %27 : vector<2x32xf32>
    %36 = arith.addf %34, %35 : vector<2x32xf32>
    %37 = math.tanh %36 : vector<2x32xf32>
    %38 = arith.mulf %33, %37 : vector<2x32xf32>
    %c0_i32 = arith.constant 0 : i32
    %39 = vector.broadcast %c0_i32 : i32 to vector<2x1xi32>
    %40 = arith.cmpi sgt, %8, %39 : vector<2x1xi32>
    %41 = arith.extui %40 : vector<2x1xi1> to vector<2x1xi32>
    %42 = arith.sitofp %41 : vector<2x1xi32> to vector<2x1xf32>
    %43 = vector.broadcast %42 : vector<2x1xf32> to vector<2x32xf32>
    %44 = arith.mulf %43, %38 : vector<2x32xf32>
    %cst_18 = arith.constant 1.000000e+00 : f32
    %45 = vector.broadcast %cst_18 : f32 to vector<2x1xf32>
    %46 = arith.subf %45, %42 : vector<2x1xf32>
    %47 = vector.broadcast %46 : vector<2x1xf32> to vector<2x32xf32>
    %48 = arith.mulf %47, %9 : vector<2x32xf32>
    %49 = arith.addf %44, %48 : vector<2x32xf32>
    %50 = vector.broadcast %42 : vector<2x1xf32> to vector<2x32xf32>
    %51 = arith.mulf %50, %36 : vector<2x32xf32>
    %cst_19 = arith.constant 1.000000e+00 : f32
    %52 = vector.broadcast %cst_19 : f32 to vector<2x1xf32>
    %53 = arith.subf %52, %42 : vector<2x1xf32>
    %54 = vector.broadcast %53 : vector<2x1xf32> to vector<2x32xf32>
    %55 = arith.mulf %54, %10 : vector<2x32xf32>
    %56 = arith.addf %51, %55 : vector<2x32xf32>
    %57 = vector.broadcast %42 : vector<2x1xf32> to vector<2x32xf32>
    %58 = arith.mulf %57, %38 : vector<2x32xf32>
    %c0_20 = arith.constant 0 : index
    %c0_21 = arith.constant 0 : index
    %c0_22 = arith.constant 0 : index
    %59 = vector.load %arg10[%c0_20, %c0_21, %c0_22] : memref<8x2x32xf32, #tpu.memory_space<vmem>>, vector<1x2x32xf32>
    %60 = vector.shape_cast %59 : vector<1x2x32xf32> to vector<2x32xf32>
    %61 = vector.shape_cast %58 : vector<2x32xf32> to vector<1x2x32xf32>
    tpu.vector_store %arg10[%c0_20, %c0_21, %c0_22], %61 {strides = array<i32>} : memref<8x2x32xf32, #tpu.memory_space<vmem>>, vector<1x2x32xf32>,
    %62 = vector.extract_strided_slice %6 {offsets = [2, 0], sizes = [2, 128], strides = [1, 1]} : vector<16x128xf32> to vector<2x128xf32>
    %cst_23 = arith.constant dense<0.000000e+00> : vector<2x128xf32>
    %63 = tpu.matmul %49, %7, %cst_23 {dimension_numbers = #tpu.dot_dimension_numbers<[1], [0], [0], [1], [0, 0, 1, 1], [], []>} : vector<2x32xf32>, vector<32x128xf32>, vector<2x128xf32> -> vector<2x128xf32>
    %64 = arith.addf %62, %63 : vector<2x128xf32>
    %65 = vector.extract_strided_slice %64 {offsets = [0, 0], sizes = [2, 32], strides = [1, 1]} : vector<2x128xf32> to vector<2x32xf32>
    %66 = arith.negf %65 : vector<2x32xf32>
    %67 = math.exp %66 : vector<2x32xf32>
    %cst_24 = arith.constant 1.000000e+00 : f32
    %68 = vector.broadcast %cst_24 : f32 to vector<2x32xf32>
    %69 = arith.addf %68, %67 : vector<2x32xf32>
    %70 = arith.divf %68, %69 : vector<2x32xf32>
    %71 = vector.extract_strided_slice %64 {offsets = [0, 32], sizes = [2, 32], strides = [1, 1]} : vector<2x128xf32> to vector<2x32xf32>
    %72 = arith.negf %71 : vector<2x32xf32>
    %73 = math.exp %72 : vector<2x32xf32>
    %cst_25 = arith.constant 1.000000e+00 : f32
    %74 = vector.broadcast %cst_25 : f32 to vector<2x32xf32>
    %75 = arith.addf %74, %73 : vector<2x32xf32>
    %76 = arith.divf %74, %75 : vector<2x32xf32>
    %77 = vector.extract_strided_slice %64 {offsets = [0, 64], sizes = [2, 32], strides = [1, 1]} : vector<2x128xf32> to vector<2x32xf32>
    %78 = math.tanh %77 : vector<2x32xf32>
    %79 = vector.extract_strided_slice %64 {offsets = [0, 96], sizes = [2, 32], strides = [1, 1]} : vector<2x128xf32> to vector<2x32xf32>
    %80 = arith.negf %79 : vector<2x32xf32>
    %81 = math.exp %80 : vector<2x32xf32>
    %cst_26 = arith.constant 1.000000e+00 : f32
    %82 = vector.broadcast %cst_26 : f32 to vector<2x32xf32>
    %83 = arith.addf %82, %81 : vector<2x32xf32>
    %84 = arith.divf %82, %83 : vector<2x32xf32>
    %85 = arith.mulf %76, %56 : vector<2x32xf32>
    %86 = arith.mulf %70, %78 : vector<2x32xf32>
    %87 = arith.addf %85, %86 : vector<2x32xf32>
    %88 = math.tanh %87 : vector<2x32xf32>
    %89 = arith.mulf %84, %88 : vector<2x32xf32>
    %c1_i32 = arith.constant 1 : i32
    %90 = vector.broadcast %c1_i32 : i32 to vector<2x1xi32>
    %91 = arith.cmpi sgt, %8, %90 : vector<2x1xi32>
    %92 = arith.extui %91 : vector<2x1xi1> to vector<2x1xi32>
    %93 = arith.sitofp %92 : vector<2x1xi32> to vector<2x1xf32>
    %94 = vector.broadcast %93 : vector<2x1xf32> to vector<2x32xf32>
    %95 = arith.mulf %94, %89 : vector<2x32xf32>
    %cst_27 = arith.constant 1.000000e+00 : f32
    %96 = vector.broadcast %cst_27 : f32 to vector<2x1xf32>
    %97 = arith.subf %96, %93 : vector<2x1xf32>
    %98 = vector.broadcast %97 : vector<2x1xf32> to vector<2x32xf32>
    %99 = arith.mulf %98, %49 : vector<2x32xf32>
    %100 = arith.addf %95, %99 : vector<2x32xf32>
    %101 = vector.broadcast %93 : vector<2x1xf32> to vector<2x32xf32>
    %102 = arith.mulf %101, %87 : vector<2x32xf32>
    %cst_28 = arith.constant 1.000000e+00 : f32
    %103 = vector.broadcast %cst_28 : f32 to vector<2x1xf32>
    %104 = arith.subf %103, %93 : vector<2x1xf32>
    %105 = vector.broadcast %104 : vector<2x1xf32> to vector<2x32xf32>
    %106 = arith.mulf %105, %56 : vector<2x32xf32>
    %107 = arith.addf %102, %106 : vector<2x32xf32>
    %108 = vector.broadcast %93 : vector<2x1xf32> to vector<2x32xf32>
    %109 = arith.mulf %108, %89 : vector<2x32xf32>
    %c1 = arith.constant 1 : index
    %c0_29 = arith.constant 0 : index
    %c0_30 = arith.constant 0 : index
    %110 = vector.load %arg10[%c1, %c0_29, %c0_30] : memref<8x2x32xf32, #tpu.memory_space<vmem>>, vector<1x2x32xf32>
    %111 = vector.shape_cast %110 : vector<1x2x32xf32> to vector<2x32xf32>
    %112 = vector.shape_cast %109 : vector<2x32xf32> to vector<1x2x32xf32>
    tpu.vector_store %arg10[%c1, %c0_29, %c0_30], %112 {strides = array<i32>} : memref<8x2x32xf32, #tpu.memory_space<vmem>>, vector<1x2x32xf32>,
    %113 = vector.extract_strided_slice %6 {offsets = [4, 0], sizes = [2, 128], strides = [1, 1]} : vector<16x128xf32> to vector<2x128xf32>
    %cst_31 = arith.constant dense<0.000000e+00> : vector<2x128xf32>
    %114 = tpu.matmul %100, %7, %cst_31 {dimension_numbers = #tpu.dot_dimension_numbers<[1], [0], [0], [1], [0, 0, 1, 1], [], []>} : vector<2x32xf32>, vector<32x128xf32>, vector<2x128xf32> -> vector<2x128xf32>
    %115 = arith.addf %113, %114 : vector<2x128xf32>
    %116 = vector.extract_strided_slice %115 {offsets = [0, 0], sizes = [2, 32], strides = [1, 1]} : vector<2x128xf32> to vector<2x32xf32>
    %117 = arith.negf %116 : vector<2x32xf32>
    %118 = math.exp %117 : vector<2x32xf32>
    %cst_32 = arith.constant 1.000000e+00 : f32
    %119 = vector.broadcast %cst_32 : f32 to vector<2x32xf32>
    %120 = arith.addf %119, %118 : vector<2x32xf32>
    %121 = arith.divf %119, %120 : vector<2x32xf32>
    %122 = vector.extract_strided_slice %115 {offsets = [0, 32], sizes = [2, 32], strides = [1, 1]} : vector<2x128xf32> to vector<2x32xf32>
    %123 = arith.negf %122 : vector<2x32xf32>
    %124 = math.exp %123 : vector<2x32xf32>
    %cst_33 = arith.constant 1.000000e+00 : f32
    %125 = vector.broadcast %cst_33 : f32 to vector<2x32xf32>
    %126 = arith.addf %125, %124 : vector<2x32xf32>
    %127 = arith.divf %125, %126 : vector<2x32xf32>
    %128 = vector.extract_strided_slice %115 {offsets = [0, 64], sizes = [2, 32], strides = [1, 1]} : vector<2x128xf32> to vector<2x32xf32>
    %129 = math.tanh %128 : vector<2x32xf32>
    %130 = vector.extract_strided_slice %115 {offsets = [0, 96], sizes = [2, 32], strides = [1, 1]} : vector<2x128xf32> to vector<2x32xf32>
    %131 = arith.negf %130 : vector<2x32xf32>
    %132 = math.exp %131 : vector<2x32xf32>
    %cst_34 = arith.constant 1.000000e+00 : f32
    %133 = vector.broadcast %cst_34 : f32 to vector<2x32xf32>
    %134 = arith.addf %133, %132 : vector<2x32xf32>
    %135 = arith.divf %133, %134 : vector<2x32xf32>
    %136 = arith.mulf %127, %107 : vector<2x32xf32>
    %137 = arith.mulf %121, %129 : vector<2x32xf32>
    %138 = arith.addf %136, %137 : vector<2x32xf32>
    %139 = math.tanh %138 : vector<2x32xf32>
    %140 = arith.mulf %135, %139 : vector<2x32xf32>
    %c2_i32 = arith.constant 2 : i32
    %141 = vector.broadcast %c2_i32 : i32 to vector<2x1xi32>
    %142 = arith.cmpi sgt, %8, %141 : vector<2x1xi32>
    %143 = arith.extui %142 : vector<2x1xi1> to vector<2x1xi32>
    %144 = arith.sitofp %143 : vector<2x1xi32> to vector<2x1xf32>
    %145 = vector.broadcast %144 : vector<2x1xf32> to vector<2x32xf32>
    %146 = arith.mulf %145, %140 : vector<2x32xf32>
    %cst_35 = arith.constant 1.000000e+00 : f32
    %147 = vector.broadcast %cst_35 : f32 to vector<2x1xf32>
    %148 = arith.subf %147, %144 : vector<2x1xf32>
    %149 = vector.broadcast %148 : vector<2x1xf32> to vector<2x32xf32>
    %150 = arith.mulf %149, %100 : vector<2x32xf32>
    %151 = arith.addf %146, %150 : vector<2x32xf32>
    %152 = vector.broadcast %144 : vector<2x1xf32> to vector<2x32xf32>
    %153 = arith.mulf %152, %138 : vector<2x32xf32>
    %cst_36 = arith.constant 1.000000e+00 : f32
    %154 = vector.broadcast %cst_36 : f32 to vector<2x1xf32>
    %155 = arith.subf %154, %144 : vector<2x1xf32>
    %156 = vector.broadcast %155 : vector<2x1xf32> to vector<2x32xf32>
    %157 = arith.mulf %156, %107 : vector<2x32xf32>
    %158 = arith.addf %153, %157 : vector<2x32xf32>
    %159 = vector.broadcast %144 : vector<2x1xf32> to vector<2x32xf32>
    %160 = arith.mulf %159, %140 : vector<2x32xf32>
    %c2 = arith.constant 2 : index
    %c0_37 = arith.constant 0 : index
    %c0_38 = arith.constant 0 : index
    %161 = vector.load %arg10[%c2, %c0_37, %c0_38] : memref<8x2x32xf32, #tpu.memory_space<vmem>>, vector<1x2x32xf32>
    %162 = vector.shape_cast %161 : vector<1x2x32xf32> to vector<2x32xf32>
    %163 = vector.shape_cast %160 : vector<2x32xf32> to vector<1x2x32xf32>
    tpu.vector_store %arg10[%c2, %c0_37, %c0_38], %163 {strides = array<i32>} : memref<8x2x32xf32, #tpu.memory_space<vmem>>, vector<1x2x32xf32>,
    %164 = vector.extract_strided_slice %6 {offsets = [6, 0], sizes = [2, 128], strides = [1, 1]} : vector<16x128xf32> to vector<2x128xf32>
    %cst_39 = arith.constant dense<0.000000e+00> : vector<2x128xf32>
    %165 = tpu.matmul %151, %7, %cst_39 {dimension_numbers = #tpu.dot_dimension_numbers<[1], [0], [0], [1], [0, 0, 1, 1], [], []>} : vector<2x32xf32>, vector<32x128xf32>, vector<2x128xf32> -> vector<2x128xf32>
    %166 = arith.addf %164, %165 : vector<2x128xf32>
    %167 = vector.extract_strided_slice %166 {offsets = [0, 0], sizes = [2, 32], strides = [1, 1]} : vector<2x128xf32> to vector<2x32xf32>
    %168 = arith.negf %167 : vector<2x32xf32>
    %169 = math.exp %168 : vector<2x32xf32>
    %cst_40 = arith.constant 1.000000e+00 : f32
    %170 = vector.broadcast %cst_40 : f32 to vector<2x32xf32>
    %171 = arith.addf %170, %169 : vector<2x32xf32>
    %172 = arith.divf %170, %171 : vector<2x32xf32>
    %173 = vector.extract_strided_slice %166 {offsets = [0, 32], sizes = [2, 32], strides = [1, 1]} : vector<2x128xf32> to vector<2x32xf32>
    %174 = arith.negf %173 : vector<2x32xf32>
    %175 = math.exp %174 : vector<2x32xf32>
    %cst_41 = arith.constant 1.000000e+00 : f32
    %176 = vector.broadcast %cst_41 : f32 to vector<2x32xf32>
    %177 = arith.addf %176, %175 : vector<2x32xf32>
    %178 = arith.divf %176, %177 : vector<2x32xf32>
    %179 = vector.extract_strided_slice %166 {offsets = [0, 64], sizes = [2, 32], strides = [1, 1]} : vector<2x128xf32> to vector<2x32xf32>
    %180 = math.tanh %179 : vector<2x32xf32>
    %181 = vector.extract_strided_slice %166 {offsets = [0, 96], sizes = [2, 32], strides = [1, 1]} : vector<2x128xf32> to vector<2x32xf32>
    %182 = arith.negf %181 : vector<2x32xf32>
    %183 = math.exp %182 : vector<2x32xf32>
    %cst_42 = arith.constant 1.000000e+00 : f32
    %184 = vector.broadcast %cst_42 : f32 to vector<2x32xf32>
    %185 = arith.addf %184, %183 : vector<2x32xf32>
    %186 = arith.divf %184, %185 : vector<2x32xf32>
    %187 = arith.mulf %178, %158 : vector<2x32xf32>
    %188 = arith.mulf %172, %180 : vector<2x32xf32>
    %189 = arith.addf %187, %188 : vector<2x32xf32>
    %190 = math.tanh %189 : vector<2x32xf32>
    %191 = arith.mulf %186, %190 : vector<2x32xf32>
    %c3_i32 = arith.constant 3 : i32
    %192 = vector.broadcast %c3_i32 : i32 to vector<2x1xi32>
    %193 = arith.cmpi sgt, %8, %192 : vector<2x1xi32>
    %194 = arith.extui %193 : vector<2x1xi1> to vector<2x1xi32>
    %195 = arith.sitofp %194 : vector<2x1xi32> to vector<2x1xf32>
    %196 = vector.broadcast %195 : vector<2x1xf32> to vector<2x32xf32>
    %197 = arith.mulf %196, %191 : vector<2x32xf32>
    %cst_43 = arith.constant 1.000000e+00 : f32
    %198 = vector.broadcast %cst_43 : f32 to vector<2x1xf32>
    %199 = arith.subf %198, %195 : vector<2x1xf32>
    %200 = vector.broadcast %199 : vector<2x1xf32> to vector<2x32xf32>
    %201 = arith.mulf %200, %151 : vector<2x32xf32>
    %202 = arith.addf %197, %201 : vector<2x32xf32>
    %203 = vector.broadcast %195 : vector<2x1xf32> to vector<2x32xf32>
    %204 = arith.mulf %203, %189 : vector<2x32xf32>
    %cst_44 = arith.constant 1.000000e+00 : f32
    %205 = vector.broadcast %cst_44 : f32 to vector<2x1xf32>
    %206 = arith.subf %205, %195 : vector<2x1xf32>
    %207 = vector.broadcast %206 : vector<2x1xf32> to vector<2x32xf32>
    %208 = arith.mulf %207, %158 : vector<2x32xf32>
    %209 = arith.addf %204, %208 : vector<2x32xf32>
    %210 = vector.broadcast %195 : vector<2x1xf32> to vector<2x32xf32>
    %211 = arith.mulf %210, %191 : vector<2x32xf32>
    %c3 = arith.constant 3 : index
    %c0_45 = arith.constant 0 : index
    %c0_46 = arith.constant 0 : index
    %212 = vector.load %arg10[%c3, %c0_45, %c0_46] : memref<8x2x32xf32, #tpu.memory_space<vmem>>, vector<1x2x32xf32>
    %213 = vector.shape_cast %212 : vector<1x2x32xf32> to vector<2x32xf32>
    %214 = vector.shape_cast %211 : vector<2x32xf32> to vector<1x2x32xf32>
    tpu.vector_store %arg10[%c3, %c0_45, %c0_46], %214 {strides = array<i32>} : memref<8x2x32xf32, #tpu.memory_space<vmem>>, vector<1x2x32xf32>,
    %215 = vector.extract_strided_slice %6 {offsets = [8, 0], sizes = [2, 128], strides = [1, 1]} : vector<16x128xf32> to vector<2x128xf32>
    %cst_47 = arith.constant dense<0.000000e+00> : vector<2x128xf32>
    %216 = tpu.matmul %202, %7, %cst_47 {dimension_numbers = #tpu.dot_dimension_numbers<[1], [0], [0], [1], [0, 0, 1, 1], [], []>} : vector<2x32xf32>, vector<32x128xf32>, vector<2x128xf32> -> vector<2x128xf32>
    %217 = arith.addf %215, %216 : vector<2x128xf32>
    %218 = vector.extract_strided_slice %217 {offsets = [0, 0], sizes = [2, 32], strides = [1, 1]} : vector<2x128xf32> to vector<2x32xf32>
    %219 = arith.negf %218 : vector<2x32xf32>
    %220 = math.exp %219 : vector<2x32xf32>
    %cst_48 = arith.constant 1.000000e+00 : f32
    %221 = vector.broadcast %cst_48 : f32 to vector<2x32xf32>
    %222 = arith.addf %221, %220 : vector<2x32xf32>
    %223 = arith.divf %221, %222 : vector<2x32xf32>
    %224 = vector.extract_strided_slice %217 {offsets = [0, 32], sizes = [2, 32], strides = [1, 1]} : vector<2x128xf32> to vector<2x32xf32>
    %225 = arith.negf %224 : vector<2x32xf32>
    %226 = math.exp %225 : vector<2x32xf32>
    %cst_49 = arith.constant 1.000000e+00 : f32
    %227 = vector.broadcast %cst_49 : f32 to vector<2x32xf32>
    %228 = arith.addf %227, %226 : vector<2x32xf32>
    %229 = arith.divf %227, %228 : vector<2x32xf32>
    %230 = vector.extract_strided_slice %217 {offsets = [0, 64], sizes = [2, 32], strides = [1, 1]} : vector<2x128xf32> to vector<2x32xf32>
    %231 = math.tanh %230 : vector<2x32xf32>
    %232 = vector.extract_strided_slice %217 {offsets = [0, 96], sizes = [2, 32], strides = [1, 1]} : vector<2x128xf32> to vector<2x32xf32>
    %233 = arith.negf %232 : vector<2x32xf32>
    %234 = math.exp %233 : vector<2x32xf32>
    %cst_50 = arith.constant 1.000000e+00 : f32
    %235 = vector.broadcast %cst_50 : f32 to vector<2x32xf32>
    %236 = arith.addf %235, %234 : vector<2x32xf32>
    %237 = arith.divf %235, %236 : vector<2x32xf32>
    %238 = arith.mulf %229, %209 : vector<2x32xf32>
    %239 = arith.mulf %223, %231 : vector<2x32xf32>
    %240 = arith.addf %238, %239 : vector<2x32xf32>
    %241 = math.tanh %240 : vector<2x32xf32>
    %242 = arith.mulf %237, %241 : vector<2x32xf32>
    %c4_i32 = arith.constant 4 : i32
    %243 = vector.broadcast %c4_i32 : i32 to vector<2x1xi32>
    %244 = arith.cmpi sgt, %8, %243 : vector<2x1xi32>
    %245 = arith.extui %244 : vector<2x1xi1> to vector<2x1xi32>
    %246 = arith.sitofp %245 : vector<2x1xi32> to vector<2x1xf32>
    %247 = vector.broadcast %246 : vector<2x1xf32> to vector<2x32xf32>
    %248 = arith.mulf %247, %242 : vector<2x32xf32>
    %cst_51 = arith.constant 1.000000e+00 : f32
    %249 = vector.broadcast %cst_51 : f32 to vector<2x1xf32>
    %250 = arith.subf %249, %246 : vector<2x1xf32>
    %251 = vector.broadcast %250 : vector<2x1xf32> to vector<2x32xf32>
    %252 = arith.mulf %251, %202 : vector<2x32xf32>
    %253 = arith.addf %248, %252 : vector<2x32xf32>
    %254 = vector.broadcast %246 : vector<2x1xf32> to vector<2x32xf32>
    %255 = arith.mulf %254, %240 : vector<2x32xf32>
    %cst_52 = arith.constant 1.000000e+00 : f32
    %256 = vector.broadcast %cst_52 : f32 to vector<2x1xf32>
    %257 = arith.subf %256, %246 : vector<2x1xf32>
    %258 = vector.broadcast %257 : vector<2x1xf32> to vector<2x32xf32>
    %259 = arith.mulf %258, %209 : vector<2x32xf32>
    %260 = arith.addf %255, %259 : vector<2x32xf32>
    %261 = vector.broadcast %246 : vector<2x1xf32> to vector<2x32xf32>
    %262 = arith.mulf %261, %242 : vector<2x32xf32>
    %c4 = arith.constant 4 : index
    %c0_53 = arith.constant 0 : index
    %c0_54 = arith.constant 0 : index
    %263 = vector.load %arg10[%c4, %c0_53, %c0_54] : memref<8x2x32xf32, #tpu.memory_space<vmem>>, vector<1x2x32xf32>
    %264 = vector.shape_cast %263 : vector<1x2x32xf32> to vector<2x32xf32>
    %265 = vector.shape_cast %262 : vector<2x32xf32> to vector<1x2x32xf32>
    tpu.vector_store %arg10[%c4, %c0_53, %c0_54], %265 {strides = array<i32>} : memref<8x2x32xf32, #tpu.memory_space<vmem>>, vector<1x2x32xf32>,
    %266 = vector.extract_strided_slice %6 {offsets = [10, 0], sizes = [2, 128], strides = [1, 1]} : vector<16x128xf32> to vector<2x128xf32>
    %cst_55 = arith.constant dense<0.000000e+00> : vector<2x128xf32>
    %267 = tpu.matmul %253, %7, %cst_55 {dimension_numbers = #tpu.dot_dimension_numbers<[1], [0], [0], [1], [0, 0, 1, 1], [], []>} : vector<2x32xf32>, vector<32x128xf32>, vector<2x128xf32> -> vector<2x128xf32>
    %268 = arith.addf %266, %267 : vector<2x128xf32>
    %269 = vector.extract_strided_slice %268 {offsets = [0, 0], sizes = [2, 32], strides = [1, 1]} : vector<2x128xf32> to vector<2x32xf32>
    %270 = arith.negf %269 : vector<2x32xf32>
    %271 = math.exp %270 : vector<2x32xf32>
    %cst_56 = arith.constant 1.000000e+00 : f32
    %272 = vector.broadcast %cst_56 : f32 to vector<2x32xf32>
    %273 = arith.addf %272, %271 : vector<2x32xf32>
    %274 = arith.divf %272, %273 : vector<2x32xf32>
    %275 = vector.extract_strided_slice %268 {offsets = [0, 32], sizes = [2, 32], strides = [1, 1]} : vector<2x128xf32> to vector<2x32xf32>
    %276 = arith.negf %275 : vector<2x32xf32>
    %277 = math.exp %276 : vector<2x32xf32>
    %cst_57 = arith.constant 1.000000e+00 : f32
    %278 = vector.broadcast %cst_57 : f32 to vector<2x32xf32>
    %279 = arith.addf %278, %277 : vector<2x32xf32>
    %280 = arith.divf %278, %279 : vector<2x32xf32>
    %281 = vector.extract_strided_slice %268 {offsets = [0, 64], sizes = [2, 32], strides = [1, 1]} : vector<2x128xf32> to vector<2x32xf32>
    %282 = math.tanh %281 : vector<2x32xf32>
    %283 = vector.extract_strided_slice %268 {offsets = [0, 96], sizes = [2, 32], strides = [1, 1]} : vector<2x128xf32> to vector<2x32xf32>
    %284 = arith.negf %283 : vector<2x32xf32>
    %285 = math.exp %284 : vector<2x32xf32>
    %cst_58 = arith.constant 1.000000e+00 : f32
    %286 = vector.broadcast %cst_58 : f32 to vector<2x32xf32>
    %287 = arith.addf %286, %285 : vector<2x32xf32>
    %288 = arith.divf %286, %287 : vector<2x32xf32>
    %289 = arith.mulf %280, %260 : vector<2x32xf32>
    %290 = arith.mulf %274, %282 : vector<2x32xf32>
    %291 = arith.addf %289, %290 : vector<2x32xf32>
    %292 = math.tanh %291 : vector<2x32xf32>
    %293 = arith.mulf %288, %292 : vector<2x32xf32>
    %c5_i32 = arith.constant 5 : i32
    %294 = vector.broadcast %c5_i32 : i32 to vector<2x1xi32>
    %295 = arith.cmpi sgt, %8, %294 : vector<2x1xi32>
    %296 = arith.extui %295 : vector<2x1xi1> to vector<2x1xi32>
    %297 = arith.sitofp %296 : vector<2x1xi32> to vector<2x1xf32>
    %298 = vector.broadcast %297 : vector<2x1xf32> to vector<2x32xf32>
    %299 = arith.mulf %298, %293 : vector<2x32xf32>
    %cst_59 = arith.constant 1.000000e+00 : f32
    %300 = vector.broadcast %cst_59 : f32 to vector<2x1xf32>
    %301 = arith.subf %300, %297 : vector<2x1xf32>
    %302 = vector.broadcast %301 : vector<2x1xf32> to vector<2x32xf32>
    %303 = arith.mulf %302, %253 : vector<2x32xf32>
    %304 = arith.addf %299, %303 : vector<2x32xf32>
    %305 = vector.broadcast %297 : vector<2x1xf32> to vector<2x32xf32>
    %306 = arith.mulf %305, %291 : vector<2x32xf32>
    %cst_60 = arith.constant 1.000000e+00 : f32
    %307 = vector.broadcast %cst_60 : f32 to vector<2x1xf32>
    %308 = arith.subf %307, %297 : vector<2x1xf32>
    %309 = vector.broadcast %308 : vector<2x1xf32> to vector<2x32xf32>
    %310 = arith.mulf %309, %260 : vector<2x32xf32>
    %311 = arith.addf %306, %310 : vector<2x32xf32>
    %312 = vector.broadcast %297 : vector<2x1xf32> to vector<2x32xf32>
    %313 = arith.mulf %312, %293 : vector<2x32xf32>
    %c5 = arith.constant 5 : index
    %c0_61 = arith.constant 0 : index
    %c0_62 = arith.constant 0 : index
    %314 = vector.load %arg10[%c5, %c0_61, %c0_62] : memref<8x2x32xf32, #tpu.memory_space<vmem>>, vector<1x2x32xf32>
    %315 = vector.shape_cast %314 : vector<1x2x32xf32> to vector<2x32xf32>
    %316 = vector.shape_cast %313 : vector<2x32xf32> to vector<1x2x32xf32>
    tpu.vector_store %arg10[%c5, %c0_61, %c0_62], %316 {strides = array<i32>} : memref<8x2x32xf32, #tpu.memory_space<vmem>>, vector<1x2x32xf32>,
    %317 = vector.extract_strided_slice %6 {offsets = [12, 0], sizes = [2, 128], strides = [1, 1]} : vector<16x128xf32> to vector<2x128xf32>
    %cst_63 = arith.constant dense<0.000000e+00> : vector<2x128xf32>
    %318 = tpu.matmul %304, %7, %cst_63 {dimension_numbers = #tpu.dot_dimension_numbers<[1], [0], [0], [1], [0, 0, 1, 1], [], []>} : vector<2x32xf32>, vector<32x128xf32>, vector<2x128xf32> -> vector<2x128xf32>
    %319 = arith.addf %317, %318 : vector<2x128xf32>
    %320 = vector.extract_strided_slice %319 {offsets = [0, 0], sizes = [2, 32], strides = [1, 1]} : vector<2x128xf32> to vector<2x32xf32>
    %321 = arith.negf %320 : vector<2x32xf32>
    %322 = math.exp %321 : vector<2x32xf32>
    %cst_64 = arith.constant 1.000000e+00 : f32
    %323 = vector.broadcast %cst_64 : f32 to vector<2x32xf32>
    %324 = arith.addf %323, %322 : vector<2x32xf32>
    %325 = arith.divf %323, %324 : vector<2x32xf32>
    %326 = vector.extract_strided_slice %319 {offsets = [0, 32], sizes = [2, 32], strides = [1, 1]} : vector<2x128xf32> to vector<2x32xf32>
    %327 = arith.negf %326 : vector<2x32xf32>
    %328 = math.exp %327 : vector<2x32xf32>
    %cst_65 = arith.constant 1.000000e+00 : f32
    %329 = vector.broadcast %cst_65 : f32 to vector<2x32xf32>
    %330 = arith.addf %329, %328 : vector<2x32xf32>
    %331 = arith.divf %329, %330 : vector<2x32xf32>
    %332 = vector.extract_strided_slice %319 {offsets = [0, 64], sizes = [2, 32], strides = [1, 1]} : vector<2x128xf32> to vector<2x32xf32>
    %333 = math.tanh %332 : vector<2x32xf32>
    %334 = vector.extract_strided_slice %319 {offsets = [0, 96], sizes = [2, 32], strides = [1, 1]} : vector<2x128xf32> to vector<2x32xf32>
    %335 = arith.negf %334 : vector<2x32xf32>
    %336 = math.exp %335 : vector<2x32xf32>
    %cst_66 = arith.constant 1.000000e+00 : f32
    %337 = vector.broadcast %cst_66 : f32 to vector<2x32xf32>
    %338 = arith.addf %337, %336 : vector<2x32xf32>
    %339 = arith.divf %337, %338 : vector<2x32xf32>
    %340 = arith.mulf %331, %311 : vector<2x32xf32>
    %341 = arith.mulf %325, %333 : vector<2x32xf32>
    %342 = arith.addf %340, %341 : vector<2x32xf32>
    %343 = math.tanh %342 : vector<2x32xf32>
    %344 = arith.mulf %339, %343 : vector<2x32xf32>
    %c6_i32 = arith.constant 6 : i32
    %345 = vector.broadcast %c6_i32 : i32 to vector<2x1xi32>
    %346 = arith.cmpi sgt, %8, %345 : vector<2x1xi32>
    %347 = arith.extui %346 : vector<2x1xi1> to vector<2x1xi32>
    %348 = arith.sitofp %347 : vector<2x1xi32> to vector<2x1xf32>
    %349 = vector.broadcast %348 : vector<2x1xf32> to vector<2x32xf32>
    %350 = arith.mulf %349, %344 : vector<2x32xf32>
    %cst_67 = arith.constant 1.000000e+00 : f32
    %351 = vector.broadcast %cst_67 : f32 to vector<2x1xf32>
    %352 = arith.subf %351, %348 : vector<2x1xf32>
    %353 = vector.broadcast %352 : vector<2x1xf32> to vector<2x32xf32>
    %354 = arith.mulf %353, %304 : vector<2x32xf32>
    %355 = arith.addf %350, %354 : vector<2x32xf32>
    %356 = vector.broadcast %348 : vector<2x1xf32> to vector<2x32xf32>
    %357 = arith.mulf %356, %342 : vector<2x32xf32>
    %cst_68 = arith.constant 1.000000e+00 : f32
    %358 = vector.broadcast %cst_68 : f32 to vector<2x1xf32>
    %359 = arith.subf %358, %348 : vector<2x1xf32>
    %360 = vector.broadcast %359 : vector<2x1xf32> to vector<2x32xf32>
    %361 = arith.mulf %360, %311 : vector<2x32xf32>
    %362 = arith.addf %357, %361 : vector<2x32xf32>
    %363 = vector.broadcast %348 : vector<2x1xf32> to vector<2x32xf32>
    %364 = arith.mulf %363, %344 : vector<2x32xf32>
    %c6 = arith.constant 6 : index
    %c0_69 = arith.constant 0 : index
    %c0_70 = arith.constant 0 : index
    %365 = vector.load %arg10[%c6, %c0_69, %c0_70] : memref<8x2x32xf32, #tpu.memory_space<vmem>>, vector<1x2x32xf32>
    %366 = vector.shape_cast %365 : vector<1x2x32xf32> to vector<2x32xf32>
    %367 = vector.shape_cast %364 : vector<2x32xf32> to vector<1x2x32xf32>
    tpu.vector_store %arg10[%c6, %c0_69, %c0_70], %367 {strides = array<i32>} : memref<8x2x32xf32, #tpu.memory_space<vmem>>, vector<1x2x32xf32>,
    %368 = vector.extract_strided_slice %6 {offsets = [14, 0], sizes = [2, 128], strides = [1, 1]} : vector<16x128xf32> to vector<2x128xf32>
    %cst_71 = arith.constant dense<0.000000e+00> : vector<2x128xf32>
    %369 = tpu.matmul %355, %7, %cst_71 {dimension_numbers = #tpu.dot_dimension_numbers<[1], [0], [0], [1], [0, 0, 1, 1], [], []>} : vector<2x32xf32>, vector<32x128xf32>, vector<2x128xf32> -> vector<2x128xf32>
    %370 = arith.addf %368, %369 : vector<2x128xf32>
    %371 = vector.extract_strided_slice %370 {offsets = [0, 0], sizes = [2, 32], strides = [1, 1]} : vector<2x128xf32> to vector<2x32xf32>
    %372 = arith.negf %371 : vector<2x32xf32>
    %373 = math.exp %372 : vector<2x32xf32>
    %cst_72 = arith.constant 1.000000e+00 : f32
    %374 = vector.broadcast %cst_72 : f32 to vector<2x32xf32>
    %375 = arith.addf %374, %373 : vector<2x32xf32>
    %376 = arith.divf %374, %375 : vector<2x32xf32>
    %377 = vector.extract_strided_slice %370 {offsets = [0, 32], sizes = [2, 32], strides = [1, 1]} : vector<2x128xf32> to vector<2x32xf32>
    %378 = arith.negf %377 : vector<2x32xf32>
    %379 = math.exp %378 : vector<2x32xf32>
    %cst_73 = arith.constant 1.000000e+00 : f32
    %380 = vector.broadcast %cst_73 : f32 to vector<2x32xf32>
    %381 = arith.addf %380, %379 : vector<2x32xf32>
    %382 = arith.divf %380, %381 : vector<2x32xf32>
    %383 = vector.extract_strided_slice %370 {offsets = [0, 64], sizes = [2, 32], strides = [1, 1]} : vector<2x128xf32> to vector<2x32xf32>
    %384 = math.tanh %383 : vector<2x32xf32>
    %385 = vector.extract_strided_slice %370 {offsets = [0, 96], sizes = [2, 32], strides = [1, 1]} : vector<2x128xf32> to vector<2x32xf32>
    %386 = arith.negf %385 : vector<2x32xf32>
    %387 = math.exp %386 : vector<2x32xf32>
    %cst_74 = arith.constant 1.000000e+00 : f32
    %388 = vector.broadcast %cst_74 : f32 to vector<2x32xf32>
    %389 = arith.addf %388, %387 : vector<2x32xf32>
    %390 = arith.divf %388, %389 : vector<2x32xf32>
    %391 = arith.mulf %382, %362 : vector<2x32xf32>
    %392 = arith.mulf %376, %384 : vector<2x32xf32>
    %393 = arith.addf %391, %392 : vector<2x32xf32>
    %394 = math.tanh %393 : vector<2x32xf32>
    %395 = arith.mulf %390, %394 : vector<2x32xf32>
    %c7_i32 = arith.constant 7 : i32
    %396 = vector.broadcast %c7_i32 : i32 to vector<2x1xi32>
    %397 = arith.cmpi sgt, %8, %396 : vector<2x1xi32>
    %398 = arith.extui %397 : vector<2x1xi1> to vector<2x1xi32>
    %399 = arith.sitofp %398 : vector<2x1xi32> to vector<2x1xf32>
    %400 = vector.broadcast %399 : vector<2x1xf32> to vector<2x32xf32>
    %401 = arith.mulf %400, %395 : vector<2x32xf32>
    %c7 = arith.constant 7 : index
    %c0_75 = arith.constant 0 : index
    %c0_76 = arith.constant 0 : index
    %402 = vector.load %arg10[%c7, %c0_75, %c0_76] : memref<8x2x32xf32, #tpu.memory_space<vmem>>, vector<1x2x32xf32>
    %403 = vector.shape_cast %402 : vector<1x2x32xf32> to vector<2x32xf32>
    %404 = vector.shape_cast %401 : vector<2x32xf32> to vector<1x2x32xf32>
    tpu.vector_store %arg10[%c7, %c0_75, %c0_76], %404 {strides = array<i32>} : memref<8x2x32xf32, #tpu.memory_space<vmem>>, vector<1x2x32xf32>,
    %c0_77 = arith.constant 0 : index
    %c0_78 = arith.constant 0 : index
    %c0_79 = arith.constant 0 : index
    %405 = vector.load %arg10[%c0_77, %c0_78, %c0_79] : memref<8x2x32xf32, #tpu.memory_space<vmem>>, vector<8x2x32xf32>
    %406 = vector.shape_cast %405 : vector<8x2x32xf32> to vector<16x32xf32>
    %c0_80 = arith.constant 0 : index
    %c0_81 = arith.constant 0 : index
    %407 = vector.load %arg7[%c0_80, %c0_81] : memref<32x6xf32, #tpu.memory_space<vmem>>, vector<32x6xf32>
    %cst_82 = arith.constant dense<0.000000e+00> : vector<16x6xf32>
    %408 = tpu.matmul %406, %407, %cst_82 {dimension_numbers = #tpu.dot_dimension_numbers<[1], [0], [0], [1], [0, 0, 1, 1], [], []>} : vector<16x32xf32>, vector<32x6xf32>, vector<16x6xf32> -> vector<16x6xf32>
    %c0_83 = arith.constant 0 : index
    %c0_84 = arith.constant 0 : index
    %409 = vector.load %arg8[%c0_83, %c0_84] : memref<1x6xf32, #tpu.memory_space<vmem>>, vector<1x6xf32>
    %410 = vector.broadcast %409 : vector<1x6xf32> to vector<16x6xf32>
    %411 = arith.addf %408, %410 : vector<16x6xf32>
    %412 = vector.shape_cast %411 : vector<16x6xf32> to vector<8x2x6xf32>
    %c0_85 = arith.constant 0 : index
    %c0_86 = arith.constant 0 : index
    %c0_87 = arith.constant 0 : index
    %413 = vector.load %arg9[%c0_85, %c0_86, %c0_87] : memref<8x2x6xf32, #tpu.memory_space<vmem>>, vector<8x2x6xf32>
    tpu.vector_store %arg9[%c0_85, %c0_86, %c0_87], %412 {strides = array<i32>} : memref<8x2x6xf32, #tpu.memory_space<vmem>>, vector<8x2x6xf32>,
    return
  }
}

</mosaic_0001>

<bundles_post_ra>
// kernel: movement_net_forward.7
= control target key start
LH: loop header
LB: loop body
LE: loop exit
PB: predicated region body
PF: predicated region fallthrough
CT: control target
= control target key end

     0   :  { %vm25_vm0 = vcmask 130048   ;;  %vm107_vm1 = vcmask 261120   ;;  %s169_s1 = inlined_call_operand.vmem [shape: f32[16,32], index: 1, kind: input, shape index: {}]   ;;  %s170_s0 = inlined_call_operand.vmem [shape: f32[16,16], index: 0, kind: input, shape index: {}]   ;;  %s171_s2 = inlined_call_operand.vmem [shape: f32[1,32], index: 2, kind: input, shape index: {}]   ;;  %s172_s3 = inlined_call_operand.vmem [shape: f32[16,32], index: 3, kind: output, shape index: {}]  }
   0x1   :  { %v17_v0 = vld [vmem:[%s169_s1 + $0x8] sm:$0xff]  ;;  %v16_v1 = vld [vmem:[%s169_s1] sm:$0xff] }
   0x2   :  { %v14_v2 = vld [vmem:[%s170_s0] sm:$0xff]  ;;  %121 = vmatprep.subr.mxu0 %v17_v0  ;;  %v15_v3 = vld [vmem:[%s170_s0 + $0x8] sm:$0xff] }
   0x3   :  { %125 = vmatprep.mubr.msk.f32.mxu0 %vm25_vm0, %v14_v2  ;;  %122 = vmatpush3.msra.mxu0 %v17_v0  ;;  %v114_v4 = vld [vmem:[%s171_s2] ss:$0 sm:$0xff] }
   0x4   :  { %123 = vmatprep.subr.mxu0 %v16_v1 }
   0x5   :  { %124 = vmatpush3.msra.mxu0 %v16_v1 }
   0x6   :  { %126 = vmatmul.mubr.msk.f32.vlgmr.msra.gmra.mxu0 %vm25_vm0, %v15_v3 }
  0xc6   :  { %v127_v5 = vpop.f32.mrf.mxu0 }
  0xc7   :  { %v104_v6 = vadd.f32 %v127_v5, %v114_v4 }
  0xc8   :  { %v98_v7 = vpop.f32.mrf.mxu0 }
  0xc9   :  { %109 = vst.msk [vmem:[%s172_s3 + $0x8] sm:$0xff] %vm107_vm1, %v104_v6  ;;  %v99_v8 = vadd.f32 %v114_v4, %v98_v7 }
  0xcb   :  { %108 = vst.msk [vmem:[%s172_s3] sm:$0xff] %vm107_vm1, %v99_v8 }

// kernel: movement_net_forward.9
= control target key start
LH: loop header
LB: loop body
LE: loop exit
PB: predicated region body
PF: predicated region fallthrough
CT: control target
= control target key end

     0   :  { %vm39_vm0 = vcmask 261120   ;;  %s412_s1 = inlined_call_operand.vmem [shape: f32[32,32], index: 1, kind: input, shape index: {}]   ;;  %s413_s0 = inlined_call_operand.vmem [shape: f32[16,32], index: 0, kind: input, shape index: {}]   ;;  %s414_s3 = inlined_call_operand.vmem [shape: f32[32,32], index: 3, kind: input, shape index: {}]   ;;  %s415_s2 = inlined_call_operand.vmem [shape: f32[1,32], index: 2, kind: input, shape index: {}]   ;;  %s416_s4 = inlined_call_operand.vmem [shape: f32[1,32], index: 4, kind: input, shape index: {}]   ;;  %s417_s5 = inlined_call_operand.vmem [shape: f32[1,32], index: 5, kind: input, shape index: {}]   ;;  %s418_s6 = inlined_call_operand.vmem [shape: f32[1,32], index: 6, kind: input, shape index: {}]   ;;  %s419_s7 = inlined_call_operand.vmem [shape: f32[16,32], index: 7, kind: output, shape index: {}]  }
   0x1   :  { %v31_v0 = vld [vmem:[%s412_s1 + $0x18] sm:$0xff]  ;;  %v30_v1 = vld [vmem:[%s412_s1 + $0x10] sm:$0xff]  ;;  %v26_v2 = vld [vmem:[%s413_s0] sm:$0xff] }
   0x2   :  { %288 = vmatprep.subr.mxu0 %v31_v0  ;;  %v29_v3 = vld [vmem:[%s412_s1 + $0x8] sm:$0xff]  ;;  %296 = vmatprep.mubr.msk.f32.mxu0 %vm39_vm0, %v26_v2  ;;  %v28_v4 = vld [vmem:[%s412_s1] sm:$0xff]  ;;  %v126_v6 = vld [vmem:[%s414_s3 + $0x18] sm:$0xff] }
   0x3   :  { %289 = vmatpush3.msra.mxu0 %v31_v0  ;;  %v27_v5 = vld [vmem:[%s413_s0 + $0x8] sm:$0xff]  ;;  %299 = vmatprep.subr.mxu1 %v126_v6  ;;  %v125_v7 = vld [vmem:[%s414_s3 + $0x10] sm:$0xff]  ;;  %v123_v9 = vld [vmem:[%s414_s3] sm:$0xff] }
   0x4   :  { %290 = vmatprep.subr.mxu0 %v30_v1  ;;  %300 = vmatpush3.msra.mxu1 %v126_v6  ;;  %v124_v8 = vld [vmem:[%s414_s3 + $0x8] sm:$0xff]  ;;  %v268_v10 = vld [vmem:[%s415_s2] ss:$0 sm:$0xff] }
   0x5   :  { %291 = vmatpush3.msra.mxu0 %v30_v1  ;;  %301 = vmatprep.subr.mxu1 %v125_v7  ;;  %v271_v18 = vld [vmem:[%s416_s4] ss:$0 sm:$0xff] }
   0x6   :  { %292 = vmatprep.subr.mxu0 %v29_v3  ;;  %302 = vmatpush3.msra.mxu1 %v125_v7  ;;  %v274_v43 = vld [vmem:[%s417_s5] ss:$0 sm:$0xff] }
   0x7   :  { %293 = vmatpush3.msra.mxu0 %v29_v3  ;;  %303 = vmatprep.subr.mxu1 %v124_v8  ;;  %v275_v45 = vld [vmem:[%s418_s6] ss:$0 sm:$0xff] }
   0x8   :  { %294 = vmatprep.subr.mxu0 %v28_v4  ;;  %304 = vmatpush3.msra.mxu1 %v124_v8 }
   0x9   :  { %295 = vmatpush3.msra.mxu0 %v28_v4  ;;  %305 = vmatprep.subr.mxu1 %v123_v9 }
   0xa   :  { %297 = vmatmul.mubr.msk.f32.vlgmr.msra.gmra.mxu0 %vm39_vm0, %v27_v5  ;;  %306 = vmatpush3.msra.mxu1 %v123_v9 }
  0xca   :  { %v298_v11 = vpop.f32.mrf.mxu0 }
  0xcb   :  { %v118_v12 = vadd.f32 %v298_v11, %v268_v10 }
  0xcc   :  { %v112_v13 = vpop.f32.mrf.mxu0 }
  0xcd   :  { %v113_v14 = vadd.f32 %v268_v10, %v112_v13  ;;  %v122_v16 = vmax.f32 %v118_v12, 0.0 }
  0xcf   :  { %v121_v15 = vmax.f32 %v113_v14, 0.0 }
  0xd1   :  { %307 = vmatprep.mubr.msk.f32.mxu1 %vm39_vm0, %v121_v15 }
  0xd2   :  { %308 = vmatmul.mubr.msk.f32.vlgmr.msra.gmra.mxu1 %vm39_vm0, %v122_v16 }
 0x192   :  { %v309_v17 = vpop.f32.mrf.mxu1 }
 0x193   :  { %v212_v20 = vadd.f32 %v309_v17, %v271_v18 }
 0x194   :  { %v206_v19 = vpop.f32.mrf.mxu1 }
 0x195   :  { %v207_v21 = vadd.f32 %v271_v18, %v206_v19  ;;  %v216_v24 = vadd.f32 %v212_v20, %v27_v5 }
 0x197   :  { %v215_v22 = vadd.f32 %v207_v21, %v26_v2  ;;  %v222_v25 = vsel %vm39_vm0, %v216_v24, 0.0 }
 0x199   :  { %v219_v23 = vsel %vm39_vm0, %v215_v22, 0.0 }
 0x19a   :  { %220 = vadd.xlane.f32.xlu0 %v219_v23 }
 0x19e   :  { %223 = vadd.xlane.f32.xlu0 %v222_v25 }
 0x223   :  { %v221_v26 = vpop.xlane.xlu0 %220 }
 0x224   :  { %v226_v27 = vmul.f32 0.03125, %v221_v26 }
 0x226   :  { %v228_v28 = vsub.f32 %v215_v22, %v226_v27 }
 0x227   :  { %v224_v29 = vpop.xlane.xlu0 %223 }
 0x228   :  { %v227_v30 = vmul.f32 0.03125, %v224_v29  ;;  %v230_v31 = vmul.f32 %v228_v28, %v228_v28 }
 0x22a   :  { %v229_v32 = vsub.f32 %v216_v24, %v227_v30  ;;  %v232_v33 = vsel %vm39_vm0, %v230_v31, 0.0 }
 0x22b   :  { %233 = vadd.xlane.f32.xlu1 %v232_v33 }
 0x22c   :  { %v231_v34 = vmul.f32 %v229_v32, %v229_v32 }
 0x22e   :  { %v235_v35 = vsel %vm39_vm0, %v231_v34, 0.0 }
 0x22f   :  { %236 = vadd.xlane.f32.xlu1 %v235_v35 }
 0x2b4   :  { %v234_v36 = vpop.xlane.xlu1 %233 }
 0x2b5   :  { %v238_v37 = vmul.f32 0.03125, %v234_v36 }
 0x2b7   :  { %v240_v38 = vadd.f32 1e-05, %v238_v37 }
 0x2b8   :  { %v237_v39 = vpop.xlane.xlu1 %236 }
 0x2b9   :  { %310 = vrsqrt.f32 %v240_v38  ;;  %v239_v40 = vmul.f32 0.03125, %v237_v39 }
 0x2bb   :  { %v241_v41 = vadd.f32 1e-05, %v239_v40 }
 0x2bd   :  { %312 = vrsqrt.f32 %v241_v41 }
 0x2c6   :  { %v311_v42 = vpop.eup %310 }
 0x2c7   :  { %v244_v44 = vmul.f32 %v311_v42, %v228_v28 }
 0x2c9   :  { %v252_v46 = vmul.f32 %v274_v43, %v244_v44 }
 0x2ca   :  { %v313_v47 = vpop.eup %312 }
 0x2cb   :  { %v260_v48 = vadd.f32 %v275_v45, %v252_v46  ;;  %v245_v49 = vmul.f32 %v313_v47, %v229_v32 }
 0x2cd   :  { %262 = vst.msk [vmem:[%s419_s7] sm:$0xff] %vm39_vm0, %v260_v48  ;;  %v253_v50 = vmul.f32 %v274_v43, %v245_v49 }
 0x2cf   :  { %v261_v51 = vadd.f32 %v275_v45, %v253_v50 }
 0x2d1   :  { %263 = vst.msk [vmem:[%s419_s7 + $0x8] sm:$0xff] %vm39_vm0, %v261_v51 }

// kernel: movement_net_forward.8
= control target key start
LH: loop header
LB: loop body
LE: loop exit
PB: predicated region body
PF: predicated region fallthrough
CT: control target
= control target key end

     0   :  { %13 = vsyncpa [#allocation3], 0  ;;  %s1246_s27 = smov [#allocation2]   ;;  %s1446_s0 = inlined_call_operand.vmem [shape: f32[2,8,32], index: 0, kind: input, shape index: {}]   ;;  %s1447_s1 = inlined_call_operand.vmem [shape: f32[2,8], index: 1, kind: input, shape index: {}]   ;;  %s1448_s2 = inlined_call_operand.vmem [shape: f32[32,96], index: 2, kind: input, shape index: {}]   ;;  %s1449_s3 = inlined_call_operand.vmem [shape: f32[1,96], index: 3, kind: input, shape index: {}]   ;;  %s1450_s4 = inlined_call_operand.vmem [shape: f32[32,32], index: 4, kind: input, shape index: {}]   ;;  %s1451_s5 = inlined_call_operand.vmem [shape: f32[1,32], index: 5, kind: input, shape index: {}]   ;;  %s1452_s6 = inlined_call_operand.hbm [shape: f32[1,32], index: 6, kind: input, shape index: {}]   ;;  %s1453_s7 = inlined_call_operand.vmem [shape: f32[1,32], index: 7, kind: input, shape index: {}]   ;;  %s1454_s8 = inlined_call_operand.vmem [shape: f32[2,8,32], index: 8, kind: output, shape index: {}]  }
   0x1   :  { %s32_s28 = sshll.u32 %s1246_s27, 4  ;;  %s33_s28 = int_to_ptr.vmem [resolvable:$true] %s32_s28 }
   0x2   :  { %s1232_s29 = scalar_lea.vmem %s33_s28, 16  ;;  %s1236_s30 = scalar_lea.vmem %s33_s28, 32 }
   0x3   :  { %p1233_p0 = scmp.ne.s32.totalorder %s33_s28, %s1232_s29  ;;  %p1237_p1 = scmp.lt.s32.totalorder %s33_s28, %s33_s28 }
   0x4   :  { %p1238_p2 = scmp.lt.s32.totalorder %s1236_s30, %s1232_s29 }
   0x6   :  { %p1239_p3 = por %p1238_p2, %p1237_p1 }
   0x8   :  { %p1240_p4 = pnand %p1239_p3, %p1233_p0 }
   0xa   :  { %1243 = shalt.err (!%p1240_p4)
}
   0xb   :  { %35 = dma.hbm_to_vmem [thread:$0]  %s1452_s6, 16, %s33_s28, [#allocation3]  }
   0xc   :  { %1244 = dma.done.wait [#allocation3], 16  }
   0xd   :  { %1245 = vsyncadd [#allocation3], 4294967280  ;;  %vm54_vm0 = vcmask 261120   ;;  %v46_v0 = vld [vmem:[%s1448_s2 + $0x18] sm:$0xff]  ;;  %v45_v1 = vld [vmem:[%s1448_s2 + $0x10] sm:$0xff]  ;;  %v1247_v6 = vmov 0.0   ;;  %v318_v16 = vlaneseq }
   0xe   :  { %1129 = vmatprep.subr.mxu0 %v46_v0  ;;  %v1313_v2 = vld [vmem:[%s1446_s0] sm:$0xff]  ;;  %v44_v3 = vld [vmem:[%s1448_s2 + $0x8] sm:$0xff]  ;;  %1140 = vmatprep.subr.mxu1 %v1247_v6  ;;  %vm1248_vm1 = vmmov 0   ;;  %s1249_s22 = smov 96   ;;  %vm152_vm2 = vcmask 130048   ;;  %v1251_v25 = vmov 0  }
   0xf   :  { %1130 = vmatpush3.msra.mxu0 %v46_v0  ;;  %1137 = vmatprep.mubr.msk.f32.mxu0 %vm54_vm0, %v1313_v2  ;;  %v43_v4 = vld [vmem:[%s1448_s2] sm:$0xff]  ;;  %v1326_v5 = vld [vmem:[%s1446_s0 + $0x8] sm:$0xff]  ;;  %v1250_v14 = vmov 1966171168   ;;  %v319_v18 = vshrl.u32 %v318_v16, 7  ;;  %vm347_vm6 = vcmask 64512  }
  0x10   :  { %1131 = vmatprep.subr.mxu0 %v45_v1  ;;  %1142 = vmatprep.mubr.msk.f32.mxu1 %vm1248_vm1, %v1247_v6  ;;  %v1076_v8 = vld [vmem:[%s1449_s3] ss:$0 sm:$0xff]  ;;  %v316_v15 = vunpack.c.l.s4 %v1250_v14  ;;  %s1253_s24 = smov 112   ;;  %s1254_s25 = smov 80   ;;  %v138_v60 = vld [vmem:[%s1450_s4 + $0x8] sm:$0xff] }
  0x11   :  { %1132 = vmatpush3.msra.mxu0 %v45_v1  ;;  %v1084_v20 = vld.sshfl [vmem:[%s1447_s1] sm:$0x11 pattern:$0x75316420]  ;;  %v337_v24 = vsub.s32 0, %v319_v18  ;;  %s1252_s1 = smov 64  }
  0x12   :  { %1133 = vmatprep.subr.mxu0 %v44_v3  ;;  %v317_v17 = vunpack.c.0.s8 %v316_v15  ;;  %v314_v21 = vcombine.high %v1084_v20, %v1084_v20  ;;  %v137_v61 = vld [vmem:[%s1450_s4] sm:$0xff]  ;;  %s1255_s30 = smov 48  }
  0x13   :  { %1134 = vmatpush3.msra.mxu0 %v44_v3 }
  0x14   :  { %1135 = vmatprep.subr.mxu0 %v43_v4  ;;  %v320_v19 = vsub.s32 %v317_v17, %v319_v18 }
  0x15   :  { %1136 = vmatpush3.msra.mxu0 %v43_v4 }
  0x16   :  { %1138 = vmatmul.mubr.msk.f32.vlgmr.msra.gmra.mxu0 %vm54_vm0, %v1326_v5  ;;  %1150 = vmatprep.subr.mxu0 %v1247_v6  ;;  %v321_v22 = vrot.slane %v1084_v20, %v320_v19  ;;  %v328_v23 = vrot.slane %v314_v21, %v320_v19 }
  0x17   :  { %1152 = vmatprep.mubr.msk.f32.mxu0 %vm1248_vm1, %v1247_v6 }
  0x18   :  { %vm331_vm3 = vcmp.gt.f32.partialorder %v321_v22, 0.5  ;;  %vm332_vm4 = vcmp.gt.f32.partialorder %v328_v23, 0.5 }
  0x19   :  { %v333_v26 = vsel %vm331_vm3, 1, %v1251_v25  ;;  %v334_v28 = vsel %vm332_vm4, 1, %v1251_v25 }
  0x1a   :  { %v1360_v27 = vrot.slane %v333_v26, %v337_v24  ;;  %v1363_v30 = vrot.slane %v334_v28, %v337_v24 }
  0x1c   :  { %vm343_vm5 = vcmp.eq.s32.totalorder %v1360_v27, 1  ;;  %vm344_vm7 = vcmp.eq.s32.totalorder %v1363_v30, 1 }
  0xd6   :  { %v1139_v7 = vpop.f32.mrf.mxu0 }
  0xd7   :  { %v1342_v11 = vadd.f32 %v1139_v7, %v1076_v8 }
  0xd8   :  { %v127_v9 = vpop.f32.mrf.mxu0 }
  0xd9   :  { %v1339_v10 = vadd.f32 %v1076_v8, %v127_v9 }
  0xdb   :  { %150 = vrot.lane.b32.xlu0 %v1339_v10, %s1249_s22 }
  0xdf   :  { %228 = vrot.lane.b32.xlu0 %v1342_v11, %s1249_s22 }
 0x14d   :  { %v151_v12 = vpop.permute.xlu0 %150 }
 0x14e   :  { %1141 = vmatpush3.xpose.msk.msra.mxu1 %vm152_vm2, %v151_v12 }
 0x14f   :  { %1145 = vmatprep.subr.mxu1 %v1247_v6 }
 0x151   :  { %1143 = vmatmul.mubr.msk.f32.vlgmr.msra.gmra.mxu1 %vm152_vm2, %v1339_v10  ;;  %v229_v13 = vpop.permute.xlu0 %228 }
 0x152   :  { %1146 = vmatpush3.xpose.msk.msra.mxu1 %vm152_vm2, %v229_v13  ;;  %1147 = vmatprep.mubr.msk.f32.mxu1 %vm1248_vm1, %v1247_v6 }
 0x153   :  { %1155 = vmatprep.subr.mxu1 %v1247_v6 }
 0x155   :  { %1148 = vmatmul.mubr.msk.f32.vlgmr.msra.gmra.mxu1 %vm152_vm2, %v1342_v11 }
 0x156   :  { %1157 = vmatprep.mubr.msk.f32.mxu1 %vm1248_vm1, %v1247_v6 }
 0x211   :  { %v223_v29 = vpop.f32.mrf.mxu1 }
 0x212   :  { %v304_v31 = vmul.f32 0.25, %v223_v29 }
 0x213   :  { %v1144_v32 = vpop.f32.mrf.mxu1 }
 0x214   :  { %v345_v33 = vsel %vm343_vm5, %v304_v31, -1e+09 }
 0x215   :  { %v300_v34 = vpop.f32.mrf.mxu1  ;;  %v348_v35 = vsel %vm347_vm6, %v345_v33, -inf }
 0x216   :  { %v305_v36 = vmul.f32 0.25, %v300_v34  ;;  %349 = vmax.xlane.f32.xlu1 %v348_v35 }
 0x217   :  { %v1149_v37 = vpop.f32.mrf.mxu1 }
 0x218   :  { %v346_v38 = vsel %vm344_vm7, %v305_v36, -1e+09  ;;  %v140_v37 = vld [vmem:[%s1450_s4 + $0x18] sm:$0xff] }
 0x219   :  { %v351_v39 = vsel %vm347_vm6, %v346_v38, -inf }
 0x21a   :  { %352 = vmax.xlane.f32.xlu1 %v351_v39 }
 0x22b   :  { %370 = vrot.lane.b32.xlu1 %v1339_v10, %s1252_s1 }
 0x29f   :  { %v350_v40 = vpop.xlane.xlu1 %349 }
 0x2a0   :  { %v354_v41 = vsub.f32 %v345_v33, %v350_v40 }
 0x2a2   :  { %v356_v42 = vmul.f32 1.442695, %v354_v41 }
 0x2a3   :  { %v353_v43 = vpop.xlane.xlu1 %352 }
 0x2a4   :  { %1204 = vpow2.f32 %v356_v42  ;;  %v355_v44 = vsub.f32 %v346_v38, %v353_v43  ;;  %v1079_v42 = vld [vmem:[%s1451_s5] ss:$0 sm:$0xff] }
 0x2a6   :  { %v358_v45 = vmul.f32 1.442695, %v355_v44 }
 0x2a7   :  { %v371_v46 = vpop.permute.xlu1 %370 }
 0x2a8   :  { %1206 = vpow2.f32 %v358_v45  ;;  %1151 = vmatpush3.msra.mxu0 %v371_v46 }
 0x2a9   :  { %1160 = vmatprep.subr.mxu0 %v138_v60 }
 0x2b1   :  { %v1205_v47 = vpop.eup %1204 }
 0x2b2   :  { %v360_v48 = vsel %vm347_vm6, %v1205_v47, 0.0 }
 0x2b3   :  { %361 = vadd.xlane.f32.xlu0 %v360_v48 }
 0x2b5   :  { %v1207_v49 = vpop.eup %1206 }
 0x2b6   :  { %v363_v50 = vsel %vm347_vm6, %v1207_v49, 0.0 }
 0x2b7   :  { %364 = vadd.xlane.f32.xlu1 %v363_v50 }
 0x2c8   :  { %446 = vrot.lane.b32.xlu1 %v1342_v11, %s1252_s1 }
 0x2c9   :  { %605 = vrot.lane.b32.xlu0 %v1339_v10, %s1253_s24 }
 0x2cc   :  { %607 = vrot.lane.b32.xlu1 %v1339_v10, %s1254_s25 }
 0x2d0   :  { %685 = vrot.lane.b32.xlu1 %v1342_v11, %s1254_s25 }
 0x2d4   :  { %683 = vrot.lane.b32.xlu1 %v1342_v11, %s1253_s24 }
 0x33c   :  { %v362_v51 = vpop.xlane.xlu0 %361 }
 0x33d   :  { %1208 = vrcp.f32 %v362_v51 }
 0x340   :  { %v365_v52 = vpop.xlane.xlu1 %364  ;;  %v606_v59 = vpop.permute.xlu0 %605 }
 0x341   :  { %1210 = vrcp.f32 %v365_v52 }
 0x344   :  { %v447_v53 = vpop.permute.xlu1 %446 }
 0x345   :  { %1156 = vmatpush3.msra.mxu1 %v447_v53 }
 0x346   :  { %1167 = vmatprep.subr.mxu1 %v1247_v6 }
 0x348   :  { %v608_v58 = vpop.permute.xlu1 %607 }
 0x34a   :  { %v1209_v54 = vpop.eup %1208 }
 0x34b   :  { %v368_v55 = vmul.f32 %v1209_v54, %v1205_v47 }
 0x34c   :  { %v686_v63 = vpop.permute.xlu1 %685 }
 0x34d   :  { %1153 = vmatmul.mubr.msk.f32.vlgmr.msra.gmra.mxu0 %vm347_vm6, %v368_v55 }
 0x34e   :  { %v1211_v56 = vpop.eup %1210  ;;  %1161 = vmatpush3.msra.mxu0 %v138_v60 }
 0x34f   :  { %v369_v57 = vmul.f32 %v1211_v56, %v1207_v49  ;;  %1162 = vmatprep.subr.mxu0 %v137_v61 }
 0x350   :  { %1163 = vmatpush3.msra.mxu0 %v137_v61  ;;  %v684_v4 = vpop.permute.xlu1 %683 }
 0x351   :  { %1158 = vmatmul.mubr.msk.f32.vlgmr.msra.gmra.mxu1 %vm347_vm6, %v369_v57  ;;  %1172 = vmatprep.subr.mxu0 %v1247_v6 }
 0x352   :  { %1168 = vmatpush3.xpose.msk.msra.mxu1 %vm152_vm2, %v608_v58  ;;  %1169 = vmatprep.mubr.msk.f32.mxu1 %vm1248_vm1, %v1247_v6 }
 0x353   :  { %1177 = vmatprep.subr.mxu1 %v1247_v6 }
 0x355   :  { %1170 = vmatmul.mubr.msk.f32.vlgmr.msra.gmra.mxu1 %vm152_vm2, %v606_v59 }
 0x356   :  { %1179 = vmatprep.mubr.msk.f32.mxu1 %vm1248_vm1, %v1247_v6 }
 0x40d   :  { %v442_v62 = vpop.f32.mrf.mxu0 }
 0x40e   :  { %1164 = vmatprep.mubr.msk.f32.mxu0 %vm152_vm2, %v442_v62 }
 0x40f   :  { %v1154_v0 = vpop.f32.mrf.mxu0 }
 0x411   :  { %v518_v1 = vpop.f32.mrf.mxu1 }
 0x412   :  { %1165 = vmatmul.mubr.msk.f32.vlgmr.msra.gmra.mxu0 %vm152_vm2, %v518_v1 }
 0x413   :  { %1173 = vmatpush3.xpose.msk.msra.mxu0 %vm152_vm2, %v686_v63  ;;  %v1159_v3 = vpop.f32.mrf.mxu1  ;;  %1174 = vmatprep.mubr.msk.f32.mxu0 %vm1248_vm1, %v1247_v6 }
 0x414   :  { %1182 = vmatprep.subr.mxu0 %v1247_v6 }
 0x415   :  { %v679_v7 = vpop.f32.mrf.mxu1 }
 0x416   :  { %v761_v8 = vmul.f32 0.25, %v679_v7  ;;  %1175 = vmatmul.mubr.msk.f32.vlgmr.msra.gmra.mxu0 %vm152_vm2, %v684_v4  ;;  %v1097_v7 = vld [vmem:[#allocation2] ss:$0 sm:$0xff] }
 0x417   :  { %v1171_v9 = vpop.f32.mrf.mxu1  ;;  %1184 = vmatprep.mubr.msk.f32.mxu0 %vm1248_vm1, %v1247_v6 }
 0x418   :  { %v763_v12 = vsel %vm343_vm5, %v761_v8, -1e+09 }
 0x419   :  { %v765_v13 = vsel %vm347_vm6, %v763_v12, -inf }
 0x41a   :  { %766 = vmax.xlane.f32.xlu1 %v765_v13 }
 0x4a3   :  { %v767_v14 = vpop.xlane.xlu1 %766 }
 0x4a4   :  { %v771_v15 = vsub.f32 %v763_v12, %v767_v14  ;;  %v1098_v12 = vld [vmem:[%s1453_s7] ss:$0 sm:$0xff] }
 0x4a6   :  { %v773_v16 = vmul.f32 1.442695, %v771_v15 }
 0x4a8   :  { %1212 = vpow2.f32 %v773_v16 }
 0x4b5   :  { %v1213_v17 = vpop.eup %1212 }
 0x4b6   :  { %v777_v18 = vsel %vm347_vm6, %v1213_v17, 0.0 }
 0x4b7   :  { %778 = vadd.xlane.f32.xlu1 %v777_v18 }
 0x4d2   :  { %v1166_v19 = vpop.f32.mrf.mxu0 }
 0x4d3   :  { %v604_v43 = vadd.f32 %v1166_v19, %v1079_v42 }
 0x4d4   :  { %v594_v20 = vpop.f32.mrf.mxu0 }
 0x4d5   :  { %v603_v45 = vadd.f32 %v1079_v42, %v594_v20 }
 0x4d6   :  { %v757_v21 = vpop.f32.mrf.mxu0 }
 0x4d7   :  { %v762_v22 = vmul.f32 0.25, %v757_v21 }
 0x4d8   :  { %v1176_v23 = vpop.f32.mrf.mxu0 }
 0x4d9   :  { %v764_v6 = vsel %vm344_vm7, %v762_v22, -1e+09 }
 0x4da   :  { %v768_v24 = vsel %vm347_vm6, %v764_v6, -inf }
 0x4db   :  { %769 = vmax.xlane.f32.xlu0 %v768_v24 }
 0x4f1   :  { %863 = vrot.lane.b32.xlu0 %v1342_v11, %s1255_s30 }
 0x540   :  { %v779_v30 = vpop.xlane.xlu1 %778 }
 0x564   :  { %v770_v25 = vpop.xlane.xlu0 %769 }
 0x565   :  { %v772_v26 = vsub.f32 %v764_v6, %v770_v25 }
 0x567   :  { %v775_v27 = vmul.f32 1.442695, %v772_v26 }
 0x568   :  { %v864_v28 = vpop.permute.xlu0 %863 }
 0x569   :  { %1214 = vpow2.f32 %v775_v27  ;;  %1183 = vmatpush3.msra.mxu0 %v864_v28 }
 0x56a   :  { %1216 = vrcp.f32 %v779_v30 }
 0x576   :  { %v1215_v29 = vpop.eup %1214 }
 0x577   :  { %v780_v31 = vsel %vm347_vm6, %v1215_v29, 0.0  ;;  %v1217_v33 = vpop.eup %1216 }
 0x578   :  { %781 = vadd.xlane.f32.xlu1 %v780_v31  ;;  %v785_v35 = vmul.f32 %v1217_v33, %v1213_v17 }
 0x589   :  { %787 = vrot.lane.b32.xlu1 %v1339_v10, %s1255_s30  ;;  %v139_v10 = vld [vmem:[%s1450_s4 + $0x10] sm:$0xff] }
 0x601   :  { %v782_v32 = vpop.xlane.xlu1 %781 }
 0x602   :  { %1218 = vrcp.f32 %v782_v32 }
 0x605   :  { %v788_v34 = vpop.permute.xlu1 %787 }
 0x606   :  { %1178 = vmatpush3.msra.mxu1 %v788_v34 }
 0x607   :  { %1180 = vmatmul.mubr.msk.f32.vlgmr.msra.gmra.mxu1 %vm347_vm6, %v785_v35  ;;  %1187 = vmatprep.subr.mxu1 %v140_v37 }
 0x608   :  { %1188 = vmatpush3.msra.mxu1 %v140_v37 }
 0x609   :  { %1189 = vmatprep.subr.mxu1 %v139_v10 }
 0x60a   :  { %1190 = vmatpush3.msra.mxu1 %v139_v10 }
 0x60f   :  { %v1219_v11 = vpop.eup %1218 }
 0x610   :  { %v786_v36 = vmul.f32 %v1219_v11, %v1215_v29 }
 0x612   :  { %1185 = vmatmul.mubr.msk.f32.vlgmr.msra.gmra.mxu0 %vm347_vm6, %v786_v36 }
 0x6c7   :  { %v859_v38 = vpop.f32.mrf.mxu1 }
 0x6c8   :  { %1191 = vmatprep.mubr.msk.f32.mxu1 %vm152_vm2, %v859_v38 }
 0x6c9   :  { %v1181_v39 = vpop.f32.mrf.mxu1 }
 0x6d2   :  { %v935_v40 = vpop.f32.mrf.mxu0 }
 0x6d3   :  { %1192 = vmatmul.mubr.msk.f32.vlgmr.msra.gmra.mxu1 %vm152_vm2, %v935_v40 }
 0x6d4   :  { %v1186_v41 = vpop.f32.mrf.mxu0 }
 0x793   :  { %v1193_v44 = vpop.f32.mrf.mxu1 }
 0x794   :  { %v1021_v46 = vadd.f32 %v1193_v44, %v604_v43 }
 0x795   :  { %v1011_v47 = vpop.f32.mrf.mxu1 }
 0x796   :  { %v1020_v48 = vadd.f32 %v1011_v47, %v603_v45  ;;  %v1023_v49 = vadd.f32 %v1021_v46, %v1326_v5 }
 0x798   :  { %v1029_v50 = vsel %vm54_vm0, %v1023_v49, 0.0  ;;  %v1022_v51 = vadd.f32 %v1020_v48, %v1313_v2 }
 0x799   :  { %1030 = vadd.xlane.f32.xlu0 %v1029_v50 }
 0x79a   :  { %v1026_v52 = vsel %vm54_vm0, %v1022_v51, 0.0 }
 0x79b   :  { %1027 = vadd.xlane.f32.xlu1 %v1026_v52 }
 0x822   :  { %v1031_v53 = vpop.xlane.xlu0 %1030 }
 0x823   :  { %v1034_v54 = vmul.f32 0.03125, %v1031_v53 }
 0x824   :  { %v1028_v55 = vpop.xlane.xlu1 %1027 }
 0x825   :  { %v1036_v56 = vsub.f32 %v1023_v49, %v1034_v54  ;;  %v1033_v57 = vmul.f32 0.03125, %v1028_v55 }
 0x827   :  { %v1035_v58 = vsub.f32 %v1022_v51, %v1033_v57  ;;  %v1038_v59 = vmul.f32 %v1036_v56, %v1036_v56 }
 0x829   :  { %v1042_v60 = vsel %vm54_vm0, %v1038_v59, 0.0  ;;  %v1037_v61 = vmul.f32 %v1035_v58, %v1035_v58 }
 0x82a   :  { %1043 = vadd.xlane.f32.xlu0 %v1042_v60 }
 0x82b   :  { %v1039_v5 = vsel %vm54_vm0, %v1037_v61, 0.0 }
 0x82c   :  { %1040 = vadd.xlane.f32.xlu1 %v1039_v5 }
 0x8b3   :  { %v1044_v62 = vpop.xlane.xlu0 %1043 }
 0x8b4   :  { %v1046_v2 = vmul.f32 0.03125, %v1044_v62 }
 0x8b5   :  { %v1041_v63 = vpop.xlane.xlu1 %1040 }
 0x8b6   :  { %v1048_v0 = vadd.f32 1e-05, %v1046_v2  ;;  %v1045_v1 = vmul.f32 0.03125, %v1041_v63 }
 0x8b8   :  { %1220 = vrsqrt.f32 %v1048_v0  ;;  %v1047_v3 = vadd.f32 1e-05, %v1045_v1 }
 0x8ba   :  { %1222 = vrsqrt.f32 %v1047_v3 }
 0x8c5   :  { %v1221_v4 = vpop.eup %1220 }
 0x8c6   :  { %v1052_v8 = vmul.f32 %v1221_v4, %v1036_v56 }
 0x8c7   :  { %v1223_v9 = vpop.eup %1222 }
 0x8c8   :  { %v1060_v13 = vmul.f32 %v1097_v7, %v1052_v8  ;;  %v1051_v14 = vmul.f32 %v1223_v9, %v1035_v58 }
 0x8ca   :  { %v1068_v15 = vadd.f32 %v1098_v12, %v1060_v13  ;;  %v1059_v16 = vmul.f32 %v1097_v7, %v1051_v14 }
 0x8cc   :  { %1070 = vst.msk [vmem:[%s1454_s8 + $0x8] sm:$0xff] %vm54_vm0, %v1068_v15  ;;  %v1067_v17 = vadd.f32 %v1098_v12, %v1059_v16 }
 0x8ce   :  { %1069 = vst.msk [vmem:[%s1454_s8] sm:$0xff] %vm54_vm0, %v1067_v17 }
 0x8cf   :  { %1075 = vsyncpa [#allocation3], 1 }

// kernel: movement_net_forward.11
= control target key start
LH: loop header
LB: loop body
LE: loop exit
PB: predicated region body
PF: predicated region fallthrough
CT: control target
= control target key end

     0   :  { %vm27_vm0 = vcmask 261120   ;;  %vm109_vm1 = vcmask 23552   ;;  %s185_s1 = inlined_call_operand.vmem [shape: f32[32,3], index: 1, kind: input, shape index: {}]   ;;  %s186_s0 = inlined_call_operand.vmem [shape: f32[16,32], index: 0, kind: input, shape index: {}]   ;;  %s187_s2 = inlined_call_operand.vmem [shape: f32[1,3], index: 2, kind: input, shape index: {}]   ;;  %s188_s3 = inlined_call_operand.vmem [shape: f32[16,3], index: 3, kind: output, shape index: {}]  }
   0x1   :  { %v19_v0 = vld [vmem:[%s185_s1 + $0x18] sm:$0xff]  ;;  %v18_v1 = vld [vmem:[%s185_s1 + $0x10] sm:$0xff]  ;;  %v14_v2 = vld [vmem:[%s186_s0] sm:$0xff] }
   0x2   :  { %125 = vmatprep.subr.mxu0 %v19_v0  ;;  %v17_v3 = vld [vmem:[%s185_s1 + $0x8] sm:$0xff]  ;;  %133 = vmatprep.mubr.msk.f32.mxu0 %vm27_vm0, %v14_v2  ;;  %v16_v4 = vld [vmem:[%s185_s1] sm:$0xff] }
   0x3   :  { %126 = vmatpush3.msra.mxu0 %v19_v0  ;;  %v15_v5 = vld [vmem:[%s186_s0 + $0x8] sm:$0xff]  ;;  %v116_v6 = vld [vmem:[%s187_s2] ss:$0 sm:$0xff] }
   0x4   :  { %127 = vmatprep.subr.mxu0 %v18_v1 }
   0x5   :  { %128 = vmatpush3.msra.mxu0 %v18_v1 }
   0x6   :  { %129 = vmatprep.subr.mxu0 %v17_v3 }
   0x7   :  { %130 = vmatpush3.msra.mxu0 %v17_v3 }
   0x8   :  { %131 = vmatprep.subr.mxu0 %v16_v4 }
   0x9   :  { %132 = vmatpush3.msra.mxu0 %v16_v4 }
   0xa   :  { %134 = vmatmul.mubr.msk.f32.vlgmr.msra.gmra.mxu0 %vm27_vm0, %v15_v5 }
  0xca   :  { %v135_v7 = vpop.f32.mrf.mxu0 }
  0xcb   :  { %v106_v8 = vadd.f32 %v135_v7, %v116_v6 }
  0xcc   :  { %v100_v9 = vpop.f32.mrf.mxu0 }
  0xcd   :  { %111 = vst.msk [vmem:[%s188_s3 + $0x8] sm:$0xff] %vm109_vm1, %v106_v8  ;;  %v101_v10 = vadd.f32 %v116_v6, %v100_v9 }
  0xcf   :  { %110 = vst.msk [vmem:[%s188_s3] sm:$0xff] %vm109_vm1, %v101_v10 }

// kernel: movement_net_forward.10
= control target key start
LH: loop header
LB: loop body
LE: loop exit
PB: predicated region body
PF: predicated region fallthrough
CT: control target
= control target key end

     0   :  { %v64_v0 = vlaneseq  ;;  %v1742_v3 = vmov 0.0   ;;  %v1743_v5 = vmov 1983009808   ;;  %vm93_vm0 = vcmask 261120   ;;  %s1746_s22 = smov 64   ;;  %s1747_s24 = smov 32   ;;  %s2123_s4 = inlined_call_operand.vmem [shape: f32[32,128], index: 4, kind: input, shape index: {}]   ;;  %s2124_s5 = inlined_call_operand.vmem [shape: f32[32,128], index: 5, kind: input, shape index: {}]   ;;  %s2125_s0 = inlined_call_operand.vmem [shape: f32[8,2,32], index: 0, kind: input, shape index: {}]   ;;  %s2126_s2 = inlined_call_operand.vmem [shape: f32[2,32], index: 2, kind: input, shape index: {}]   ;;  %s2127_s6 = inlined_call_operand.vmem [shape: f32[1,128], index: 6, kind: input, shape index: {}]   ;;  %s2128_s1 = inlined_call_operand.vmem [shape: s32[2,1], index: 1, kind: input, shape index: {}]   ;;  %s2129_s3 = inlined_call_operand.vmem [shape: f32[2,32], index: 3, kind: input, shape index: {}]   ;;  %s2130_s7 = inlined_call_operand.vmem [shape: f32[32,9], index: 7, kind: input, shape index: {}]   ;;  %s2131_s8 = inlined_call_operand.vmem [shape: f32[1,9], index: 8, kind: input, shape index: {}]   ;;  %s2132_s9 = inlined_call_operand.vmem [shape: f32[8,2,9], index: 9, kind: output, shape index: {}]  }
   0x1   :  { %v43_v1 = vld [vmem:[%s2123_s4 + $0x18] sm:$0xff]  ;;  %v42_v2 = vld [vmem:[%s2123_s4 + $0x10] sm:$0xff]  ;;  %1570 = vmatprep.subr.mxu1 %v1742_v3  ;;  %v62_v6 = vunpack.c.l.s4 %v1743_v5  ;;  %v41_v7 = vld [vmem:[%s2123_s4 + $0x8] sm:$0xff]  ;;  %vm1744_vm1 = vmmov 0   ;;  %v1745_v34 = vmov 0   ;;  %vm314_vm4 = vcmask 254976  }
   0x2   :  { %v1809_v4 = vld [vmem:[%s2124_s5 + $0x18] sm:$0xff]  ;;  %1559 = vmatprep.subr.mxu0 %v43_v1  ;;  %v1818_v8 = vld [vmem:[%s2124_s5 + $0x10] sm:$0xff]  ;;  %v65_v9 = vshrl.u32 %v64_v0, 7  ;;  %v40_v10 = vld [vmem:[%s2123_s4] sm:$0xff]  ;;  %1578 = vmatprep.mubr.msk.f32.mxu1 %vm1744_vm1, %v1742_v3  ;;  %vm1464_vm11 = vcmask 66560  }
   0x3   :  { %1571 = vmatpush3.msra.mxu1 %v1809_v4  ;;  %1560 = vmatpush3.msra.mxu0 %v43_v1  ;;  %v32_v11 = vld [vmem:[%s2125_s0] sm:$0x3]  ;;  %v33_v12 = vld [vmem:[%s2125_s0 + $0x2] sm:$0x3]  ;;  %v34_v13 = vld [vmem:[%s2125_s0 + $0x4] sm:$0x3]  ;;  %v63_v14 = vunpack.c.0.s8 %v62_v6 }
   0x4   :  { %1572 = vmatprep.subr.mxu1 %v1742_v3  ;;  %1561 = vmatprep.subr.mxu0 %v42_v2  ;;  %v35_v15 = vld [vmem:[%s2125_s0 + $0x6] sm:$0x3]  ;;  %v59_v16 = vcombine.low %v32_v11, %v33_v12  ;;  %v1840_v17 = vld [vmem:[%s2124_s5 + $0x8] sm:$0xff]  ;;  %v1869_v29 = vld [vmem:[%s2126_s2] sm:$0x3] }
   0x5   :  { %1573 = vmatpush3.msra.mxu1 %v1818_v8  ;;  %v36_v18 = vld [vmem:[%s2125_s0 + $0x8] sm:$0x3]  ;;  %1562 = vmatpush3.msra.mxu0 %v42_v2  ;;  %v60_v19 = vcombine.low %v34_v13, %v35_v15  ;;  %v1846_v20 = vsub.s32 %v63_v14, %v65_v9  ;;  %v37_v21 = vld [vmem:[%s2125_s0 + $0xa] sm:$0x3]  ;;  %v38_v22 = vld [vmem:[%s2125_s0 + $0xc] sm:$0x3] }
   0x6   :  { %1574 = vmatprep.subr.mxu1 %v1742_v3  ;;  %v39_v23 = vld [vmem:[%s2125_s0 + $0xe] sm:$0x3]  ;;  %1563 = vmatprep.subr.mxu0 %v41_v7  ;;  %v76_v24 = vcombine.low %v36_v18, %v37_v21  ;;  %v1861_v26 = vld [vmem:[%s2124_s5] sm:$0xff] }
   0x7   :  { %1575 = vmatpush3.msra.mxu1 %v1840_v17  ;;  %v77_v25 = vcombine.low %v38_v22, %v39_v23  ;;  %1564 = vmatpush3.msra.mxu0 %v41_v7  ;;  %v67_v27 = vrot.slane %v59_v16, %v1846_v20  ;;  %v74_v28 = vrot.slane %v60_v19, %v1846_v20  ;;  %v1477_v35 = vld [vmem:[%s2127_s6] ss:$0 sm:$0xff] }
   0x8   :  { %1576 = vmatprep.subr.mxu1 %v1742_v3  ;;  %1565 = vmatprep.subr.mxu0 %v40_v10  ;;  %v84_v30 = vrot.slane %v76_v24, %v1846_v20  ;;  %v1913_v44 = vld [vmem:[%s2128_s1] sm:$0x3]  ;;  %s1748_s1 = smov 96  }
   0x9   :  { %v91_v31 = vrot.slane %v77_v25, %v1846_v20  ;;  %1577 = vmatpush3.msra.mxu1 %v1861_v26  ;;  %1566 = vmatpush3.msra.mxu0 %v40_v10  ;;  %v75_v32 = vcombine.low %v67_v27, %v74_v28  ;;  %v179_v45 = vld [vmem:[%s2129_s3] sm:$0x3]  ;;  %vm282_vm2 = vcmp.gt.s32.totalorder %v1913_v44, 0  ;;  %vm422_vm3 = vcmp.gt.s32.totalorder %v1913_v44, 1 }
   0xa   :  { %1579 = vmatmul.mubr.msk.f32.vlgmr.msra.gmra.mxu1 %vm93_vm0, %v1869_v29  ;;  %1581 = vmatprep.subr.mxu0 %v1742_v3  ;;  %v1482_v46 = vsel %vm282_vm2, 1.0, %v1742_v3  ;;  %v1485_v5 = vsel %vm422_vm3, 1.0, %v1742_v3  ;;  %vm568_vm5 = vcmp.gt.s32.totalorder %v1913_v44, 2  ;;  %vm706_vm6 = vcmp.gt.s32.totalorder %v1913_v44, 3 }
   0xb   :  { %v92_v33 = vcombine.low %v84_v30, %v91_v31  ;;  %1567 = vmatprep.mubr.msk.f32.mxu0 %vm93_vm0, %v75_v32  ;;  %1592 = vmatprep.subr.mxu1 %v1742_v3  ;;  %v291_v53 = vsub.f32 1.0, %v1482_v46  ;;  %v436_v7 = vsub.f32 1.0, %v1485_v5  ;;  %vm840_vm7 = vcmp.gt.s32.totalorder %v1913_v44, 4 }
   0xc   :  { %1593 = vmatpush3.msra.mxu1 %v1809_v4  ;;  %1600 = vmatprep.mubr.msk.f32.mxu1 %vm1744_vm1, %v1742_v3  ;;  %vm980_vm8 = vcmp.gt.s32.totalorder %v1913_v44, 5  ;;  %vm1126_vm9 = vcmp.gt.s32.totalorder %v1913_v44, 6  ;;  %vm1264_vm10 = vcmp.gt.s32.totalorder %v1913_v44, 7 }
   0xd   :  { %1568 = vmatmul.mubr.msk.f32.vlgmr.msra.gmra.mxu0 %vm93_vm0, %v92_v33  ;;  %1594 = vmatprep.subr.mxu1 %v1742_v3 }
   0xe   :  { %1582 = vmatpush3.msra.mxu0 %v1809_v4  ;;  %1589 = vmatprep.mubr.msk.f32.mxu0 %vm1744_vm1, %v1742_v3 }
   0xf   :  { %1583 = vmatprep.subr.mxu0 %v1742_v3  ;;  %1595 = vmatpush3.msra.mxu1 %v1818_v8 }
  0x10   :  { %1584 = vmatpush3.msra.mxu0 %v1818_v8  ;;  %1596 = vmatprep.subr.mxu1 %v1742_v3 }
  0x11   :  { %1585 = vmatprep.subr.mxu0 %v1742_v3  ;;  %1597 = vmatpush3.msra.mxu1 %v1840_v17 }
  0x12   :  { %1586 = vmatpush3.msra.mxu0 %v1840_v17  ;;  %1598 = vmatprep.subr.mxu1 %v1742_v3 }
  0x13   :  { %1587 = vmatprep.subr.mxu0 %v1742_v3  ;;  %1599 = vmatpush3.msra.mxu1 %v1861_v26 }
  0x14   :  { %1588 = vmatpush3.msra.mxu0 %v1861_v26  ;;  %1614 = vmatprep.subr.mxu1 %v1742_v3 }
  0x15   :  { %1603 = vmatprep.subr.mxu0 %v1742_v3  ;;  %1677 = vset.pattern.permute.xlu0 %v1745_v34 }
  0x16   :  { %1676 = vset.pattern.permute.xlu1 %v1745_v34 }
  0xca   :  { %v249_v36 = vpop.f32.mrf.mxu1 }
  0xcc   :  { %v1580_v38 = vpop.f32.mrf.mxu1 }
  0xcd   :  { %v1569_v37 = vpop.f32.mrf.mxu0 }
  0xce   :  { %v1905_v39 = vadd.f32 %v1569_v37, %v1477_v35 }
  0xcf   :  { %v164_v40 = vpop.f32.mrf.mxu0 }
  0xd0   :  { %v1907_v41 = vadd.f32 %v1477_v35, %v164_v40 }
  0xd2   :  { %v253_v42 = vadd.f32 %v249_v36, %v1907_v41 }
  0xd4   :  { %1678 = vtanh.f32 %v253_v42  ;;  %v1481_v47 = vmul.f32 -1.442695, %v253_v42 }
  0xd6   :  { %1680 = vpow2.f32 %v1481_v47 }
  0xe1   :  { %v1679_v43 = vpop.eup %1678 }
  0xe2   :  { %267 = vrot.lane.b32.xlu0 %v1679_v43, %s1746_s22 }
  0xe3   :  { %v1681_v48 = vpop.eup %1680 }
  0xe4   :  { %v257_v49 = vadd.f32 1.0, %v1681_v48 }
  0xe6   :  { %262 = vrot.lane.b32.xlu0 %v179_v45, %s1747_s24  ;;  %1682 = vrcp.f32 %v257_v49 }
  0xea   :  { %287 = vperm.xlu0 %1677, %v1482_v46  }
  0xf3   :  { %v1683_v50 = vpop.eup %1682 }
 0x154   :  { %v268_v51 = vpop.permute.xlu0 %267 }
 0x155   :  { %v270_v52 = vmul.f32 %v1683_v50, %v268_v51 }
 0x157   :  { %272 = vrot.lane.b32.xlu1 %v270_v52, %s1747_s24 }
 0x158   :  { %v263_v54 = vpop.permute.xlu0 %262 }
 0x159   :  { %v265_v55 = vmul.f32 %v1683_v50, %v263_v54 }
 0x15b   :  { %294 = vperm.xlu1 %1676, %v291_v53  }
 0x165   :  { %v288_v63 = vpop.permute.xlu0 %287 }
 0x1c9   :  { %v273_v56 = vpop.permute.xlu1 %272 }
 0x1ca   :  { %v275_v57 = vadd.f32 %v273_v56, %v265_v55 }
 0x1cc   :  { %1684 = vtanh.f32 %v275_v57  ;;  %v303_v12 = vmul.f32 %v288_v63, %v275_v57 }
 0x1d6   :  { %v295_v58 = vpop.permute.xlu1 %294 }
 0x1d7   :  { %v297_v60 = vmul.f32 %v295_v58, %v1869_v29  ;;  %v304_v6 = vmul.f32 %v295_v58, %v179_v45 }
 0x1d9   :  { %v1685_v59 = vpop.eup %1684 }
 0x1da   :  { %278 = vrot.lane.b32.xlu1 %v1685_v59, %s1746_s22 }
 0x1de   :  { %299 = vrot.lane.b32.xlu1 %v297_v60, %s1748_s1 }
 0x24c   :  { %v279_v61 = vpop.permute.xlu1 %278 }
 0x24d   :  { %v281_v62 = vmul.f32 %v1683_v50, %v279_v61 }
 0x24f   :  { %v1926_v0 = vmul.f32 %v288_v63, %v281_v62  ;;  %v1488_v63 = vsel %vm568_vm5, 1.0, %v1742_v3 }
 0x250   :  { %v300_v1 = vpop.permute.xlu1 %299 }
 0x251   :  { %v302_v2 = vadd.f32 %v300_v1, %v1926_v0 }
 0x253   :  { %317 = vrot.lane.b32.xlu0 %v302_v2, %s1747_s24 }
 0x257   :  { %306 = vrot.lane.b32.xlu0 %v304_v6, %s1747_s24 }
 0x25b   :  { %439 = vperm.xlu0 %1677, %v436_v7  }
 0x25f   :  { %427 = vperm.xlu0 %1677, %v1485_v5  }
 0x2c5   :  { %v318_v9 = vpop.permute.xlu0 %317 }
 0x2c6   :  { %1590 = vmatmul.mubr.msk.f32.vlgmr.msra.gmra.mxu0 %vm93_vm0, %v318_v9  ;;  %v582_v9 = vsub.f32 1.0, %v1488_v63 }
 0x2c7   :  { %1604 = vmatpush3.msra.mxu0 %v1809_v4  ;;  %1611 = vmatprep.mubr.msk.f32.mxu0 %vm1744_vm1, %v1742_v3 }
 0x2c8   :  { %1605 = vmatprep.subr.mxu0 %v1742_v3 }
 0x2c9   :  { %1606 = vmatpush3.msra.mxu0 %v1818_v8  ;;  %v307_v10 = vpop.permute.xlu0 %306 }
 0x2ca   :  { %1607 = vmatprep.subr.mxu0 %v1742_v3  ;;  %v309_v14 = vadd.f32 %v307_v10, %v303_v12 }
 0x2cb   :  { %1608 = vmatpush3.msra.mxu0 %v1840_v17 }
 0x2cc   :  { %1609 = vmatprep.subr.mxu0 %v1742_v3  ;;  %v403_v30 = vrot.slane %v309_v14, 6 }
 0x2cd   :  { %1610 = vmatpush3.msra.mxu0 %v1861_v26 }
 0x2ce   :  { %1625 = vmatprep.subr.mxu0 %v1742_v3 }
 0x2d6   :  { %v440_v11 = vpop.permute.xlu0 %439 }
 0x2d7   :  { %v442_v13 = vmul.f32 %v440_v11, %v302_v2  ;;  %v454_v15 = vmul.f32 %v440_v11, %v309_v14 }
 0x2d9   :  { %444 = vrot.lane.b32.xlu0 %v442_v13, %s1747_s24 }
 0x2da   :  { %v428_v40 = vpop.permute.xlu0 %427 }
 0x2dd   :  { %456 = vrot.lane.b32.xlu0 %v454_v15, %s1748_s1 }
 0x34b   :  { %v445_v42 = vpop.permute.xlu0 %444 }
 0x34f   :  { %v457_v49 = vpop.permute.xlu0 %456 }
 0x386   :  { %v387_v16 = vpop.f32.mrf.mxu0 }
 0x387   :  { %v392_v18 = vrot.slane %v387_v16, 6 }
 0x388   :  { %v1591_v19 = vpop.f32.mrf.mxu0 }
 0x389   :  { %v394_v21 = vadd.f32 %v392_v18, %v1907_v41 }
 0x38b   :  { %1686 = vtanh.f32 %v394_v21  ;;  %v1484_v23 = vmul.f32 -1.442695, %v394_v21 }
 0x38d   :  { %1688 = vpow2.f32 %v1484_v23 }
 0x398   :  { %v1687_v22 = vpop.eup %1686 }
 0x399   :  { %407 = vrot.lane.b32.xlu1 %v1687_v22, %s1746_s22 }
 0x39a   :  { %v1689_v24 = vpop.eup %1688 }
 0x39b   :  { %v398_v25 = vadd.f32 1.0, %v1689_v24 }
 0x39d   :  { %1690 = vrcp.f32 %v398_v25 }
 0x3aa   :  { %v1691_v27 = vpop.eup %1690 }
 0x3ab   :  { %v405_v31 = vmul.f32 %v1691_v27, %v403_v30 }
 0x40b   :  { %v408_v28 = vpop.permute.xlu1 %407 }
 0x40c   :  { %v410_v29 = vmul.f32 %v1691_v27, %v408_v28 }
 0x40e   :  { %412 = vrot.lane.b32.xlu1 %v410_v29, %s1747_s24 }
 0x480   :  { %v413_v32 = vpop.permute.xlu1 %412 }
 0x481   :  { %v415_v33 = vadd.f32 %v413_v32, %v405_v31 }
 0x483   :  { %1692 = vtanh.f32 %v415_v33  ;;  %v449_v38 = vrot.slane %v415_v33, 2 }
 0x490   :  { %v1693_v34 = vpop.eup %1692 }
 0x491   :  { %418 = vrot.lane.b32.xlu1 %v1693_v34, %s1746_s22 }
 0x503   :  { %v419_v35 = vpop.permute.xlu1 %418 }
 0x504   :  { %v421_v36 = vmul.f32 %v1691_v27, %v419_v35 }
 0x506   :  { %v431_v37 = vrot.slane %v421_v36, 2 }
 0x508   :  { %432 = vrot.lane.b32.xlu1 %v431_v37, %s1747_s24 }
 0x50c   :  { %450 = vrot.lane.b32.xlu1 %v449_v38, %s1748_s1 }
 0x57a   :  { %v433_v43 = vpop.permute.xlu1 %432 }
 0x57b   :  { %v435_v45 = vmul.f32 %v433_v43, %v428_v40 }
 0x57d   :  { %v447_v46 = vadd.f32 %v445_v42, %v435_v45  ;;  %461 = vst.msk [vmem:[#allocation2 + $0x2] sm:$0x3] %vm314_vm4, %v435_v45 }
 0x57e   :  { %v451_v47 = vpop.permute.xlu1 %450 }
 0x57f   :  { %v453_v48 = vmul.f32 %v451_v47, %v428_v40  ;;  %1601 = vmatmul.mubr.msk.f32.vlgmr.msra.gmra.mxu1 %vm93_vm0, %v447_v46  ;;  %v1491_v40 = vsel %vm706_vm6, 1.0, %v1742_v3 }
 0x580   :  { %1615 = vmatpush3.msra.mxu1 %v1809_v4  ;;  %1622 = vmatprep.mubr.msk.f32.mxu1 %vm1744_vm1, %v1742_v3  ;;  %v720_v47 = vsub.f32 1.0, %v1491_v40 }
 0x581   :  { %v459_v50 = vadd.f32 %v457_v49, %v453_v48  ;;  %1616 = vmatprep.subr.mxu1 %v1742_v3 }
 0x582   :  { %1617 = vmatpush3.msra.mxu1 %v1818_v8 }
 0x583   :  { %v547_v51 = vrot.slane %v459_v50, 4  ;;  %1618 = vmatprep.subr.mxu1 %v1742_v3 }
 0x584   :  { %1619 = vmatpush3.msra.mxu1 %v1840_v17 }
 0x585   :  { %548 = vrot.lane.b32.xlu0 %v547_v51, %s1747_s24  ;;  %1620 = vmatprep.subr.mxu1 %v1742_v3 }
 0x586   :  { %1621 = vmatpush3.msra.mxu1 %v1861_v26 }
 0x587   :  { %1636 = vmatprep.subr.mxu1 %v1742_v3 }
 0x5f7   :  { %v549_v1 = vpop.permute.xlu0 %548 }
 0x63f   :  { %v531_v52 = vpop.f32.mrf.mxu1 }
 0x640   :  { %v536_v53 = vrot.slane %v531_v52, 4 }
 0x641   :  { %v1602_v54 = vpop.f32.mrf.mxu1 }
 0x642   :  { %v538_v55 = vadd.f32 %v536_v53, %v1907_v41 }
 0x644   :  { %1694 = vtanh.f32 %v538_v55  ;;  %v1487_v57 = vmul.f32 -1.442695, %v538_v55 }
 0x646   :  { %1696 = vpow2.f32 %v1487_v57  ;;  %v1494_v57 = vsel %vm840_vm7, 1.0, %v1742_v3 }
 0x651   :  { %v1695_v56 = vpop.eup %1694 }
 0x652   :  { %553 = vrot.lane.b32.xlu1 %v1695_v56, %s1746_s22 }
 0x653   :  { %v1697_v58 = vpop.eup %1696 }
 0x654   :  { %v542_v59 = vadd.f32 1.0, %v1697_v58 }
 0x656   :  { %1698 = vrcp.f32 %v542_v59  ;;  %v849_v59 = vsub.f32 1.0, %v1494_v57 }
 0x663   :  { %v1699_v60 = vpop.eup %1698 }
 0x664   :  { %v551_v2 = vmul.f32 %v1699_v60, %v549_v1 }
 0x6c4   :  { %v554_v61 = vpop.permute.xlu1 %553 }
 0x6c5   :  { %v556_v62 = vmul.f32 %v1699_v60, %v554_v61 }
 0x6c7   :  { %558 = vrot.lane.b32.xlu1 %v556_v62, %s1747_s24 }
 0x6cb   :  { %573 = vperm.xlu1 %1676, %v1488_v63  }
 0x739   :  { %v559_v5 = vpop.permute.xlu1 %558 }
 0x73a   :  { %v561_v6 = vadd.f32 %v559_v5, %v551_v2 }
 0x73c   :  { %1700 = vtanh.f32 %v561_v6  ;;  %v591_v10 = vrot.slane %v561_v6, 4 }
 0x746   :  { %v574_v15 = vpop.permute.xlu1 %573 }
 0x749   :  { %v1701_v7 = vpop.eup %1700 }
 0x74a   :  { %564 = vrot.lane.b32.xlu0 %v1701_v7, %s1746_s22 }
 0x74e   :  { %585 = vperm.xlu0 %1677, %v582_v9  }
 0x752   :  { %592 = vrot.lane.b32.xlu0 %v591_v10, %s1748_s1 }
 0x7bc   :  { %v565_v11 = vpop.permute.xlu0 %564 }
 0x7bd   :  { %v567_v12 = vmul.f32 %v1699_v60, %v565_v11 }
 0x7bf   :  { %v577_v13 = vrot.slane %v567_v12, 4 }
 0x7c1   :  { %578 = vrot.lane.b32.xlu1 %v577_v13, %s1747_s24 }
 0x7c9   :  { %v586_v14 = vpop.permute.xlu0 %585 }
 0x7ca   :  { %v596_v18 = vmul.f32 %v586_v14, %v459_v50  ;;  %v588_v24 = vmul.f32 %v586_v14, %v447_v46 }
 0x7cd   :  { %v593_v16 = vpop.permute.xlu0 %592 }
 0x7ce   :  { %v595_v19 = vmul.f32 %v593_v16, %v574_v15 }
 0x7d0   :  { %v597_v21 = vadd.f32 %v596_v18, %v595_v19 }
 0x7d2   :  { %v685_v22 = vrot.slane %v597_v21, 2 }
 0x7d4   :  { %686 = vrot.lane.b32.xlu0 %v685_v22, %s1747_s24 }
 0x833   :  { %v579_v23 = vpop.permute.xlu1 %578 }
 0x834   :  { %v581_v25 = vmul.f32 %v579_v23, %v574_v15 }
 0x836   :  { %v589_v27 = vadd.f32 %v588_v24, %v581_v25  ;;  %599 = vst.msk [vmem:[#allocation2 + $0x4] sm:$0x3] %vm314_vm4, %v581_v25 }
 0x838   :  { %1612 = vmatmul.mubr.msk.f32.vlgmr.msra.gmra.mxu0 %vm93_vm0, %v589_v27 }
 0x839   :  { %1626 = vmatpush3.msra.mxu0 %v1809_v4  ;;  %1633 = vmatprep.mubr.msk.f32.mxu0 %vm1744_vm1, %v1742_v3 }
 0x83a   :  { %1627 = vmatprep.subr.mxu0 %v1742_v3 }
 0x83b   :  { %1628 = vmatpush3.msra.mxu0 %v1818_v8 }
 0x83c   :  { %1629 = vmatprep.subr.mxu0 %v1742_v3 }
 0x83d   :  { %1630 = vmatpush3.msra.mxu0 %v1840_v17 }
 0x83e   :  { %1631 = vmatprep.subr.mxu0 %v1742_v3 }
 0x83f   :  { %1632 = vmatpush3.msra.mxu0 %v1861_v26 }
 0x840   :  { %1647 = vmatprep.subr.mxu0 %v1742_v3 }
 0x8f8   :  { %v669_v28 = vpop.f32.mrf.mxu0 }
 0x8f9   :  { %v674_v29 = vrot.slane %v669_v28, 2 }
 0x8fa   :  { %v1613_v30 = vpop.f32.mrf.mxu0 }
 0x8fb   :  { %v676_v31 = vadd.f32 %v674_v29, %v1907_v41  ;;  %v687_v41 = vpop.permute.xlu0 %686  ;;  %v1497_v30 = vsel %vm980_vm8, 1.0, %v1742_v3 }
 0x8fd   :  { %1702 = vtanh.f32 %v676_v31  ;;  %v1490_v33 = vmul.f32 -1.442695, %v676_v31 }
 0x8ff   :  { %1704 = vpow2.f32 %v1490_v33 }
 0x90a   :  { %v1703_v32 = vpop.eup %1702 }
 0x90b   :  { %691 = vrot.lane.b32.xlu1 %v1703_v32, %s1746_s22  ;;  %v994_v32 = vsub.f32 1.0, %v1497_v30 }
 0x90c   :  { %v1705_v34 = vpop.eup %1704 }
 0x90d   :  { %v680_v35 = vadd.f32 1.0, %v1705_v34 }
 0x90f   :  { %1706 = vrcp.f32 %v680_v35 }
 0x91c   :  { %v1707_v36 = vpop.eup %1706 }
 0x91d   :  { %v689_v42 = vmul.f32 %v1707_v36, %v687_v41 }
 0x97d   :  { %v692_v37 = vpop.permute.xlu1 %691 }
 0x97e   :  { %v694_v38 = vmul.f32 %v1707_v36, %v692_v37 }
 0x980   :  { %696 = vrot.lane.b32.xlu1 %v694_v38, %s1747_s24 }
 0x984   :  { %711 = vperm.xlu1 %1676, %v1491_v40  }
 0x9f2   :  { %v697_v43 = vpop.permute.xlu1 %696 }
 0x9f3   :  { %v699_v45 = vadd.f32 %v697_v43, %v689_v42 }
 0x9f5   :  { %1708 = vtanh.f32 %v699_v45  ;;  %v729_v48 = vrot.slane %v699_v45, 6 }
 0x9ff   :  { %v712_v53 = vpop.permute.xlu1 %711 }
 0xa02   :  { %v1709_v46 = vpop.eup %1708 }
 0xa03   :  { %702 = vrot.lane.b32.xlu0 %v1709_v46, %s1746_s22 }
 0xa07   :  { %723 = vperm.xlu0 %1677, %v720_v47  }
 0xa0b   :  { %730 = vrot.lane.b32.xlu0 %v729_v48, %s1748_s1 }
 0xa75   :  { %v703_v49 = vpop.permute.xlu0 %702 }
 0xa76   :  { %v705_v50 = vmul.f32 %v1707_v36, %v703_v49 }
 0xa78   :  { %v715_v51 = vrot.slane %v705_v50, 6 }
 0xa7a   :  { %716 = vrot.lane.b32.xlu1 %v715_v51, %s1747_s24 }
 0xa82   :  { %v724_v52 = vpop.permute.xlu0 %723 }
 0xa83   :  { %v734_v55 = vmul.f32 %v724_v52, %v597_v21  ;;  %v726_v61 = vmul.f32 %v724_v52, %v589_v27 }
 0xa86   :  { %v731_v54 = vpop.permute.xlu0 %730 }
 0xa87   :  { %v733_v56 = vmul.f32 %v731_v54, %v712_v53 }
 0xa89   :  { %v735_v58 = vadd.f32 %v734_v55, %v733_v56 }
 0xa8b   :  { %820 = vrot.lane.b32.xlu0 %v735_v58, %s1747_s24 }
 0xa8f   :  { %852 = vperm.xlu0 %1677, %v849_v59  }
 0xaec   :  { %v717_v60 = vpop.permute.xlu1 %716 }
 0xaed   :  { %v719_v62 = vmul.f32 %v717_v60, %v712_v53 }
 0xaef   :  { %v727_v63 = vadd.f32 %v726_v61, %v719_v62  ;;  %737 = vst.msk [vmem:[#allocation2 + $0x6] sm:$0x3] %vm314_vm4, %v719_v62 }
 0xaf1   :  { %1623 = vmatmul.mubr.msk.f32.vlgmr.msra.gmra.mxu1 %vm93_vm0, %v727_v63 }
 0xaf2   :  { %1637 = vmatpush3.msra.mxu1 %v1809_v4  ;;  %1644 = vmatprep.mubr.msk.f32.mxu1 %vm1744_vm1, %v1742_v3 }
 0xaf3   :  { %1638 = vmatprep.subr.mxu1 %v1742_v3 }
 0xaf4   :  { %1639 = vmatpush3.msra.mxu1 %v1818_v8 }
 0xaf5   :  { %1640 = vmatprep.subr.mxu1 %v1742_v3 }
 0xaf6   :  { %1641 = vmatpush3.msra.mxu1 %v1840_v17  ;;  %v1283_v44 = vld [vmem:[#allocation2 + $0x6] sm:$0x3] }
 0xaf7   :  { %1642 = vmatprep.subr.mxu1 %v1742_v3 }
 0xaf8   :  { %1643 = vmatpush3.msra.mxu1 %v1861_v26 }
 0xafd   :  { %v821_v14 = vpop.permute.xlu0 %820 }
 0xb0a   :  { %v853_v15 = vpop.permute.xlu0 %852 }
 0xb0b   :  { %v855_v16 = vmul.f32 %v853_v15, %v727_v63  ;;  %v862_v31 = vmul.f32 %v853_v15, %v735_v58 }
 0xbb1   :  { %v807_v1 = vpop.f32.mrf.mxu1 }
 0xbb2   :  { %v811_v2 = vadd.f32 %v807_v1, %v1905_v39 }
 0xbb3   :  { %v1624_v5 = vpop.f32.mrf.mxu1 }
 0xbb4   :  { %1710 = vtanh.f32 %v811_v2  ;;  %v1493_v7 = vmul.f32 -1.442695, %v811_v2 }
 0xbb6   :  { %1712 = vpow2.f32 %v1493_v7 }
 0xbc1   :  { %v1711_v6 = vpop.eup %1710 }
 0xbc2   :  { %825 = vrot.lane.b32.xlu1 %v1711_v6, %s1746_s22 }
 0xbc3   :  { %v1713_v9 = vpop.eup %1712 }
 0xbc4   :  { %v815_v10 = vadd.f32 1.0, %v1713_v9 }
 0xbc6   :  { %1714 = vrcp.f32 %v815_v10 }
 0xbd3   :  { %v1715_v11 = vpop.eup %1714 }
 0xbd4   :  { %v823_v18 = vmul.f32 %v1715_v11, %v821_v14 }
 0xc34   :  { %v826_v12 = vpop.permute.xlu1 %825 }
 0xc35   :  { %v828_v13 = vmul.f32 %v1715_v11, %v826_v12 }
 0xc37   :  { %830 = vrot.lane.b32.xlu1 %v828_v13, %s1747_s24 }
 0xc3b   :  { %845 = vperm.xlu1 %1676, %v1494_v57  }
 0xc3f   :  { %857 = vrot.lane.b32.xlu1 %v855_v16, %s1748_s1 }
 0xca9   :  { %v831_v19 = vpop.permute.xlu1 %830 }
 0xcaa   :  { %v833_v21 = vadd.f32 %v831_v19, %v823_v18 }
 0xcac   :  { %1716 = vtanh.f32 %v833_v21 }
 0xcb6   :  { %v846_v23 = vpop.permute.xlu1 %845 }
 0xcb7   :  { %v861_v36 = vmul.f32 %v846_v23, %v833_v21  ;;  %v1500_v21 = vsel %vm1126_vm9, 1.0, %v1742_v3 }
 0xcb9   :  { %v1717_v22 = vpop.eup %1716 }
 0xcba   :  { %836 = vrot.lane.b32.xlu0 %v1717_v22, %s1746_s22  ;;  %v858_v28 = vpop.permute.xlu1 %857 }
 0xd2c   :  { %v837_v24 = vpop.permute.xlu0 %836 }
 0xd2d   :  { %v839_v25 = vmul.f32 %v1715_v11, %v837_v24 }
 0xd2f   :  { %v2013_v27 = vmul.f32 %v846_v23, %v839_v25 }
 0xd31   :  { %v860_v29 = vadd.f32 %v858_v28, %v2013_v27 }
 0xd33   :  { %875 = vrot.lane.b32.xlu0 %v860_v29, %s1747_s24 }
 0xd37   :  { %864 = vrot.lane.b32.xlu0 %v862_v31, %s1747_s24 }
 0xd3b   :  { %997 = vperm.xlu0 %1677, %v994_v32  }
 0xd3f   :  { %985 = vperm.xlu0 %1677, %v1497_v30  }
 0xda5   :  { %v876_v33 = vpop.permute.xlu0 %875 }
 0xda6   :  { %1634 = vmatmul.mubr.msk.f32.vlgmr.msra.gmra.mxu0 %vm93_vm0, %v876_v33 }
 0xda7   :  { %1648 = vmatpush3.msra.mxu0 %v1809_v4  ;;  %1655 = vmatprep.mubr.msk.f32.mxu0 %vm1744_vm1, %v1742_v3 }
 0xda8   :  { %1649 = vmatprep.subr.mxu0 %v1742_v3 }
 0xda9   :  { %1650 = vmatpush3.msra.mxu0 %v1818_v8  ;;  %v865_v34 = vpop.permute.xlu0 %864 }
 0xdaa   :  { %1651 = vmatprep.subr.mxu0 %v1742_v3  ;;  %v867_v4 = vadd.f32 %v865_v34, %v861_v36 }
 0xdab   :  { %1652 = vmatpush3.msra.mxu0 %v1840_v17 }
 0xdac   :  { %1653 = vmatprep.subr.mxu0 %v1742_v3  ;;  %v961_v49 = vrot.slane %v867_v4, 6 }
 0xdad   :  { %1654 = vmatpush3.msra.mxu0 %v1861_v26 }
 0xdb6   :  { %v998_v35 = vpop.permute.xlu0 %997 }
 0xdb7   :  { %v1000_v37 = vmul.f32 %v998_v35, %v860_v29  ;;  %v1012_v38 = vmul.f32 %v998_v35, %v867_v4  ;;  %v1140_v29 = vsub.f32 1.0, %v1500_v21 }
 0xdb9   :  { %1002 = vrot.lane.b32.xlu0 %v1000_v37, %s1747_s24 }
 0xdba   :  { %v986_v58 = vpop.permute.xlu0 %985 }
 0xdbd   :  { %1014 = vrot.lane.b32.xlu0 %v1012_v38, %s1748_s1 }
 0xe2b   :  { %v1003_v59 = vpop.permute.xlu0 %1002 }
 0xe2f   :  { %v1015_v2 = vpop.permute.xlu0 %1014 }
 0xe66   :  { %v945_v40 = vpop.f32.mrf.mxu0 }
 0xe67   :  { %v950_v8 = vrot.slane %v945_v40, 6 }
 0xe68   :  { %v1635_v41 = vpop.f32.mrf.mxu0 }
 0xe69   :  { %v952_v42 = vadd.f32 %v950_v8, %v1905_v39 }
 0xe6b   :  { %1718 = vtanh.f32 %v952_v42  ;;  %v1496_v26 = vmul.f32 -1.442695, %v952_v42 }
 0xe6d   :  { %1720 = vpow2.f32 %v1496_v26 }
 0xe78   :  { %v1719_v17 = vpop.eup %1718 }
 0xe79   :  { %965 = vrot.lane.b32.xlu1 %v1719_v17, %s1746_s22 }
 0xe7a   :  { %v1721_v43 = vpop.eup %1720 }
 0xe7b   :  { %v956_v45 = vadd.f32 1.0, %v1721_v43 }
 0xe7d   :  { %1722 = vrcp.f32 %v956_v45 }
 0xe8a   :  { %v1723_v46 = vpop.eup %1722 }
 0xe8b   :  { %v963_v50 = vmul.f32 %v1723_v46, %v961_v49 }
 0xeeb   :  { %v966_v47 = vpop.permute.xlu1 %965 }
 0xeec   :  { %v968_v48 = vmul.f32 %v1723_v46, %v966_v47 }
 0xeee   :  { %970 = vrot.lane.b32.xlu1 %v968_v48, %s1747_s24 }
 0xf60   :  { %v971_v51 = vpop.permute.xlu1 %970 }
 0xf61   :  { %v973_v52 = vadd.f32 %v971_v51, %v963_v50 }
 0xf63   :  { %1724 = vtanh.f32 %v973_v52  ;;  %v1007_v57 = vrot.slane %v973_v52, 2 }
 0xf70   :  { %v1725_v53 = vpop.eup %1724 }
 0xf71   :  { %976 = vrot.lane.b32.xlu1 %v1725_v53, %s1746_s22 }
 0xfe3   :  { %v977_v54 = vpop.permute.xlu1 %976 }
 0xfe4   :  { %v979_v55 = vmul.f32 %v1723_v46, %v977_v54  ;;  %v1503_v54 = vsel %vm1264_vm10, 1.0, %v1742_v3 }
 0xfe6   :  { %v989_v56 = vrot.slane %v979_v55, 2 }
 0xfe8   :  { %990 = vrot.lane.b32.xlu1 %v989_v56, %s1747_s24 }
 0xfec   :  { %1008 = vrot.lane.b32.xlu1 %v1007_v57, %s1748_s1 }
0x105a   :  { %v991_v60 = vpop.permute.xlu1 %990 }
0x105b   :  { %v993_v61 = vmul.f32 %v991_v60, %v986_v58 }
0x105d   :  { %v1005_v62 = vadd.f32 %v1003_v59, %v993_v61  ;;  %1019 = vst.msk [vmem:[#allocation2 + $0xa] sm:$0x3] %vm314_vm4, %v993_v61  ;;  %v1282_v61 = vld [vmem:[#allocation2 + $0x4] sm:$0x3] }
0x105e   :  { %v1009_v63 = vpop.permute.xlu1 %1008 }
0x105f   :  { %v1011_v1 = vmul.f32 %v1009_v63, %v986_v58  ;;  %1645 = vmatmul.mubr.msk.f32.vlgmr.msra.gmra.mxu1 %vm93_vm0, %v1005_v62  ;;  %v1281_v63 = vld [vmem:[#allocation2 + $0x2] sm:$0x3] }
0x1061   :  { %v1017_v5 = vadd.f32 %v1015_v2, %v1011_v1 }
0x1063   :  { %v1105_v6 = vrot.slane %v1017_v5, 4 }
0x1065   :  { %1106 = vrot.lane.b32.xlu0 %v1105_v6, %s1747_s24  ;;  %v1291_v6 = vld [vmem:[%s2130_s7 + $0x18] sm:$0xff] }
0x1066   :  { %1658 = vmatprep.subr.mxu1 %v1291_v6 }
0x1067   :  { %1659 = vmatpush3.msra.mxu1 %v1291_v6 }
0x10d7   :  { %v1107_v22 = vpop.permute.xlu0 %1106 }
0x111f   :  { %v1089_v7 = vpop.f32.mrf.mxu1 }
0x1120   :  { %v1094_v9 = vrot.slane %v1089_v7, 4  ;;  %v1290_v7 = vld [vmem:[%s2130_s7 + $0x10] sm:$0xff] }
0x1121   :  { %v1646_v10 = vpop.f32.mrf.mxu1  ;;  %1660 = vmatprep.subr.mxu1 %v1290_v7 }
0x1122   :  { %v1096_v11 = vadd.f32 %v1094_v9, %v1905_v39  ;;  %v1289_v9 = vld [vmem:[%s2130_s7 + $0x8] sm:$0xff]  ;;  %1661 = vmatpush3.msra.mxu1 %v1290_v7 }
0x1123   :  { %1662 = vmatprep.subr.mxu1 %v1289_v9 }
0x1124   :  { %1726 = vtanh.f32 %v1096_v11  ;;  %v1499_v13 = vmul.f32 -1.442695, %v1096_v11  ;;  %1663 = vmatpush3.msra.mxu1 %v1289_v9 }
0x1126   :  { %1728 = vpow2.f32 %v1499_v13 }
0x1131   :  { %v1727_v12 = vpop.eup %1726 }
0x1132   :  { %1111 = vrot.lane.b32.xlu1 %v1727_v12, %s1746_s22  ;;  %v1288_v12 = vld [vmem:[%s2130_s7] sm:$0xff] }
0x1133   :  { %v1729_v14 = vpop.eup %1728  ;;  %1664 = vmatprep.subr.mxu1 %v1288_v12 }
0x1134   :  { %v1100_v15 = vadd.f32 1.0, %v1729_v14  ;;  %1665 = vmatpush3.msra.mxu1 %v1288_v12 }
0x1136   :  { %1730 = vrcp.f32 %v1100_v15 }
0x1143   :  { %v1731_v16 = vpop.eup %1730 }
0x1144   :  { %v1109_v23 = vmul.f32 %v1731_v16, %v1107_v22 }
0x11a4   :  { %v1112_v18 = vpop.permute.xlu1 %1111 }
0x11a5   :  { %v1114_v19 = vmul.f32 %v1731_v16, %v1112_v18 }
0x11a7   :  { %1116 = vrot.lane.b32.xlu1 %v1114_v19, %s1747_s24 }
0x11ab   :  { %1131 = vperm.xlu1 %1676, %v1500_v21  }
0x1219   :  { %v1117_v24 = vpop.permute.xlu1 %1116 }
0x121a   :  { %v1119_v25 = vadd.f32 %v1117_v24, %v1109_v23  ;;  %v1285_v23 = vld [vmem:[#allocation2 + $0xa] sm:$0x3] }
0x121c   :  { %1732 = vtanh.f32 %v1119_v25  ;;  %v1149_v30 = vrot.slane %v1119_v25, 4 }
0x1226   :  { %v1132_v35 = vpop.permute.xlu1 %1131 }
0x1229   :  { %v1733_v28 = vpop.eup %1732 }
0x122a   :  { %1122 = vrot.lane.b32.xlu0 %v1733_v28, %s1746_s22 }
0x122e   :  { %1143 = vperm.xlu0 %1677, %v1140_v29  }
0x1232   :  { %1150 = vrot.lane.b32.xlu0 %v1149_v30, %s1748_s1 }
0x129c   :  { %v1123_v31 = vpop.permute.xlu0 %1122 }
0x129d   :  { %v1125_v32 = vmul.f32 %v1731_v16, %v1123_v31 }
0x129f   :  { %v1135_v33 = vrot.slane %v1125_v32, 4 }
0x12a1   :  { %1136 = vrot.lane.b32.xlu1 %v1135_v33, %s1747_s24 }
0x12a9   :  { %v1144_v34 = vpop.permute.xlu0 %1143 }
0x12aa   :  { %v1154_v37 = vmul.f32 %v1144_v34, %v1017_v5  ;;  %v1146_v41 = vmul.f32 %v1144_v34, %v1005_v62  ;;  %v1308_v62 = vcombine.low %v1282_v61, %v1283_v44 }
0x12ac   :  { %v1322_v2 = vrot.slane %v1308_v62, %v1846_v20 }
0x12ad   :  { %v1151_v36 = vpop.permute.xlu0 %1150 }
0x12ae   :  { %v1153_v4 = vmul.f32 %v1151_v36, %v1132_v35 }
0x12b0   :  { %v1155_v38 = vadd.f32 %v1154_v37, %v1153_v4 }
0x12b2   :  { %v1243_v40 = vrot.slane %v1155_v38, 2 }
0x12b4   :  { %1244 = vrot.lane.b32.xlu0 %v1243_v40, %s1747_s24 }
0x1313   :  { %v1137_v8 = vpop.permute.xlu1 %1136 }
0x1314   :  { %v1139_v42 = vmul.f32 %v1137_v8, %v1132_v35 }
0x1316   :  { %v1147_v17 = vadd.f32 %v1146_v41, %v1139_v42  ;;  %1157 = vst.msk [vmem:[#allocation2 + $0xc] sm:$0x3] %vm314_vm4, %v1139_v42 }
0x1318   :  { %1656 = vmatmul.mubr.msk.f32.vlgmr.msra.gmra.mxu0 %vm93_vm0, %v1147_v17 }
0x131d   :  { %v1286_v18 = vld [vmem:[#allocation2 + $0xc] sm:$0x3] }
0x13d8   :  { %v1227_v26 = vpop.f32.mrf.mxu0 }
0x13d9   :  { %v1232_v43 = vrot.slane %v1227_v26, 2 }
0x13da   :  { %v1657_v45 = vpop.f32.mrf.mxu0 }
0x13db   :  { %v1234_v46 = vadd.f32 %v1232_v43, %v1905_v39  ;;  %v1245_v39 = vpop.permute.xlu0 %1244 }
0x13dd   :  { %1734 = vtanh.f32 %v1234_v46  ;;  %v1502_v48 = vmul.f32 -1.442695, %v1234_v46 }
0x13df   :  { %1736 = vpow2.f32 %v1502_v48 }
0x13ea   :  { %v1735_v47 = vpop.eup %1734 }
0x13eb   :  { %1249 = vrot.lane.b32.xlu1 %v1735_v47, %s1746_s22 }
0x13ec   :  { %v1737_v49 = vpop.eup %1736 }
0x13ed   :  { %v1238_v50 = vadd.f32 1.0, %v1737_v49 }
0x13ef   :  { %1738 = vrcp.f32 %v1238_v50 }
0x13fc   :  { %v1739_v51 = vpop.eup %1738 }
0x13fd   :  { %v1247_v55 = vmul.f32 %v1739_v51, %v1245_v39 }
0x145d   :  { %v1250_v52 = vpop.permute.xlu1 %1249 }
0x145e   :  { %v1252_v53 = vmul.f32 %v1739_v51, %v1250_v52 }
0x1460   :  { %1254 = vrot.lane.b32.xlu1 %v1252_v53, %s1747_s24 }
0x1464   :  { %1269 = vperm.xlu1 %1676, %v1503_v54  }
0x1468   :  { %311 = vrot.lane.b32.xlu1 %v1926_v0, %s1747_s24 }
0x14d2   :  { %v1255_v56 = vpop.permute.xlu1 %1254 }
0x14d3   :  { %v1257_v57 = vadd.f32 %v1255_v56, %v1247_v55 }
0x14d5   :  { %1740 = vtanh.f32 %v1257_v57 }
0x14df   :  { %v1270_v58 = vpop.permute.xlu1 %1269 }
0x14e2   :  { %v1741_v59 = vpop.eup %1740 }
0x14e3   :  { %v312_v60 = vpop.permute.xlu1 %311  ;;  %1260 = vrot.lane.b32.xlu0 %v1741_v59, %s1746_s22 }
0x14e4   :  { %315 = vst.msk [vmem:[#allocation2] sm:$0x3] %vm314_vm4, %v312_v60 }
0x14eb   :  { %v1280_v3 = vld [vmem:[#allocation2] sm:$0x3] }
0x14ec   :  { %v1307_v1 = vcombine.low %v1280_v3, %v1281_v63 }
0x14ee   :  { %v1315_v0 = vrot.slane %v1307_v1, %v1846_v20 }
0x14f0   :  { %v1323_v5 = vcombine.low %v1315_v0, %v1322_v2 }
0x14f2   :  { %1666 = vmatprep.mubr.msk.f32.mxu1 %vm93_vm0, %v1323_v5 }
0x1555   :  { %v1261_v10 = vpop.permute.xlu0 %1260 }
0x1556   :  { %v1263_v11 = vmul.f32 %v1739_v51, %v1261_v10 }
0x1558   :  { %v1273_v13 = vrot.slane %v1263_v11, 6 }
0x155a   :  { %1274 = vrot.lane.b32.xlu0 %v1273_v13, %s1747_s24 }
0x155e   :  { %869 = vrot.lane.b32.xlu0 %v2013_v27, %s1747_s24  ;;  %v1504_v27 = vld [vmem:[%s2131_s8] ss:$0 sm:$0xff] }
0x15cc   :  { %v1275_v14 = vpop.permute.xlu0 %1274 }
0x15cd   :  { %v1277_v15 = vmul.f32 %v1275_v14, %v1270_v58 }
0x15cf   :  { %1279 = vst.msk [vmem:[#allocation2 + $0xe] sm:$0x3] %vm314_vm4, %v1277_v15 }
0x15d0   :  { %v870_v16 = vpop.permute.xlu0 %869 }
0x15d1   :  { %873 = vst.msk [vmem:[#allocation2 + $0x8] sm:$0x3] %vm314_vm4, %v870_v16 }
0x15d6   :  { %v1287_v19 = vld [vmem:[#allocation2 + $0xe] sm:$0x3] }
0x15d7   :  { %v1325_v21 = vcombine.low %v1286_v18, %v1287_v19 }
0x15d8   :  { %v1284_v22 = vld [vmem:[#allocation2 + $0x8] sm:$0x3] }
0x15d9   :  { %v1324_v24 = vcombine.low %v1284_v22, %v1285_v23  ;;  %v1339_v28 = vrot.slane %v1325_v21, %v1846_v20 }
0x15db   :  { %v1332_v25 = vrot.slane %v1324_v24, %v1846_v20 }
0x15dd   :  { %v1340_v29 = vcombine.low %v1332_v25, %v1339_v28 }
0x15df   :  { %1667 = vmatmul.mubr.msk.f32.vlgmr.msra.gmra.mxu1 %vm93_vm0, %v1340_v29 }
0x169f   :  { %v1668_v30 = vpop.f32.mrf.mxu1 }
0x16a0   :  { %v1417_v31 = vadd.f32 %v1668_v30, %v1504_v27 }
0x16a1   :  { %v1411_v32 = vpop.f32.mrf.mxu1 }
0x16a2   :  { %v1439_v33 = vcombine.high %v1417_v31, %v1417_v31  ;;  %v1446_v34 = vrot.slane %v1417_v31, %v1846_v20  ;;  %v1412_v35 = vadd.f32 %v1504_v27, %v1411_v32 }
0x16a4   :  { %v1453_v36 = vrot.slane %v1439_v33, %v1846_v20  ;;  %v1454_v37 = vcombine.high %v1446_v34, %v1446_v34  ;;  %1469 = vst.msk [vmem:[%s2132_s9 + $0x8] sm:$0x3] %vm1464_vm11, %v1446_v34  ;;  %v1422_v4 = vcombine.high %v1412_v35, %v1412_v35  ;;  %v1429_v38 = vrot.slane %v1412_v35, %v1846_v20 }
0x16a6   :  { %v1455_v40 = vcombine.high %v1453_v36, %v1453_v36  ;;  %1470 = vst.msk [vmem:[%s2132_s9 + $0xa] sm:$0x3] %vm1464_vm11, %v1454_v37  ;;  %1471 = vst.msk [vmem:[%s2132_s9 + $0xc] sm:$0x3] %vm1464_vm11, %v1453_v36  ;;  %v1436_v8 = vrot.slane %v1422_v4, %v1846_v20  ;;  %v1437_v41 = vcombine.high %v1429_v38, %v1429_v38 }
0x16a7   :  { %1465 = vst.msk [vmem:[%s2132_s9] sm:$0x3] %vm1464_vm11, %v1429_v38 }
0x16a8   :  { %1472 = vst.msk [vmem:[%s2132_s9 + $0xe] sm:$0x3] %vm1464_vm11, %v1455_v40  ;;  %v1438_v42 = vcombine.high %v1436_v8, %v1436_v8  ;;  %1466 = vst.msk [vmem:[%s2132_s9 + $0x2] sm:$0x3] %vm1464_vm11, %v1437_v41 }
0x16a9   :  { %1467 = vst.msk [vmem:[%s2132_s9 + $0x4] sm:$0x3] %vm1464_vm11, %v1436_v8 }
0x16aa   :  { %1468 = vst.msk [vmem:[%s2132_s9 + $0x6] sm:$0x3] %vm1464_vm11, %v1438_v42 }

// kernel: movement_net_forward.6
= control target key start
LH: loop header
LB: loop body
LE: loop exit
PB: predicated region body
PF: predicated region fallthrough
CT: control target
= control target key end

     0   :  { %v62_v0 = vlaneseq  ;;  %v1735_v1 = vmov 0.0   ;;  %v1736_v5 = vmov 1983009808   ;;  %vm1737_vm0 = vmmov 0   ;;  %s1739_s18 = smov 64   ;;  %s1740_s20 = smov 32   ;;  %s2108_s5 = inlined_call_operand.vmem [shape: f32[32,128], index: 5, kind: input, shape index: {}]   ;;  %s2109_s4 = inlined_call_operand.vmem [shape: f32[16,128], index: 4, kind: input, shape index: {}]   ;;  %s2110_s0 = inlined_call_operand.vmem [shape: f32[8,2,16], index: 0, kind: input, shape index: {}]   ;;  %s2111_s2 = inlined_call_operand.vmem [shape: f32[2,32], index: 2, kind: input, shape index: {}]   ;;  %s2112_s6 = inlined_call_operand.vmem [shape: f32[1,128], index: 6, kind: input, shape index: {}]   ;;  %s2113_s1 = inlined_call_operand.vmem [shape: s32[2,1], index: 1, kind: input, shape index: {}]   ;;  %s2114_s3 = inlined_call_operand.vmem [shape: f32[2,32], index: 3, kind: input, shape index: {}]   ;;  %s2115_s7 = inlined_call_operand.vmem [shape: f32[32,6], index: 7, kind: input, shape index: {}]   ;;  %s2116_s8 = inlined_call_operand.vmem [shape: f32[1,6], index: 8, kind: input, shape index: {}]   ;;  %s2117_s9 = inlined_call_operand.vmem [shape: f32[8,2,6], index: 9, kind: output, shape index: {}]  }
   0x1   :  { %1563 = vmatprep.subr.mxu1 %v1735_v1  ;;  %v1796_v2 = vld [vmem:[%s2108_s5 + $0x18] sm:$0xff]  ;;  %v41_v3 = vld [vmem:[%s2109_s4 + $0x8] sm:$0xff]  ;;  %v1804_v4 = vld [vmem:[%s2108_s5 + $0x10] sm:$0xff]  ;;  %v60_v6 = vunpack.c.l.s4 %v1736_v5  ;;  %1571 = vmatprep.mubr.msk.f32.mxu1 %vm1737_vm0, %v1735_v1  ;;  %vm178_vm1 = vcmask 261120   ;;  %vm91_vm2 = vcmask 130048   ;;  %v1738_v32 = vmov 0  }
   0x2   :  { %1564 = vmatpush3.msra.mxu1 %v1796_v2  ;;  %1556 = vmatprep.subr.mxu0 %v41_v3  ;;  %v40_v7 = vld [vmem:[%s2109_s4] sm:$0xff]  ;;  %v63_v10 = vshrl.u32 %v62_v0, 7  ;;  %v1826_v15 = vld [vmem:[%s2108_s5 + $0x8] sm:$0xff]  ;;  %vm313_vm5 = vcmask 254976   ;;  %vm1463_vm12 = vcmask 41984  }
   0x3   :  { %v32_v8 = vld [vmem:[%s2110_s0] sm:$0x3]  ;;  %v33_v9 = vld [vmem:[%s2110_s0 + $0x2] sm:$0x3]  ;;  %1565 = vmatprep.subr.mxu1 %v1735_v1  ;;  %1557 = vmatpush3.msra.mxu0 %v41_v3  ;;  %v34_v11 = vld [vmem:[%s2110_s0 + $0x4] sm:$0x3]  ;;  %v61_v14 = vunpack.c.0.s8 %v60_v6 }
   0x4   :  { %v35_v12 = vld [vmem:[%s2110_s0 + $0x6] sm:$0x3]  ;;  %v57_v13 = vcombine.low %v32_v8, %v33_v9  ;;  %1566 = vmatpush3.msra.mxu1 %v1804_v4  ;;  %1558 = vmatprep.subr.mxu0 %v40_v7  ;;  %v36_v17 = vld [vmem:[%s2110_s0 + $0x8] sm:$0x3]  ;;  %v37_v18 = vld [vmem:[%s2110_s0 + $0xa] sm:$0x3] }
   0x5   :  { %v58_v16 = vcombine.low %v34_v11, %v35_v12  ;;  %v38_v19 = vld [vmem:[%s2110_s0 + $0xc] sm:$0x3]  ;;  %1567 = vmatprep.subr.mxu1 %v1735_v1  ;;  %1559 = vmatpush3.msra.mxu0 %v40_v7  ;;  %v1839_v20 = vsub.s32 %v61_v14, %v63_v10  ;;  %v39_v21 = vld [vmem:[%s2110_s0 + $0xe] sm:$0x3]  ;;  %v74_v22 = vcombine.low %v36_v17, %v37_v18  ;;  %v1847_v23 = vld [vmem:[%s2108_s5] sm:$0xff] }
   0x6   :  { %1568 = vmatpush3.msra.mxu1 %v1826_v15  ;;  %v75_v24 = vcombine.low %v38_v19, %v39_v21  ;;  %v1855_v25 = vld [vmem:[%s2111_s2] sm:$0x3]  ;;  %1574 = vmatprep.subr.mxu0 %v1735_v1 }
   0x7   :  { %v65_v26 = vrot.slane %v57_v13, %v1839_v20  ;;  %v72_v27 = vrot.slane %v58_v16, %v1839_v20  ;;  %v82_v28 = vrot.slane %v74_v22, %v1839_v20  ;;  %1569 = vmatprep.subr.mxu1 %v1735_v1  ;;  %1670 = vset.pattern.permute.xlu0 %v1738_v32  ;;  %v1476_v34 = vld [vmem:[%s2112_s6] ss:$0 sm:$0xff] }
   0x8   :  { %v89_v29 = vrot.slane %v75_v24, %v1839_v20  ;;  %1570 = vmatpush3.msra.mxu1 %v1847_v23  ;;  %1669 = vset.pattern.permute.xlu1 %v1738_v32  ;;  %v1898_v42 = vld [vmem:[%s2113_s1] sm:$0x3]  ;;  %s1741_s1 = smov 96  }
   0x9   :  { %v73_v30 = vcombine.low %v65_v26, %v72_v27  ;;  %1572 = vmatmul.mubr.msk.f32.vlgmr.msra.gmra.mxu1 %vm178_vm1, %v1855_v25  ;;  %1585 = vmatprep.subr.mxu1 %v1735_v1  ;;  %v177_v43 = vld [vmem:[%s2114_s3] sm:$0x3]  ;;  %vm281_vm3 = vcmp.gt.s32.totalorder %v1898_v42, 0  ;;  %vm421_vm4 = vcmp.gt.s32.totalorder %v1898_v42, 1  ;;  %vm567_vm6 = vcmp.gt.s32.totalorder %v1898_v42, 2 }
   0xa   :  { %v90_v31 = vcombine.low %v82_v28, %v89_v29  ;;  %1586 = vmatpush3.msra.mxu1 %v1796_v2  ;;  %1593 = vmatprep.mubr.msk.f32.mxu1 %vm1737_vm0, %v1735_v1  ;;  %v1481_v44 = vsel %vm281_vm3, 1.0, %v1735_v1  ;;  %v1484_v3 = vsel %vm421_vm4, 1.0, %v1735_v1  ;;  %vm705_vm7 = vcmp.gt.s32.totalorder %v1898_v42, 3 }
   0xb   :  { %1560 = vmatprep.mubr.msk.f32.mxu0 %vm91_vm2, %v73_v30  ;;  %1587 = vmatprep.subr.mxu1 %v1735_v1  ;;  %v290_v51 = vsub.f32 1.0, %v1481_v44  ;;  %v435_v6 = vsub.f32 1.0, %v1484_v3  ;;  %vm839_vm8 = vcmp.gt.s32.totalorder %v1898_v42, 4  ;;  %vm979_vm9 = vcmp.gt.s32.totalorder %v1898_v42, 5 }
   0xc   :  { %1561 = vmatmul.mubr.msk.f32.vlgmr.msra.gmra.mxu0 %vm91_vm2, %v90_v31  ;;  %1588 = vmatpush3.msra.mxu1 %v1804_v4  ;;  %vm1125_vm10 = vcmp.gt.s32.totalorder %v1898_v42, 6  ;;  %vm1263_vm11 = vcmp.gt.s32.totalorder %v1898_v42, 7 }
   0xd   :  { %1575 = vmatpush3.msra.mxu0 %v1796_v2  ;;  %1582 = vmatprep.mubr.msk.f32.mxu0 %vm1737_vm0, %v1735_v1 }
   0xe   :  { %1576 = vmatprep.subr.mxu0 %v1735_v1  ;;  %1589 = vmatprep.subr.mxu1 %v1735_v1 }
   0xf   :  { %1577 = vmatpush3.msra.mxu0 %v1804_v4  ;;  %1590 = vmatpush3.msra.mxu1 %v1826_v15 }
  0x10   :  { %1578 = vmatprep.subr.mxu0 %v1735_v1  ;;  %1591 = vmatprep.subr.mxu1 %v1735_v1 }
  0x11   :  { %1579 = vmatpush3.msra.mxu0 %v1826_v15  ;;  %1592 = vmatpush3.msra.mxu1 %v1847_v23 }
  0x12   :  { %1580 = vmatprep.subr.mxu0 %v1735_v1  ;;  %1607 = vmatprep.subr.mxu1 %v1735_v1 }
  0x13   :  { %1581 = vmatpush3.msra.mxu0 %v1847_v23 }
  0x14   :  { %1596 = vmatprep.subr.mxu0 %v1735_v1 }
  0xc9   :  { %v248_v33 = vpop.f32.mrf.mxu1 }
  0xcb   :  { %v1573_v35 = vpop.f32.mrf.mxu1 }
  0xcc   :  { %v1562_v36 = vpop.f32.mrf.mxu0 }
  0xcd   :  { %v1890_v37 = vadd.f32 %v1562_v36, %v1476_v34 }
  0xce   :  { %v162_v38 = vpop.f32.mrf.mxu0 }
  0xcf   :  { %v1892_v39 = vadd.f32 %v1476_v34, %v162_v38 }
  0xd1   :  { %v252_v40 = vadd.f32 %v248_v33, %v1892_v39 }
  0xd3   :  { %1671 = vtanh.f32 %v252_v40  ;;  %v1480_v45 = vmul.f32 -1.442695, %v252_v40 }
  0xd5   :  { %1673 = vpow2.f32 %v1480_v45 }
  0xe0   :  { %v1672_v41 = vpop.eup %1671 }
  0xe1   :  { %266 = vrot.lane.b32.xlu0 %v1672_v41, %s1739_s18 }
  0xe2   :  { %v1674_v46 = vpop.eup %1673 }
  0xe3   :  { %v256_v47 = vadd.f32 1.0, %v1674_v46 }
  0xe5   :  { %261 = vrot.lane.b32.xlu0 %v177_v43, %s1740_s20  ;;  %1675 = vrcp.f32 %v256_v47 }
  0xe9   :  { %286 = vperm.xlu0 %1670, %v1481_v44  }
  0xf2   :  { %v1676_v48 = vpop.eup %1675 }
 0x153   :  { %v267_v49 = vpop.permute.xlu0 %266 }
 0x154   :  { %v269_v50 = vmul.f32 %v1676_v48, %v267_v49 }
 0x156   :  { %271 = vrot.lane.b32.xlu1 %v269_v50, %s1740_s20 }
 0x157   :  { %v262_v52 = vpop.permute.xlu0 %261 }
 0x158   :  { %v264_v53 = vmul.f32 %v1676_v48, %v262_v52 }
 0x15a   :  { %293 = vperm.xlu1 %1669, %v290_v51  }
 0x164   :  { %v287_v61 = vpop.permute.xlu0 %286 }
 0x1c8   :  { %v272_v54 = vpop.permute.xlu1 %271 }
 0x1c9   :  { %v274_v55 = vadd.f32 %v272_v54, %v264_v53 }
 0x1cb   :  { %1677 = vtanh.f32 %v274_v55  ;;  %v302_v10 = vmul.f32 %v287_v61, %v274_v55 }
 0x1d5   :  { %v294_v56 = vpop.permute.xlu1 %293 }
 0x1d6   :  { %v296_v58 = vmul.f32 %v294_v56, %v1855_v25  ;;  %v303_v5 = vmul.f32 %v294_v56, %v177_v43 }
 0x1d8   :  { %v1678_v57 = vpop.eup %1677 }
 0x1d9   :  { %277 = vrot.lane.b32.xlu1 %v1678_v57, %s1739_s18 }
 0x1dd   :  { %298 = vrot.lane.b32.xlu1 %v296_v58, %s1741_s1 }
 0x24b   :  { %v278_v59 = vpop.permute.xlu1 %277 }
 0x24c   :  { %v280_v60 = vmul.f32 %v1676_v48, %v278_v59 }
 0x24e   :  { %v1911_v62 = vmul.f32 %v287_v61, %v280_v60  ;;  %v1487_v61 = vsel %vm567_vm6, 1.0, %v1735_v1 }
 0x24f   :  { %v299_v63 = vpop.permute.xlu1 %298 }
 0x250   :  { %v301_v0 = vadd.f32 %v299_v63, %v1911_v62 }
 0x252   :  { %316 = vrot.lane.b32.xlu0 %v301_v0, %s1740_s20 }
 0x256   :  { %305 = vrot.lane.b32.xlu0 %v303_v5, %s1740_s20 }
 0x25a   :  { %438 = vperm.xlu0 %1670, %v435_v6  }
 0x25e   :  { %426 = vperm.xlu0 %1670, %v1484_v3  }
 0x2c4   :  { %v317_v7 = vpop.permute.xlu0 %316 }
 0x2c5   :  { %1583 = vmatmul.mubr.msk.f32.vlgmr.msra.gmra.mxu0 %vm178_vm1, %v317_v7  ;;  %v581_v7 = vsub.f32 1.0, %v1487_v61 }
 0x2c6   :  { %1597 = vmatpush3.msra.mxu0 %v1796_v2  ;;  %1604 = vmatprep.mubr.msk.f32.mxu0 %vm1737_vm0, %v1735_v1 }
 0x2c7   :  { %1598 = vmatprep.subr.mxu0 %v1735_v1 }
 0x2c8   :  { %1599 = vmatpush3.msra.mxu0 %v1804_v4  ;;  %v306_v8 = vpop.permute.xlu0 %305 }
 0x2c9   :  { %1600 = vmatprep.subr.mxu0 %v1735_v1  ;;  %v308_v12 = vadd.f32 %v306_v8, %v302_v10 }
 0x2ca   :  { %1601 = vmatpush3.msra.mxu0 %v1826_v15 }
 0x2cb   :  { %1602 = vmatprep.subr.mxu0 %v1735_v1  ;;  %v402_v28 = vrot.slane %v308_v12, 6 }
 0x2cc   :  { %1603 = vmatpush3.msra.mxu0 %v1847_v23 }
 0x2cd   :  { %1618 = vmatprep.subr.mxu0 %v1735_v1 }
 0x2d5   :  { %v439_v9 = vpop.permute.xlu0 %438 }
 0x2d6   :  { %v441_v11 = vmul.f32 %v439_v9, %v301_v0  ;;  %v453_v13 = vmul.f32 %v439_v9, %v308_v12 }
 0x2d8   :  { %443 = vrot.lane.b32.xlu0 %v441_v11, %s1740_s20 }
 0x2d9   :  { %v427_v38 = vpop.permute.xlu0 %426 }
 0x2dc   :  { %455 = vrot.lane.b32.xlu0 %v453_v13, %s1741_s1 }
 0x34a   :  { %v444_v40 = vpop.permute.xlu0 %443 }
 0x34e   :  { %v456_v47 = vpop.permute.xlu0 %455 }
 0x385   :  { %v386_v14 = vpop.f32.mrf.mxu0 }
 0x386   :  { %v391_v16 = vrot.slane %v386_v14, 6 }
 0x387   :  { %v1584_v17 = vpop.f32.mrf.mxu0 }
 0x388   :  { %v393_v18 = vadd.f32 %v391_v16, %v1892_v39 }
 0x38a   :  { %1679 = vtanh.f32 %v393_v18  ;;  %v1483_v21 = vmul.f32 -1.442695, %v393_v18 }
 0x38c   :  { %1681 = vpow2.f32 %v1483_v21 }
 0x397   :  { %v1680_v19 = vpop.eup %1679 }
 0x398   :  { %406 = vrot.lane.b32.xlu1 %v1680_v19, %s1739_s18 }
 0x399   :  { %v1682_v22 = vpop.eup %1681 }
 0x39a   :  { %v397_v24 = vadd.f32 1.0, %v1682_v22 }
 0x39c   :  { %1683 = vrcp.f32 %v397_v24 }
 0x3a9   :  { %v1684_v25 = vpop.eup %1683 }
 0x3aa   :  { %v404_v29 = vmul.f32 %v1684_v25, %v402_v28 }
 0x40a   :  { %v407_v26 = vpop.permute.xlu1 %406 }
 0x40b   :  { %v409_v27 = vmul.f32 %v1684_v25, %v407_v26 }
 0x40d   :  { %411 = vrot.lane.b32.xlu1 %v409_v27, %s1740_s20 }
 0x47f   :  { %v412_v30 = vpop.permute.xlu1 %411 }
 0x480   :  { %v414_v31 = vadd.f32 %v412_v30, %v404_v29 }
 0x482   :  { %1685 = vtanh.f32 %v414_v31  ;;  %v448_v36 = vrot.slane %v414_v31, 2 }
 0x48f   :  { %v1686_v32 = vpop.eup %1685 }
 0x490   :  { %417 = vrot.lane.b32.xlu1 %v1686_v32, %s1739_s18 }
 0x502   :  { %v418_v33 = vpop.permute.xlu1 %417 }
 0x503   :  { %v420_v34 = vmul.f32 %v1684_v25, %v418_v33 }
 0x505   :  { %v430_v35 = vrot.slane %v420_v34, 2 }
 0x507   :  { %431 = vrot.lane.b32.xlu1 %v430_v35, %s1740_s20 }
 0x50b   :  { %449 = vrot.lane.b32.xlu1 %v448_v36, %s1741_s1 }
 0x579   :  { %v432_v41 = vpop.permute.xlu1 %431 }
 0x57a   :  { %v434_v43 = vmul.f32 %v432_v41, %v427_v38 }
 0x57c   :  { %v446_v44 = vadd.f32 %v444_v40, %v434_v43  ;;  %460 = vst.msk [vmem:[#allocation2 + $0x2] sm:$0x3] %vm313_vm5, %v434_v43 }
 0x57d   :  { %v450_v45 = vpop.permute.xlu1 %449 }
 0x57e   :  { %v452_v46 = vmul.f32 %v450_v45, %v427_v38  ;;  %1594 = vmatmul.mubr.msk.f32.vlgmr.msra.gmra.mxu1 %vm178_vm1, %v446_v44  ;;  %v1490_v38 = vsel %vm705_vm7, 1.0, %v1735_v1 }
 0x57f   :  { %1608 = vmatpush3.msra.mxu1 %v1796_v2  ;;  %1615 = vmatprep.mubr.msk.f32.mxu1 %vm1737_vm0, %v1735_v1  ;;  %v719_v45 = vsub.f32 1.0, %v1490_v38 }
 0x580   :  { %v458_v48 = vadd.f32 %v456_v47, %v452_v46  ;;  %1609 = vmatprep.subr.mxu1 %v1735_v1 }
 0x581   :  { %1610 = vmatpush3.msra.mxu1 %v1804_v4 }
 0x582   :  { %v546_v49 = vrot.slane %v458_v48, 4  ;;  %1611 = vmatprep.subr.mxu1 %v1735_v1 }
 0x583   :  { %1612 = vmatpush3.msra.mxu1 %v1826_v15 }
 0x584   :  { %547 = vrot.lane.b32.xlu0 %v546_v49, %s1740_s20  ;;  %1613 = vmatprep.subr.mxu1 %v1735_v1 }
 0x585   :  { %1614 = vmatpush3.msra.mxu1 %v1847_v23 }
 0x586   :  { %1629 = vmatprep.subr.mxu1 %v1735_v1 }
 0x5f6   :  { %v548_v63 = vpop.permute.xlu0 %547 }
 0x63e   :  { %v530_v50 = vpop.f32.mrf.mxu1 }
 0x63f   :  { %v535_v51 = vrot.slane %v530_v50, 4 }
 0x640   :  { %v1595_v52 = vpop.f32.mrf.mxu1 }
 0x641   :  { %v537_v53 = vadd.f32 %v535_v51, %v1892_v39 }
 0x643   :  { %1687 = vtanh.f32 %v537_v53  ;;  %v1486_v55 = vmul.f32 -1.442695, %v537_v53 }
 0x645   :  { %1689 = vpow2.f32 %v1486_v55  ;;  %v1493_v55 = vsel %vm839_vm8, 1.0, %v1735_v1 }
 0x650   :  { %v1688_v54 = vpop.eup %1687 }
 0x651   :  { %552 = vrot.lane.b32.xlu1 %v1688_v54, %s1739_s18 }
 0x652   :  { %v1690_v56 = vpop.eup %1689 }
 0x653   :  { %v541_v57 = vadd.f32 1.0, %v1690_v56 }
 0x655   :  { %1691 = vrcp.f32 %v541_v57  ;;  %v848_v57 = vsub.f32 1.0, %v1493_v55 }
 0x662   :  { %v1692_v58 = vpop.eup %1691 }
 0x663   :  { %v550_v0 = vmul.f32 %v1692_v58, %v548_v63 }
 0x6c3   :  { %v553_v59 = vpop.permute.xlu1 %552 }
 0x6c4   :  { %v555_v60 = vmul.f32 %v1692_v58, %v553_v59 }
 0x6c6   :  { %557 = vrot.lane.b32.xlu1 %v555_v60, %s1740_s20 }
 0x6ca   :  { %572 = vperm.xlu1 %1669, %v1487_v61  }
 0x738   :  { %v558_v3 = vpop.permute.xlu1 %557 }
 0x739   :  { %v560_v5 = vadd.f32 %v558_v3, %v550_v0 }
 0x73b   :  { %1693 = vtanh.f32 %v560_v5  ;;  %v590_v8 = vrot.slane %v560_v5, 4 }
 0x745   :  { %v573_v13 = vpop.permute.xlu1 %572 }
 0x748   :  { %v1694_v6 = vpop.eup %1693 }
 0x749   :  { %563 = vrot.lane.b32.xlu0 %v1694_v6, %s1739_s18 }
 0x74d   :  { %584 = vperm.xlu0 %1670, %v581_v7  }
 0x751   :  { %591 = vrot.lane.b32.xlu0 %v590_v8, %s1741_s1 }
 0x7bb   :  { %v564_v9 = vpop.permute.xlu0 %563 }
 0x7bc   :  { %v566_v10 = vmul.f32 %v1692_v58, %v564_v9 }
 0x7be   :  { %v576_v11 = vrot.slane %v566_v10, 4 }
 0x7c0   :  { %577 = vrot.lane.b32.xlu1 %v576_v11, %s1740_s20 }
 0x7c8   :  { %v585_v12 = vpop.permute.xlu0 %584 }
 0x7c9   :  { %v595_v16 = vmul.f32 %v585_v12, %v458_v48  ;;  %v587_v22 = vmul.f32 %v585_v12, %v446_v44 }
 0x7cc   :  { %v592_v14 = vpop.permute.xlu0 %591 }
 0x7cd   :  { %v594_v17 = vmul.f32 %v592_v14, %v573_v13 }
 0x7cf   :  { %v596_v18 = vadd.f32 %v595_v16, %v594_v17 }
 0x7d1   :  { %v684_v19 = vrot.slane %v596_v18, 2 }
 0x7d3   :  { %685 = vrot.lane.b32.xlu0 %v684_v19, %s1740_s20 }
 0x832   :  { %v578_v21 = vpop.permute.xlu1 %577 }
 0x833   :  { %v580_v24 = vmul.f32 %v578_v21, %v573_v13 }
 0x835   :  { %v588_v25 = vadd.f32 %v587_v22, %v580_v24  ;;  %598 = vst.msk [vmem:[#allocation2 + $0x4] sm:$0x3] %vm313_vm5, %v580_v24 }
 0x837   :  { %1605 = vmatmul.mubr.msk.f32.vlgmr.msra.gmra.mxu0 %vm178_vm1, %v588_v25 }
 0x838   :  { %1619 = vmatpush3.msra.mxu0 %v1796_v2  ;;  %1626 = vmatprep.mubr.msk.f32.mxu0 %vm1737_vm0, %v1735_v1 }
 0x839   :  { %1620 = vmatprep.subr.mxu0 %v1735_v1 }
 0x83a   :  { %1621 = vmatpush3.msra.mxu0 %v1804_v4 }
 0x83b   :  { %1622 = vmatprep.subr.mxu0 %v1735_v1 }
 0x83c   :  { %1623 = vmatpush3.msra.mxu0 %v1826_v15 }
 0x83d   :  { %1624 = vmatprep.subr.mxu0 %v1735_v1 }
 0x83e   :  { %1625 = vmatpush3.msra.mxu0 %v1847_v23 }
 0x83f   :  { %1640 = vmatprep.subr.mxu0 %v1735_v1 }
 0x8f7   :  { %v668_v26 = vpop.f32.mrf.mxu0 }
 0x8f8   :  { %v673_v27 = vrot.slane %v668_v26, 2 }
 0x8f9   :  { %v1606_v28 = vpop.f32.mrf.mxu0 }
 0x8fa   :  { %v675_v29 = vadd.f32 %v673_v27, %v1892_v39  ;;  %v686_v39 = vpop.permute.xlu0 %685  ;;  %v1496_v28 = vsel %vm979_vm9, 1.0, %v1735_v1 }
 0x8fc   :  { %1695 = vtanh.f32 %v675_v29  ;;  %v1489_v31 = vmul.f32 -1.442695, %v675_v29 }
 0x8fe   :  { %1697 = vpow2.f32 %v1489_v31 }
 0x909   :  { %v1696_v30 = vpop.eup %1695 }
 0x90a   :  { %690 = vrot.lane.b32.xlu1 %v1696_v30, %s1739_s18  ;;  %v993_v30 = vsub.f32 1.0, %v1496_v28 }
 0x90b   :  { %v1698_v32 = vpop.eup %1697 }
 0x90c   :  { %v679_v33 = vadd.f32 1.0, %v1698_v32 }
 0x90e   :  { %1699 = vrcp.f32 %v679_v33 }
 0x91b   :  { %v1700_v34 = vpop.eup %1699 }
 0x91c   :  { %v688_v40 = vmul.f32 %v1700_v34, %v686_v39 }
 0x97c   :  { %v691_v35 = vpop.permute.xlu1 %690 }
 0x97d   :  { %v693_v36 = vmul.f32 %v1700_v34, %v691_v35 }
 0x97f   :  { %695 = vrot.lane.b32.xlu1 %v693_v36, %s1740_s20 }
 0x983   :  { %710 = vperm.xlu1 %1669, %v1490_v38  }
 0x9f1   :  { %v696_v41 = vpop.permute.xlu1 %695 }
 0x9f2   :  { %v698_v43 = vadd.f32 %v696_v41, %v688_v40 }
 0x9f4   :  { %1701 = vtanh.f32 %v698_v43  ;;  %v728_v46 = vrot.slane %v698_v43, 6 }
 0x9fe   :  { %v711_v51 = vpop.permute.xlu1 %710 }
 0xa01   :  { %v1702_v44 = vpop.eup %1701 }
 0xa02   :  { %701 = vrot.lane.b32.xlu0 %v1702_v44, %s1739_s18 }
 0xa06   :  { %722 = vperm.xlu0 %1670, %v719_v45  }
 0xa0a   :  { %729 = vrot.lane.b32.xlu0 %v728_v46, %s1741_s1 }
 0xa74   :  { %v702_v47 = vpop.permute.xlu0 %701 }
 0xa75   :  { %v704_v48 = vmul.f32 %v1700_v34, %v702_v47 }
 0xa77   :  { %v714_v49 = vrot.slane %v704_v48, 6 }
 0xa79   :  { %715 = vrot.lane.b32.xlu1 %v714_v49, %s1740_s20 }
 0xa81   :  { %v723_v50 = vpop.permute.xlu0 %722 }
 0xa82   :  { %v733_v53 = vmul.f32 %v723_v50, %v596_v18  ;;  %v725_v59 = vmul.f32 %v723_v50, %v588_v25 }
 0xa85   :  { %v730_v52 = vpop.permute.xlu0 %729 }
 0xa86   :  { %v732_v54 = vmul.f32 %v730_v52, %v711_v51 }
 0xa88   :  { %v734_v56 = vadd.f32 %v733_v53, %v732_v54 }
 0xa8a   :  { %819 = vrot.lane.b32.xlu0 %v734_v56, %s1740_s20 }
 0xa8e   :  { %851 = vperm.xlu0 %1670, %v848_v57  }
 0xaeb   :  { %v716_v58 = vpop.permute.xlu1 %715 }
 0xaec   :  { %v718_v60 = vmul.f32 %v716_v58, %v711_v51 }
 0xaee   :  { %v726_v61 = vadd.f32 %v725_v59, %v718_v60  ;;  %736 = vst.msk [vmem:[#allocation2 + $0x6] sm:$0x3] %vm313_vm5, %v718_v60 }
 0xaf0   :  { %1616 = vmatmul.mubr.msk.f32.vlgmr.msra.gmra.mxu1 %vm178_vm1, %v726_v61 }
 0xaf1   :  { %1630 = vmatpush3.msra.mxu1 %v1796_v2  ;;  %1637 = vmatprep.mubr.msk.f32.mxu1 %vm1737_vm0, %v1735_v1 }
 0xaf2   :  { %1631 = vmatprep.subr.mxu1 %v1735_v1 }
 0xaf3   :  { %1632 = vmatpush3.msra.mxu1 %v1804_v4 }
 0xaf4   :  { %1633 = vmatprep.subr.mxu1 %v1735_v1 }
 0xaf5   :  { %1634 = vmatpush3.msra.mxu1 %v1826_v15  ;;  %v1282_v42 = vld [vmem:[#allocation2 + $0x6] sm:$0x3] }
 0xaf6   :  { %1635 = vmatprep.subr.mxu1 %v1735_v1 }
 0xaf7   :  { %1636 = vmatpush3.msra.mxu1 %v1847_v23 }
 0xafc   :  { %v820_v12 = vpop.permute.xlu0 %819 }
 0xb09   :  { %v852_v13 = vpop.permute.xlu0 %851 }
 0xb0a   :  { %v854_v14 = vmul.f32 %v852_v13, %v726_v61  ;;  %v861_v29 = vmul.f32 %v852_v13, %v734_v56 }
 0xbb0   :  { %v806_v63 = vpop.f32.mrf.mxu1 }
 0xbb1   :  { %v810_v0 = vadd.f32 %v806_v63, %v1890_v37 }
 0xbb2   :  { %v1617_v3 = vpop.f32.mrf.mxu1 }
 0xbb3   :  { %1703 = vtanh.f32 %v810_v0  ;;  %v1492_v6 = vmul.f32 -1.442695, %v810_v0 }
 0xbb5   :  { %1705 = vpow2.f32 %v1492_v6 }
 0xbc0   :  { %v1704_v5 = vpop.eup %1703 }
 0xbc1   :  { %824 = vrot.lane.b32.xlu1 %v1704_v5, %s1739_s18 }
 0xbc2   :  { %v1706_v7 = vpop.eup %1705 }
 0xbc3   :  { %v814_v8 = vadd.f32 1.0, %v1706_v7 }
 0xbc5   :  { %1707 = vrcp.f32 %v814_v8 }
 0xbd2   :  { %v1708_v9 = vpop.eup %1707 }
 0xbd3   :  { %v822_v16 = vmul.f32 %v1708_v9, %v820_v12 }
 0xc33   :  { %v825_v10 = vpop.permute.xlu1 %824 }
 0xc34   :  { %v827_v11 = vmul.f32 %v1708_v9, %v825_v10 }
 0xc36   :  { %829 = vrot.lane.b32.xlu1 %v827_v11, %s1740_s20 }
 0xc3a   :  { %844 = vperm.xlu1 %1669, %v1493_v55  }
 0xc3e   :  { %856 = vrot.lane.b32.xlu1 %v854_v14, %s1741_s1 }
 0xca8   :  { %v830_v17 = vpop.permute.xlu1 %829 }
 0xca9   :  { %v832_v18 = vadd.f32 %v830_v17, %v822_v16 }
 0xcab   :  { %1709 = vtanh.f32 %v832_v18 }
 0xcb5   :  { %v845_v21 = vpop.permute.xlu1 %844 }
 0xcb6   :  { %v860_v34 = vmul.f32 %v845_v21, %v832_v18  ;;  %v1499_v18 = vsel %vm1125_vm10, 1.0, %v1735_v1 }
 0xcb8   :  { %v1710_v19 = vpop.eup %1709 }
 0xcb9   :  { %835 = vrot.lane.b32.xlu0 %v1710_v19, %s1739_s18  ;;  %v857_v26 = vpop.permute.xlu1 %856 }
 0xd2b   :  { %v836_v22 = vpop.permute.xlu0 %835 }
 0xd2c   :  { %v838_v24 = vmul.f32 %v1708_v9, %v836_v22 }
 0xd2e   :  { %v1998_v25 = vmul.f32 %v845_v21, %v838_v24 }
 0xd30   :  { %v859_v27 = vadd.f32 %v857_v26, %v1998_v25 }
 0xd32   :  { %874 = vrot.lane.b32.xlu0 %v859_v27, %s1740_s20 }
 0xd36   :  { %863 = vrot.lane.b32.xlu0 %v861_v29, %s1740_s20 }
 0xd3a   :  { %996 = vperm.xlu0 %1670, %v993_v30  }
 0xd3e   :  { %984 = vperm.xlu0 %1670, %v1496_v28  }
 0xda4   :  { %v875_v31 = vpop.permute.xlu0 %874 }
 0xda5   :  { %1627 = vmatmul.mubr.msk.f32.vlgmr.msra.gmra.mxu0 %vm178_vm1, %v875_v31 }
 0xda6   :  { %1641 = vmatpush3.msra.mxu0 %v1796_v2  ;;  %1648 = vmatprep.mubr.msk.f32.mxu0 %vm1737_vm0, %v1735_v1 }
 0xda7   :  { %1642 = vmatprep.subr.mxu0 %v1735_v1 }
 0xda8   :  { %1643 = vmatpush3.msra.mxu0 %v1804_v4  ;;  %v864_v32 = vpop.permute.xlu0 %863 }
 0xda9   :  { %1644 = vmatprep.subr.mxu0 %v1735_v1  ;;  %v866_v2 = vadd.f32 %v864_v32, %v860_v34 }
 0xdaa   :  { %1645 = vmatpush3.msra.mxu0 %v1826_v15 }
 0xdab   :  { %1646 = vmatprep.subr.mxu0 %v1735_v1  ;;  %v960_v47 = vrot.slane %v866_v2, 6 }
 0xdac   :  { %1647 = vmatpush3.msra.mxu0 %v1847_v23 }
 0xdb5   :  { %v997_v33 = vpop.permute.xlu0 %996 }
 0xdb6   :  { %v999_v35 = vmul.f32 %v997_v33, %v859_v27  ;;  %v1011_v36 = vmul.f32 %v997_v33, %v866_v2  ;;  %v1139_v27 = vsub.f32 1.0, %v1499_v18 }
 0xdb8   :  { %1001 = vrot.lane.b32.xlu0 %v999_v35, %s1740_s20 }
 0xdb9   :  { %v985_v56 = vpop.permute.xlu0 %984 }
 0xdbc   :  { %1013 = vrot.lane.b32.xlu0 %v1011_v36, %s1741_s1 }
 0xe2a   :  { %v1002_v57 = vpop.permute.xlu0 %1001 }
 0xe2e   :  { %v1014_v0 = vpop.permute.xlu0 %1013 }
 0xe65   :  { %v944_v38 = vpop.f32.mrf.mxu0 }
 0xe66   :  { %v949_v4 = vrot.slane %v944_v38, 6 }
 0xe67   :  { %v1628_v39 = vpop.f32.mrf.mxu0 }
 0xe68   :  { %v951_v40 = vadd.f32 %v949_v4, %v1890_v37 }
 0xe6a   :  { %1711 = vtanh.f32 %v951_v40  ;;  %v1495_v23 = vmul.f32 -1.442695, %v951_v40 }
 0xe6c   :  { %1713 = vpow2.f32 %v1495_v23 }
 0xe77   :  { %v1712_v15 = vpop.eup %1711 }
 0xe78   :  { %964 = vrot.lane.b32.xlu1 %v1712_v15, %s1739_s18 }
 0xe79   :  { %v1714_v41 = vpop.eup %1713 }
 0xe7a   :  { %v955_v43 = vadd.f32 1.0, %v1714_v41 }
 0xe7c   :  { %1715 = vrcp.f32 %v955_v43 }
 0xe89   :  { %v1716_v44 = vpop.eup %1715 }
 0xe8a   :  { %v962_v48 = vmul.f32 %v1716_v44, %v960_v47 }
 0xeea   :  { %v965_v45 = vpop.permute.xlu1 %964 }
 0xeeb   :  { %v967_v46 = vmul.f32 %v1716_v44, %v965_v45 }
 0xeed   :  { %969 = vrot.lane.b32.xlu1 %v967_v46, %s1740_s20 }
 0xf5f   :  { %v970_v49 = vpop.permute.xlu1 %969 }
 0xf60   :  { %v972_v50 = vadd.f32 %v970_v49, %v962_v48 }
 0xf62   :  { %1717 = vtanh.f32 %v972_v50  ;;  %v1006_v55 = vrot.slane %v972_v50, 2 }
 0xf6f   :  { %v1718_v51 = vpop.eup %1717 }
 0xf70   :  { %975 = vrot.lane.b32.xlu1 %v1718_v51, %s1739_s18 }
 0xfe2   :  { %v976_v52 = vpop.permute.xlu1 %975 }
 0xfe3   :  { %v978_v53 = vmul.f32 %v1716_v44, %v976_v52  ;;  %v1502_v52 = vsel %vm1263_vm11, 1.0, %v1735_v1 }
 0xfe5   :  { %v988_v54 = vrot.slane %v978_v53, 2 }
 0xfe7   :  { %989 = vrot.lane.b32.xlu1 %v988_v54, %s1740_s20 }
 0xfeb   :  { %1007 = vrot.lane.b32.xlu1 %v1006_v55, %s1741_s1 }
0x1059   :  { %v990_v58 = vpop.permute.xlu1 %989 }
0x105a   :  { %v992_v59 = vmul.f32 %v990_v58, %v985_v56 }
0x105c   :  { %v1004_v60 = vadd.f32 %v1002_v57, %v992_v59  ;;  %1018 = vst.msk [vmem:[#allocation2 + $0xa] sm:$0x3] %vm313_vm5, %v992_v59  ;;  %v1281_v59 = vld [vmem:[#allocation2 + $0x4] sm:$0x3] }
0x105d   :  { %v1008_v61 = vpop.permute.xlu1 %1007 }
0x105e   :  { %v1010_v63 = vmul.f32 %v1008_v61, %v985_v56  ;;  %1638 = vmatmul.mubr.msk.f32.vlgmr.msra.gmra.mxu1 %vm178_vm1, %v1004_v60  ;;  %v1280_v61 = vld [vmem:[#allocation2 + $0x2] sm:$0x3] }
0x1060   :  { %v1016_v3 = vadd.f32 %v1014_v0, %v1010_v63 }
0x1062   :  { %v1104_v5 = vrot.slane %v1016_v3, 4 }
0x1064   :  { %1105 = vrot.lane.b32.xlu0 %v1104_v5, %s1740_s20  ;;  %v1290_v5 = vld [vmem:[%s2115_s7 + $0x18] sm:$0xff] }
0x1065   :  { %1651 = vmatprep.subr.mxu1 %v1290_v5 }
0x1066   :  { %1652 = vmatpush3.msra.mxu1 %v1290_v5 }
0x10d6   :  { %v1106_v19 = vpop.permute.xlu0 %1105 }
0x111e   :  { %v1088_v6 = vpop.f32.mrf.mxu1 }
0x111f   :  { %v1093_v7 = vrot.slane %v1088_v6, 4  ;;  %v1289_v6 = vld [vmem:[%s2115_s7 + $0x10] sm:$0xff] }
0x1120   :  { %v1639_v8 = vpop.f32.mrf.mxu1  ;;  %1653 = vmatprep.subr.mxu1 %v1289_v6 }
0x1121   :  { %v1095_v9 = vadd.f32 %v1093_v7, %v1890_v37  ;;  %v1288_v7 = vld [vmem:[%s2115_s7 + $0x8] sm:$0xff]  ;;  %1654 = vmatpush3.msra.mxu1 %v1289_v6 }
0x1122   :  { %1655 = vmatprep.subr.mxu1 %v1288_v7 }
0x1123   :  { %1719 = vtanh.f32 %v1095_v9  ;;  %v1498_v11 = vmul.f32 -1.442695, %v1095_v9  ;;  %1656 = vmatpush3.msra.mxu1 %v1288_v7 }
0x1125   :  { %1721 = vpow2.f32 %v1498_v11 }
0x1130   :  { %v1720_v10 = vpop.eup %1719 }
0x1131   :  { %1110 = vrot.lane.b32.xlu1 %v1720_v10, %s1739_s18  ;;  %v1287_v10 = vld [vmem:[%s2115_s7] sm:$0xff] }
0x1132   :  { %v1722_v12 = vpop.eup %1721  ;;  %1657 = vmatprep.subr.mxu1 %v1287_v10 }
0x1133   :  { %v1099_v13 = vadd.f32 1.0, %v1722_v12  ;;  %1658 = vmatpush3.msra.mxu1 %v1287_v10 }
0x1135   :  { %1723 = vrcp.f32 %v1099_v13 }
0x1142   :  { %v1724_v14 = vpop.eup %1723 }
0x1143   :  { %v1108_v21 = vmul.f32 %v1724_v14, %v1106_v19 }
0x11a3   :  { %v1111_v16 = vpop.permute.xlu1 %1110 }
0x11a4   :  { %v1113_v17 = vmul.f32 %v1724_v14, %v1111_v16 }
0x11a6   :  { %1115 = vrot.lane.b32.xlu1 %v1113_v17, %s1740_s20 }
0x11aa   :  { %1130 = vperm.xlu1 %1669, %v1499_v18  }
0x1218   :  { %v1116_v22 = vpop.permute.xlu1 %1115 }
0x1219   :  { %v1118_v24 = vadd.f32 %v1116_v22, %v1108_v21  ;;  %v1284_v21 = vld [vmem:[#allocation2 + $0xa] sm:$0x3] }
0x121b   :  { %1725 = vtanh.f32 %v1118_v24  ;;  %v1148_v28 = vrot.slane %v1118_v24, 4 }
0x1225   :  { %v1131_v33 = vpop.permute.xlu1 %1130 }
0x1228   :  { %v1726_v26 = vpop.eup %1725 }
0x1229   :  { %1121 = vrot.lane.b32.xlu0 %v1726_v26, %s1739_s18 }
0x122d   :  { %1142 = vperm.xlu0 %1670, %v1139_v27  }
0x1231   :  { %1149 = vrot.lane.b32.xlu0 %v1148_v28, %s1741_s1 }
0x129b   :  { %v1122_v29 = vpop.permute.xlu0 %1121 }
0x129c   :  { %v1124_v30 = vmul.f32 %v1724_v14, %v1122_v29 }
0x129e   :  { %v1134_v31 = vrot.slane %v1124_v30, 4 }
0x12a0   :  { %1135 = vrot.lane.b32.xlu1 %v1134_v31, %s1740_s20 }
0x12a8   :  { %v1143_v32 = vpop.permute.xlu0 %1142 }
0x12a9   :  { %v1153_v35 = vmul.f32 %v1143_v32, %v1016_v3  ;;  %v1145_v39 = vmul.f32 %v1143_v32, %v1004_v60  ;;  %v1307_v60 = vcombine.low %v1281_v59, %v1282_v42 }
0x12ab   :  { %v1321_v0 = vrot.slane %v1307_v60, %v1839_v20 }
0x12ac   :  { %v1150_v34 = vpop.permute.xlu0 %1149 }
0x12ad   :  { %v1152_v2 = vmul.f32 %v1150_v34, %v1131_v33 }
0x12af   :  { %v1154_v36 = vadd.f32 %v1153_v35, %v1152_v2 }
0x12b1   :  { %v1242_v38 = vrot.slane %v1154_v36, 2 }
0x12b3   :  { %1243 = vrot.lane.b32.xlu0 %v1242_v38, %s1740_s20 }
0x1312   :  { %v1136_v4 = vpop.permute.xlu1 %1135 }
0x1313   :  { %v1138_v40 = vmul.f32 %v1136_v4, %v1131_v33 }
0x1315   :  { %v1146_v15 = vadd.f32 %v1145_v39, %v1138_v40  ;;  %1156 = vst.msk [vmem:[#allocation2 + $0xc] sm:$0x3] %vm313_vm5, %v1138_v40 }
0x1317   :  { %1649 = vmatmul.mubr.msk.f32.vlgmr.msra.gmra.mxu0 %vm178_vm1, %v1146_v15 }
0x131c   :  { %v1285_v16 = vld [vmem:[#allocation2 + $0xc] sm:$0x3] }
0x13d7   :  { %v1226_v23 = vpop.f32.mrf.mxu0 }
0x13d8   :  { %v1231_v41 = vrot.slane %v1226_v23, 2 }
0x13d9   :  { %v1650_v43 = vpop.f32.mrf.mxu0 }
0x13da   :  { %v1233_v44 = vadd.f32 %v1231_v41, %v1890_v37  ;;  %v1244_v37 = vpop.permute.xlu0 %1243 }
0x13dc   :  { %1727 = vtanh.f32 %v1233_v44  ;;  %v1501_v46 = vmul.f32 -1.442695, %v1233_v44 }
0x13de   :  { %1729 = vpow2.f32 %v1501_v46 }
0x13e9   :  { %v1728_v45 = vpop.eup %1727 }
0x13ea   :  { %1248 = vrot.lane.b32.xlu1 %v1728_v45, %s1739_s18 }
0x13eb   :  { %v1730_v47 = vpop.eup %1729 }
0x13ec   :  { %v1237_v48 = vadd.f32 1.0, %v1730_v47 }
0x13ee   :  { %1731 = vrcp.f32 %v1237_v48 }
0x13fb   :  { %v1732_v49 = vpop.eup %1731 }
0x13fc   :  { %v1246_v53 = vmul.f32 %v1732_v49, %v1244_v37 }
0x145c   :  { %v1249_v50 = vpop.permute.xlu1 %1248 }
0x145d   :  { %v1251_v51 = vmul.f32 %v1732_v49, %v1249_v50 }
0x145f   :  { %1253 = vrot.lane.b32.xlu1 %v1251_v51, %s1740_s20 }
0x1463   :  { %1268 = vperm.xlu1 %1669, %v1502_v52  }
0x1467   :  { %310 = vrot.lane.b32.xlu1 %v1911_v62, %s1740_s20 }
0x14d1   :  { %v1254_v54 = vpop.permute.xlu1 %1253 }
0x14d2   :  { %v1256_v55 = vadd.f32 %v1254_v54, %v1246_v53 }
0x14d4   :  { %1733 = vtanh.f32 %v1256_v55 }
0x14de   :  { %v1269_v56 = vpop.permute.xlu1 %1268 }
0x14e1   :  { %v1734_v57 = vpop.eup %1733 }
0x14e2   :  { %v311_v58 = vpop.permute.xlu1 %310  ;;  %1259 = vrot.lane.b32.xlu0 %v1734_v57, %s1739_s18 }
0x14e3   :  { %314 = vst.msk [vmem:[#allocation2] sm:$0x3] %vm313_vm5, %v311_v58 }
0x14ea   :  { %v1279_v1 = vld [vmem:[#allocation2] sm:$0x3] }
0x14eb   :  { %v1306_v63 = vcombine.low %v1279_v1, %v1280_v61 }
0x14ed   :  { %v1314_v62 = vrot.slane %v1306_v63, %v1839_v20 }
0x14ef   :  { %v1322_v3 = vcombine.low %v1314_v62, %v1321_v0 }
0x14f1   :  { %1659 = vmatprep.mubr.msk.f32.mxu1 %vm178_vm1, %v1322_v3 }
0x1554   :  { %v1260_v8 = vpop.permute.xlu0 %1259 }
0x1555   :  { %v1262_v9 = vmul.f32 %v1732_v49, %v1260_v8 }
0x1557   :  { %v1272_v11 = vrot.slane %v1262_v9, 6 }
0x1559   :  { %1273 = vrot.lane.b32.xlu0 %v1272_v11, %s1740_s20 }
0x155d   :  { %868 = vrot.lane.b32.xlu0 %v1998_v25, %s1740_s20  ;;  %v1503_v25 = vld [vmem:[%s2116_s8] ss:$0 sm:$0xff] }
0x15cb   :  { %v1274_v12 = vpop.permute.xlu0 %1273 }
0x15cc   :  { %v1276_v13 = vmul.f32 %v1274_v12, %v1269_v56 }
0x15ce   :  { %1278 = vst.msk [vmem:[#allocation2 + $0xe] sm:$0x3] %vm313_vm5, %v1276_v13 }
0x15cf   :  { %v869_v14 = vpop.permute.xlu0 %868 }
0x15d0   :  { %872 = vst.msk [vmem:[#allocation2 + $0x8] sm:$0x3] %vm313_vm5, %v869_v14 }
0x15d5   :  { %v1286_v17 = vld [vmem:[#allocation2 + $0xe] sm:$0x3] }
0x15d6   :  { %v1324_v18 = vcombine.low %v1285_v16, %v1286_v17 }
0x15d7   :  { %v1283_v19 = vld [vmem:[#allocation2 + $0x8] sm:$0x3] }
0x15d8   :  { %v1323_v22 = vcombine.low %v1283_v19, %v1284_v21  ;;  %v1338_v26 = vrot.slane %v1324_v18, %v1839_v20 }
0x15da   :  { %v1331_v24 = vrot.slane %v1323_v22, %v1839_v20 }
0x15dc   :  { %v1339_v27 = vcombine.low %v1331_v24, %v1338_v26 }
0x15de   :  { %1660 = vmatmul.mubr.msk.f32.vlgmr.msra.gmra.mxu1 %vm178_vm1, %v1339_v27 }
0x169e   :  { %v1661_v28 = vpop.f32.mrf.mxu1 }
0x169f   :  { %v1416_v29 = vadd.f32 %v1661_v28, %v1503_v25 }
0x16a0   :  { %v1410_v30 = vpop.f32.mrf.mxu1 }
0x16a1   :  { %v1438_v31 = vcombine.high %v1416_v29, %v1416_v29  ;;  %v1445_v32 = vrot.slane %v1416_v29, %v1839_v20  ;;  %v1411_v33 = vadd.f32 %v1503_v25, %v1410_v30 }
0x16a3   :  { %v1452_v34 = vrot.slane %v1438_v31, %v1839_v20  ;;  %v1453_v35 = vcombine.high %v1445_v32, %v1445_v32  ;;  %1468 = vst.msk [vmem:[%s2117_s9 + $0x8] sm:$0x3] %vm1463_vm12, %v1445_v32  ;;  %v1421_v2 = vcombine.high %v1411_v33, %v1411_v33  ;;  %v1428_v36 = vrot.slane %v1411_v33, %v1839_v20 }
0x16a5   :  { %v1454_v38 = vcombine.high %v1452_v34, %v1452_v34  ;;  %1469 = vst.msk [vmem:[%s2117_s9 + $0xa] sm:$0x3] %vm1463_vm12, %v1453_v35  ;;  %1470 = vst.msk [vmem:[%s2117_s9 + $0xc] sm:$0x3] %vm1463_vm12, %v1452_v34  ;;  %v1435_v4 = vrot.slane %v1421_v2, %v1839_v20  ;;  %v1436_v39 = vcombine.high %v1428_v36, %v1428_v36 }
0x16a6   :  { %1464 = vst.msk [vmem:[%s2117_s9] sm:$0x3] %vm1463_vm12, %v1428_v36 }
0x16a7   :  { %1471 = vst.msk [vmem:[%s2117_s9 + $0xe] sm:$0x3] %vm1463_vm12, %v1454_v38  ;;  %v1437_v40 = vcombine.high %v1435_v4, %v1435_v4  ;;  %1465 = vst.msk [vmem:[%s2117_s9 + $0x2] sm:$0x3] %vm1463_vm12, %v1436_v39 }
0x16a8   :  { %1466 = vst.msk [vmem:[%s2117_s9 + $0x4] sm:$0x3] %vm1463_vm12, %v1435_v4 }
0x16a9   :  { %1467 = vst.msk [vmem:[%s2117_s9 + $0x6] sm:$0x3] %vm1463_vm12, %v1437_v40 }

</bundles_post_ra>
